<compile_context>
chip_gen: v5e
topology: v5e:2x2
jax: 0.10.0
libtpu: 0.0.40
codegen_flags: <defaults>
</compile_context>

<pallas_src>
import functools

import jax
import jax.numpy as jnp
from jax import lax
from jax.experimental import pallas as pl
from jax.experimental.pallas import tpu as pltpu

F32 = jnp.float32

_GATE_ORDER = (0, 1, 3, 2)   # PyTorch packs [i, f, g, o]; kernel wants [i, f, o, g]


# ---------------------------------------------------------------------------
# Fused kernel (grid-less; everything lives in VMEM / SMEM)
# ---------------------------------------------------------------------------
def _make_kernel(n, din, h1, h2, hl, e):
    three_hl = 3 * hl

    def kernel(ea_ref, x_ref, wslab_ref, rows_ref, o_ref):
        f32 = jnp.float32

        # ---- static slices of the two packed slabs (2 DMAs instead of ~20) ----
        r = 0
        w0t = wslab_ref[r:r + din, 0:h1]; r += din            # (DIN, H1)
        w1t = wslab_ref[r:r + din, 0:h1]; r += din            # (DIN, H1)
        wih_a = wslab_ref[r:r + h1, :]; r += h1               # (H1, 4*HL)
        wih_b = wslab_ref[r:r + h1, :]; r += h1               # (H1, 4*HL)
        whh = wslab_ref[r:r + hl, :]; r += hl                 # (HL, 4*HL) loaded once
        wat = wslab_ref[r:r + h1, 0:h2]; r += h1              # (H1, H2)

        lstmb = rows_ref[0:1, :]                               # (1, 4*HL)
        chebb = rows_ref[1:2, 0:h1]                            # (1, H1)
        wbt_cs = rows_ref[2:3, 0:h2]                           # (1, H2) rowsum(Wb)
        att_src = rows_ref[3:4, 0:h2]                          # (1, H2)
        att_dst = rows_ref[4:5, 0:h2]                          # (1, H2)
        gat_b = rows_ref[5:6, 0:h2]                            # (1, H2)
        lin_w = rows_ref[6:7, 0:h2]                            # (1, H2)
        lin_b = rows_ref[7:8, 0:1]                             # (1, 1)

        # ---- build dense graph operators from the SMEM edge list -------------
        tgt_nn = lax.broadcasted_iota(jnp.int32, (n, n), 0)    # row = tgt node id
        src_nn = lax.broadcasted_iota(jnp.int32, (n, n), 1)    # col = src node id
        eid_en = lax.broadcasted_iota(jnp.int32, (e, n), 0)    # edge id
        nid_en = lax.broadcasted_iota(jnp.int32, (e, n), 1)    # node id
        nid_nh = lax.broadcasted_iota(jnp.int32, (n, hl), 0)   # node id
        eid_nh = lax.broadcasted_iota(jnp.int32, (n, hl), 1)   # edge id
        nid_n1 = lax.broadcasted_iota(jnp.int32, (n, 1), 0)    # node id

        adj_ns = jnp.zeros((n, n), f32)   # non-self edge multiplicity at [tgt, src]
        deg = jnp.zeros((n, 1), f32)      # out-degree over non-self edges
        sel_a = jnp.zeros((e, n), f32)    # one-hot: LSTM-sequence source nodes
        sel_b = jnp.zeros((e, n), f32)    # one-hot: LSTM-sequence target nodes
        incT = jnp.zeros((n, hl), f32)    # node x edge incidence (self edge -> 2)

        for ei in range(e):               # static unroll over SMEM scalars
            s = ea_ref[ei]                # edge_index[0, ei]  (edge_attr.reshape(2,-1))
            t = ea_ref[e + ei]            # edge_index[1, ei]
            a = ea_ref[2 * ei]            # edge_sequence[0, ei] (edge_attr.view(-1,2).t())
            b = ea_ref[2 * ei + 1]        # edge_sequence[1, ei]
            nsf = jnp.where(s != t, 1.0, 0.0)                  # scalar: non-self edge
            adj_ns = adj_ns + nsf * jnp.where((tgt_nn == t) & (src_nn == s), 1.0, 0.0)
            deg = deg + nsf * jnp.where(nid_n1 == s, 1.0, 0.0)
            sel_a = jnp.where((eid_en == ei) & (nid_en == a), 1.0, sel_a)
            sel_b = jnp.where((eid_en == ei) & (nid_en == b), 1.0, sel_b)
            incT = incT + (jnp.where((eid_nh == ei) & (nid_nh == s), 1.0, 0.0)
                           + jnp.where((eid_nh == ei) & (nid_nh == t), 1.0, 0.0))

        # ---- ChebConv(K=2, sym norm, lambda_max=2) + ReLU ---------------------
        x = x_ref[...]                                          # (N, DIN)
        dinv = jnp.where(deg > 0.0, lax.rsqrt(jnp.maximum(deg, 1.0)), 0.0)   # (N, 1)
        # L_hat @ x = -D^{-1/2} A D^{-1/2} x  computed without materializing L_hat
        lx = -dinv * jnp.dot(adj_ns, dinv * x, preferred_element_type=f32)
        x1 = (jnp.dot(x, w0t, preferred_element_type=f32)
              + jnp.dot(lx, w1t, preferred_element_type=f32) + chebb)
        x1 = jnp.maximum(x1, 0.0)                               # (N, H1)
        # TODO(synk): F.dropout(p=0.5, training=True) treated as identity (eval mode).

        # ---- LSTM over the edge-feature sequence ------------------------------
        xs = jnp.dot(sel_a, x1, preferred_element_type=f32)     # (E, H1) = x1[seq[0]]
        xt = jnp.dot(sel_b, x1, preferred_element_type=f32)     # (E, H1) = x1[seq[1]]
        xproj = (jnp.dot(xs, wih_a, preferred_element_type=f32)
                 + jnp.dot(xt, wih_b, preferred_element_type=f32)
                 + lstmb)                                       # (E, 4*HL), gates [i,f,o,g]
        h = jnp.zeros((1, hl), f32)
        c = jnp.zeros((1, hl), f32)
        for step in range(e):             # static unroll; one (1,HL)@(HL,4HL) per step
            z = xproj[step:step + 1, :] + jnp.dot(h, whh, preferred_element_type=f32)
            sig = jax.nn.sigmoid(z[:, :three_hl])               # i | f | o (contiguous)
            g_g = jnp.tanh(z[:, three_hl:])                     # g
            i_g = sig[:, :hl]
            f_g = sig[:, hl:2 * hl]
            o_g = sig[:, 2 * hl:]
            c = f_g * c + i_g * g_g
            h = o_g * jnp.tanh(c)                               # (1, HL)

        # ---- edge -> node aggregation (h_n is 1-D: one scalar per edge) -------
        cnt = jnp.sum(incT, axis=1, keepdims=True)
        cnt = jnp.where(cnt == 0.0, 1.0, cnt)
        val = jnp.sum(incT * h, axis=1, keepdims=True) / cnt    # (N, 1)

        # ---- GATConv (1 head, dense masked softmax w/ multiplicities) + ReLU --
        # concat([x1, agg]) @ W^T == x1 @ Wa^T + val * rowsum(Wb)   (agg is rank-1)
        xp = jnp.dot(x1, wat, preferred_element_type=f32) + val * wbt_cs   # (N, H2)
        a_s = jnp.sum(xp * att_src, axis=1)                     # (N,)
        a_d = jnp.sum(xp * att_dst, axis=1)                     # (N,)
        e_att = a_d[:, None] + a_s[None, :]                     # e[dst, src]
        e_att = jnp.where(e_att >= 0.0, e_att, 0.2 * e_att)     # leaky_relu(0.2)
        adjcnt = adj_ns + jnp.where(tgt_nn == src_nn, 1.0, 0.0)  # + self loops
        e_m = jnp.where(adjcnt > 0.0, e_att, -1e30)
        m = jnp.max(e_m, axis=1, keepdims=True)
        p = adjcnt * jnp.exp(e_m - m)
        alpha = p / jnp.sum(p, axis=1, keepdims=True)
        gat = jnp.dot(alpha, xp, preferred_element_type=f32) + gat_b
        gat = jnp.maximum(gat, 0.0)                             # (N, H2)

        # ---- global_mean_pool + Linear(H2 -> 1) --------------------------------
        pooled = jnp.sum(gat, axis=0, keepdims=True) * (1.0 / n)            # (1, H2)
        o_ref[...] = jnp.sum(pooled * lin_w, axis=1, keepdims=True) + lin_b  # (1, 1)

    return kernel


# ---------------------------------------------------------------------------
# One-time weight packing (host-side prep, outside the jitted forward)
# ---------------------------------------------------------------------------
def _pack_gates_w(w, hl):
    # torch (4*HL, K) -> (K, 4*HL) with gates reordered to [i, f, o, g]
    return jnp.concatenate([w[g * hl:(g + 1) * hl] for g in _GATE_ORDER], axis=0).T


def _pack_gates_b(b_ih, b_hh, hl):
    bsum = b_ih + b_hh
    return jnp.concatenate([bsum[g * hl:(g + 1) * hl] for g in _GATE_ORDER],
                           axis=0)[None, :]


def pack_params(params):
    h1, din = params["cheb_w0"].shape
    h2 = params["gat_w"].shape[0]
    hl = params["lstm_w_hh"].shape[1]
    lane = 4 * hl
    assert lane >= max(h1, h2), "lane width (4*HL) must cover H1 and H2"

    def lane_pad(a):
        a = jnp.asarray(a, F32)
        return jnp.pad(a, ((0, 0), (0, lane - a.shape[1])))

    wih = _pack_gates_w(jnp.asarray(params["lstm_w_ih"], F32), hl)   # (2*H1, 4*HL)
    wslab = jnp.concatenate([
        lane_pad(params["cheb_w0"].T),                       # rows [0, DIN)
        lane_pad(params["cheb_w1"].T),                       # rows [DIN, 2*DIN)
        wih[:h1],                                            # (H1, 4*HL)
        wih[h1:],                                            # (H1, 4*HL)
        _pack_gates_w(jnp.asarray(params["lstm_w_hh"], F32), hl),    # (HL, 4*HL)
        lane_pad(params["gat_w"][:, :h1].T),                 # (H1, H2) padded
    ], axis=0)                                               # (2*DIN+2*H1+HL+H1, 4*HL)

    def row_pad(a):
        a = jnp.asarray(a, F32).reshape(1, -1)
        return jnp.pad(a, ((0, 0), (0, lane - a.shape[1])))

    wbt_cs = jnp.sum(params["gat_w"][:, h1:], axis=1)        # rowsum of Wb -> (H2,)
    rowslab = jnp.concatenate([
        jnp.asarray(_pack_gates_b(params["lstm_b_ih"], params["lstm_b_hh"], hl), F32),
        row_pad(params["cheb_b"]),
        row_pad(wbt_cs),
        row_pad(params["gat_att_src"]),
        row_pad(params["gat_att_dst"]),
        row_pad(params["gat_b"]),
        row_pad(params["lin_w"]),
        row_pad(params["lin_b"]),
    ], axis=0)                                               # (8, 4*HL)

    dims = (int(din), int(h1), int(h2), int(hl))
    return wslab, rowslab, dims


# ---------------------------------------------------------------------------
# Forward pass: one pallas_call, 4 inputs (edge list in SMEM, x + 2 slabs in VMEM)
# ---------------------------------------------------------------------------
@functools.partial(jax.jit, static_argnames=("dims",))
def sequential_lstm_gnn_forward(x, edge_attr, wslab, rowslab, dims):
    din, h1, h2, hl = dims
    n = x.shape[0]
    e = edge_attr.shape[0] // 2
    assert e <= hl, "torch indexes h_n per edge -> requires E <= lstm_hidden_dim"

    kernel = _make_kernel(n, din, h1, h2, hl, e)
    vmem = pl.BlockSpec(memory_space=pltpu.MemorySpace.VMEM)
    smem = pl.BlockSpec(memory_space=pltpu.MemorySpace.SMEM)
    return pl.pallas_call(
        kernel,
        out_shape=jax.ShapeDtypeStruct((1, 1), F32),
        in_specs=[smem, vmem, vmem, vmem],
        out_specs=vmem,
    )(edge_attr.astype(jnp.int32), x.astype(F32), wslab, rowslab)


# ---------------------------------------------------------------------------
if __name__ == "__main__":
    # small shapes consistent with the module
    N, DIN, H1, H2, HL = 12, 16, 16, 8, 32
    E = 16          # must satisfy E <= HL (torch code indexes h_n per edge)
    key = jax.random.PRNGKey(0)
    ks = list(jax.random.split(key, 16))

    def rnd(k, shape, s=0.1):
        return (s * jax.random.normal(k, shape)).astype(F32)

    params = {
        "cheb_w0": rnd(ks[0], (H1, DIN)),
        "cheb_w1": rnd(ks[1], (H1, DIN)),
        "cheb_b": rnd(ks[2], (H1,)),
        "lstm_w_ih": rnd(ks[3], (4 * HL, 2 * H1)),
        "lstm_w_hh": rnd(ks[4], (4 * HL, HL)),
        "lstm_b_ih": rnd(ks[5], (4 * HL,)),
        "lstm_b_hh": rnd(ks[6], (4 * HL,)),
        "gat_w": rnd(ks[7], (H2, H1 + HL)),
        "gat_att_src": rnd(ks[8], (H2,)),
        "gat_att_dst": rnd(ks[9], (H2,)),
        "gat_b": rnd(ks[10], (H2,)),
        "lin_w": rnd(ks[11], (1, H2)),
        "lin_b": rnd(ks[12], (1,)),
    }

    x = rnd(ks[13], (N, DIN), s=1.0)
    edge_attr = jax.random.randint(ks[14], (2 * E,), 0, N, dtype=jnp.int32)

    wslab, rowslab, dims = pack_params(params)        # one-time weight prep
    out = sequential_lstm_gnn_forward(x, edge_attr, wslab, rowslab, dims)
    out = jax.block_until_ready(out)
    assert out.shape == (1, 1) and bool(jnp.all(jnp.isfinite(out)))
    print("KERNEL_OK")
</pallas_src>

<mosaic_0001>
module attributes {stable_mosaic.version = 11 : i64} {
  func.func @kernel(%arg0: memref<32xi32, #tpu.memory_space<smem>>, %arg1: memref<12x16xf32, #tpu.memory_space<vmem>>, %arg2: memref<112x128xf32, #tpu.memory_space<vmem>>, %arg3: memref<8x128xf32, #tpu.memory_space<vmem>>, %arg4: memref<1x1xf32, #tpu.memory_space<vmem>>) attributes {dimension_semantics = [], scalar_prefetch = 0 : i64, scratch_operands = 0 : i64, tpu.core_type = #tpu.core_type<tc>} {
    %c0 = arith.constant 0 : index
    %c0_0 = arith.constant 0 : index
    %0 = vector.load %arg2[%c0, %c0_0] : memref<112x128xf32, #tpu.memory_space<vmem>>, vector<16x16xf32>
    %c16 = arith.constant 16 : index
    %c0_1 = arith.constant 0 : index
    %1 = vector.load %arg2[%c16, %c0_1] : memref<112x128xf32, #tpu.memory_space<vmem>>, vector<16x16xf32>
    %c32 = arith.constant 32 : index
    %c0_2 = arith.constant 0 : index
    %2 = vector.load %arg2[%c32, %c0_2] : memref<112x128xf32, #tpu.memory_space<vmem>>, vector<16x128xf32>
    %c48 = arith.constant 48 : index
    %c0_3 = arith.constant 0 : index
    %3 = vector.load %arg2[%c48, %c0_3] : memref<112x128xf32, #tpu.memory_space<vmem>>, vector<16x128xf32>
    %c64 = arith.constant 64 : index
    %c0_4 = arith.constant 0 : index
    %4 = vector.load %arg2[%c64, %c0_4] : memref<112x128xf32, #tpu.memory_space<vmem>>, vector<32x128xf32>
    %c96 = arith.constant 96 : index
    %c0_5 = arith.constant 0 : index
    %5 = vector.load %arg2[%c96, %c0_5] : memref<112x128xf32, #tpu.memory_space<vmem>>, vector<16x8xf32>
    %c0_6 = arith.constant 0 : index
    %c0_7 = arith.constant 0 : index
    %6 = vector.load %arg3[%c0_6, %c0_7] : memref<8x128xf32, #tpu.memory_space<vmem>>, vector<1x128xf32>
    %c1 = arith.constant 1 : index
    %c0_8 = arith.constant 0 : index
    %7 = vector.load %arg3[%c1, %c0_8] : memref<8x128xf32, #tpu.memory_space<vmem>>, vector<1x16xf32>
    %c2 = arith.constant 2 : index
    %c0_9 = arith.constant 0 : index
    %8 = vector.load %arg3[%c2, %c0_9] : memref<8x128xf32, #tpu.memory_space<vmem>>, vector<1x8xf32>
    %c3 = arith.constant 3 : index
    %c0_10 = arith.constant 0 : index
    %9 = vector.load %arg3[%c3, %c0_10] : memref<8x128xf32, #tpu.memory_space<vmem>>, vector<1x8xf32>
    %c4 = arith.constant 4 : index
    %c0_11 = arith.constant 0 : index
    %10 = vector.load %arg3[%c4, %c0_11] : memref<8x128xf32, #tpu.memory_space<vmem>>, vector<1x8xf32>
    %c5 = arith.constant 5 : index
    %c0_12 = arith.constant 0 : index
    %11 = vector.load %arg3[%c5, %c0_12] : memref<8x128xf32, #tpu.memory_space<vmem>>, vector<1x8xf32>
    %c6 = arith.constant 6 : index
    %c0_13 = arith.constant 0 : index
    %12 = vector.load %arg3[%c6, %c0_13] : memref<8x128xf32, #tpu.memory_space<vmem>>, vector<1x8xf32>
    %c7 = arith.constant 7 : index
    %c0_14 = arith.constant 0 : index
    %13 = vector.load %arg3[%c7, %c0_14] : memref<8x128xf32, #tpu.memory_space<vmem>>, vector<1x1xf32>
    %14 = tpu.iota {dimensions = array<i32: 0>} : vector<12x12xi32>
    %15 = tpu.iota {dimensions = array<i32: 1>} : vector<12x12xi32>
    %16 = tpu.iota {dimensions = array<i32: 0>} : vector<16x12xi32>
    %17 = tpu.iota {dimensions = array<i32: 1>} : vector<16x12xi32>
    %18 = tpu.iota {dimensions = array<i32: 0>} : vector<12x32xi32>
    %19 = tpu.iota {dimensions = array<i32: 1>} : vector<12x32xi32>
    %20 = tpu.iota {dimensions = array<i32: 0>} : vector<12x1xi32>
    %cst = arith.constant 0.000000e+00 : f32
    %21 = vector.broadcast %cst : f32 to vector<12x12xf32>
    %cst_15 = arith.constant 0.000000e+00 : f32
    %22 = vector.broadcast %cst_15 : f32 to vector<12x1xf32>
    %cst_16 = arith.constant 0.000000e+00 : f32
    %23 = vector.broadcast %cst_16 : f32 to vector<16x12xf32>
    %cst_17 = arith.constant 0.000000e+00 : f32
    %24 = vector.broadcast %cst_17 : f32 to vector<16x12xf32>
    %cst_18 = arith.constant 0.000000e+00 : f32
    %25 = vector.broadcast %cst_18 : f32 to vector<12x32xf32>
    %c0_19 = arith.constant 0 : index
    %26 = memref.load %arg0[%c0_19] : memref<32xi32, #tpu.memory_space<smem>>
    %c16_20 = arith.constant 16 : index
    %27 = memref.load %arg0[%c16_20] : memref<32xi32, #tpu.memory_space<smem>>
    %c0_21 = arith.constant 0 : index
    %28 = memref.load %arg0[%c0_21] : memref<32xi32, #tpu.memory_space<smem>>
    %c1_22 = arith.constant 1 : index
    %29 = memref.load %arg0[%c1_22] : memref<32xi32, #tpu.memory_space<smem>>
    %30 = arith.cmpi ne, %26, %27 : i32
    %cst_23 = arith.constant 1.000000e+00 : f32
    %cst_24 = arith.constant 0.000000e+00 : f32
    %31 = arith.select %30, %cst_23, %cst_24 : f32
    %32 = vector.broadcast %27 : i32 to vector<12x12xi32>
    %33 = arith.cmpi eq, %14, %32 : vector<12x12xi32>
    %34 = vector.broadcast %26 : i32 to vector<12x12xi32>
    %35 = arith.cmpi eq, %15, %34 : vector<12x12xi32>
    %36 = arith.andi %33, %35 : vector<12x12xi1>
    %cst_25 = arith.constant 1.000000e+00 : f32
    %cst_26 = arith.constant 0.000000e+00 : f32
    %37 = vector.broadcast %cst_25 : f32 to vector<12x12xf32>
    %38 = vector.broadcast %cst_26 : f32 to vector<12x12xf32>
    %39 = arith.select %36, %37, %38 : vector<12x12xi1>, vector<12x12xf32>
    %40 = vector.broadcast %31 : f32 to vector<12x12xf32>
    %41 = arith.mulf %40, %39 : vector<12x12xf32>
    %42 = arith.addf %21, %41 : vector<12x12xf32>
    %43 = vector.broadcast %26 : i32 to vector<12x1xi32>
    %44 = arith.cmpi eq, %20, %43 : vector<12x1xi32>
    %cst_27 = arith.constant 1.000000e+00 : f32
    %cst_28 = arith.constant 0.000000e+00 : f32
    %45 = vector.broadcast %cst_27 : f32 to vector<12x1xf32>
    %46 = vector.broadcast %cst_28 : f32 to vector<12x1xf32>
    %47 = arith.select %44, %45, %46 : vector<12x1xi1>, vector<12x1xf32>
    %48 = vector.broadcast %31 : f32 to vector<12x1xf32>
    %49 = arith.mulf %48, %47 : vector<12x1xf32>
    %50 = arith.addf %22, %49 : vector<12x1xf32>
    %c0_i32 = arith.constant 0 : i32
    %51 = vector.broadcast %c0_i32 : i32 to vector<16x12xi32>
    %52 = arith.cmpi eq, %16, %51 : vector<16x12xi32>
    %53 = vector.broadcast %28 : i32 to vector<16x12xi32>
    %54 = arith.cmpi eq, %17, %53 : vector<16x12xi32>
    %55 = arith.andi %52, %54 : vector<16x12xi1>
    %cst_29 = arith.constant 1.000000e+00 : f32
    %56 = vector.broadcast %cst_29 : f32 to vector<16x12xf32>
    %57 = arith.select %55, %56, %23 : vector<16x12xi1>, vector<16x12xf32>
    %c0_i32_30 = arith.constant 0 : i32
    %58 = vector.broadcast %c0_i32_30 : i32 to vector<16x12xi32>
    %59 = arith.cmpi eq, %16, %58 : vector<16x12xi32>
    %60 = vector.broadcast %29 : i32 to vector<16x12xi32>
    %61 = arith.cmpi eq, %17, %60 : vector<16x12xi32>
    %62 = arith.andi %59, %61 : vector<16x12xi1>
    %cst_31 = arith.constant 1.000000e+00 : f32
    %63 = vector.broadcast %cst_31 : f32 to vector<16x12xf32>
    %64 = arith.select %62, %63, %24 : vector<16x12xi1>, vector<16x12xf32>
    %c0_i32_32 = arith.constant 0 : i32
    %65 = vector.broadcast %c0_i32_32 : i32 to vector<12x32xi32>
    %66 = arith.cmpi eq, %19, %65 : vector<12x32xi32>
    %67 = vector.broadcast %26 : i32 to vector<12x32xi32>
    %68 = arith.cmpi eq, %18, %67 : vector<12x32xi32>
    %69 = arith.andi %66, %68 : vector<12x32xi1>
    %cst_33 = arith.constant 1.000000e+00 : f32
    %cst_34 = arith.constant 0.000000e+00 : f32
    %70 = vector.broadcast %cst_33 : f32 to vector<12x32xf32>
    %71 = vector.broadcast %cst_34 : f32 to vector<12x32xf32>
    %72 = arith.select %69, %70, %71 : vector<12x32xi1>, vector<12x32xf32>
    %c0_i32_35 = arith.constant 0 : i32
    %73 = vector.broadcast %c0_i32_35 : i32 to vector<12x32xi32>
    %74 = arith.cmpi eq, %19, %73 : vector<12x32xi32>
    %75 = vector.broadcast %27 : i32 to vector<12x32xi32>
    %76 = arith.cmpi eq, %18, %75 : vector<12x32xi32>
    %77 = arith.andi %74, %76 : vector<12x32xi1>
    %cst_36 = arith.constant 1.000000e+00 : f32
    %cst_37 = arith.constant 0.000000e+00 : f32
    %78 = vector.broadcast %cst_36 : f32 to vector<12x32xf32>
    %79 = vector.broadcast %cst_37 : f32 to vector<12x32xf32>
    %80 = arith.select %77, %78, %79 : vector<12x32xi1>, vector<12x32xf32>
    %81 = arith.addf %72, %80 : vector<12x32xf32>
    %82 = arith.addf %25, %81 : vector<12x32xf32>
    %c1_38 = arith.constant 1 : index
    %83 = memref.load %arg0[%c1_38] : memref<32xi32, #tpu.memory_space<smem>>
    %c17 = arith.constant 17 : index
    %84 = memref.load %arg0[%c17] : memref<32xi32, #tpu.memory_space<smem>>
    %c2_39 = arith.constant 2 : index
    %85 = memref.load %arg0[%c2_39] : memref<32xi32, #tpu.memory_space<smem>>
    %c3_40 = arith.constant 3 : index
    %86 = memref.load %arg0[%c3_40] : memref<32xi32, #tpu.memory_space<smem>>
    %87 = arith.cmpi ne, %83, %84 : i32
    %cst_41 = arith.constant 1.000000e+00 : f32
    %cst_42 = arith.constant 0.000000e+00 : f32
    %88 = arith.select %87, %cst_41, %cst_42 : f32
    %89 = vector.broadcast %84 : i32 to vector<12x12xi32>
    %90 = arith.cmpi eq, %14, %89 : vector<12x12xi32>
    %91 = vector.broadcast %83 : i32 to vector<12x12xi32>
    %92 = arith.cmpi eq, %15, %91 : vector<12x12xi32>
    %93 = arith.andi %90, %92 : vector<12x12xi1>
    %cst_43 = arith.constant 1.000000e+00 : f32
    %cst_44 = arith.constant 0.000000e+00 : f32
    %94 = vector.broadcast %cst_43 : f32 to vector<12x12xf32>
    %95 = vector.broadcast %cst_44 : f32 to vector<12x12xf32>
    %96 = arith.select %93, %94, %95 : vector<12x12xi1>, vector<12x12xf32>
    %97 = vector.broadcast %88 : f32 to vector<12x12xf32>
    %98 = arith.mulf %97, %96 : vector<12x12xf32>
    %99 = arith.addf %42, %98 : vector<12x12xf32>
    %100 = vector.broadcast %83 : i32 to vector<12x1xi32>
    %101 = arith.cmpi eq, %20, %100 : vector<12x1xi32>
    %cst_45 = arith.constant 1.000000e+00 : f32
    %cst_46 = arith.constant 0.000000e+00 : f32
    %102 = vector.broadcast %cst_45 : f32 to vector<12x1xf32>
    %103 = vector.broadcast %cst_46 : f32 to vector<12x1xf32>
    %104 = arith.select %101, %102, %103 : vector<12x1xi1>, vector<12x1xf32>
    %105 = vector.broadcast %88 : f32 to vector<12x1xf32>
    %106 = arith.mulf %105, %104 : vector<12x1xf32>
    %107 = arith.addf %50, %106 : vector<12x1xf32>
    %c1_i32 = arith.constant 1 : i32
    %108 = vector.broadcast %c1_i32 : i32 to vector<16x12xi32>
    %109 = arith.cmpi eq, %16, %108 : vector<16x12xi32>
    %110 = vector.broadcast %85 : i32 to vector<16x12xi32>
    %111 = arith.cmpi eq, %17, %110 : vector<16x12xi32>
    %112 = arith.andi %109, %111 : vector<16x12xi1>
    %cst_47 = arith.constant 1.000000e+00 : f32
    %113 = vector.broadcast %cst_47 : f32 to vector<16x12xf32>
    %114 = arith.select %112, %113, %57 : vector<16x12xi1>, vector<16x12xf32>
    %c1_i32_48 = arith.constant 1 : i32
    %115 = vector.broadcast %c1_i32_48 : i32 to vector<16x12xi32>
    %116 = arith.cmpi eq, %16, %115 : vector<16x12xi32>
    %117 = vector.broadcast %86 : i32 to vector<16x12xi32>
    %118 = arith.cmpi eq, %17, %117 : vector<16x12xi32>
    %119 = arith.andi %116, %118 : vector<16x12xi1>
    %cst_49 = arith.constant 1.000000e+00 : f32
    %120 = vector.broadcast %cst_49 : f32 to vector<16x12xf32>
    %121 = arith.select %119, %120, %64 : vector<16x12xi1>, vector<16x12xf32>
    %c1_i32_50 = arith.constant 1 : i32
    %122 = vector.broadcast %c1_i32_50 : i32 to vector<12x32xi32>
    %123 = arith.cmpi eq, %19, %122 : vector<12x32xi32>
    %124 = vector.broadcast %83 : i32 to vector<12x32xi32>
    %125 = arith.cmpi eq, %18, %124 : vector<12x32xi32>
    %126 = arith.andi %123, %125 : vector<12x32xi1>
    %cst_51 = arith.constant 1.000000e+00 : f32
    %cst_52 = arith.constant 0.000000e+00 : f32
    %127 = vector.broadcast %cst_51 : f32 to vector<12x32xf32>
    %128 = vector.broadcast %cst_52 : f32 to vector<12x32xf32>
    %129 = arith.select %126, %127, %128 : vector<12x32xi1>, vector<12x32xf32>
    %c1_i32_53 = arith.constant 1 : i32
    %130 = vector.broadcast %c1_i32_53 : i32 to vector<12x32xi32>
    %131 = arith.cmpi eq, %19, %130 : vector<12x32xi32>
    %132 = vector.broadcast %84 : i32 to vector<12x32xi32>
    %133 = arith.cmpi eq, %18, %132 : vector<12x32xi32>
    %134 = arith.andi %131, %133 : vector<12x32xi1>
    %cst_54 = arith.constant 1.000000e+00 : f32
    %cst_55 = arith.constant 0.000000e+00 : f32
    %135 = vector.broadcast %cst_54 : f32 to vector<12x32xf32>
    %136 = vector.broadcast %cst_55 : f32 to vector<12x32xf32>
    %137 = arith.select %134, %135, %136 : vector<12x32xi1>, vector<12x32xf32>
    %138 = arith.addf %129, %137 : vector<12x32xf32>
    %139 = arith.addf %82, %138 : vector<12x32xf32>
    %c2_56 = arith.constant 2 : index
    %140 = memref.load %arg0[%c2_56] : memref<32xi32, #tpu.memory_space<smem>>
    %c18 = arith.constant 18 : index
    %141 = memref.load %arg0[%c18] : memref<32xi32, #tpu.memory_space<smem>>
    %c4_57 = arith.constant 4 : index
    %142 = memref.load %arg0[%c4_57] : memref<32xi32, #tpu.memory_space<smem>>
    %c5_58 = arith.constant 5 : index
    %143 = memref.load %arg0[%c5_58] : memref<32xi32, #tpu.memory_space<smem>>
    %144 = arith.cmpi ne, %140, %141 : i32
    %cst_59 = arith.constant 1.000000e+00 : f32
    %cst_60 = arith.constant 0.000000e+00 : f32
    %145 = arith.select %144, %cst_59, %cst_60 : f32
    %146 = vector.broadcast %141 : i32 to vector<12x12xi32>
    %147 = arith.cmpi eq, %14, %146 : vector<12x12xi32>
    %148 = vector.broadcast %140 : i32 to vector<12x12xi32>
    %149 = arith.cmpi eq, %15, %148 : vector<12x12xi32>
    %150 = arith.andi %147, %149 : vector<12x12xi1>
    %cst_61 = arith.constant 1.000000e+00 : f32
    %cst_62 = arith.constant 0.000000e+00 : f32
    %151 = vector.broadcast %cst_61 : f32 to vector<12x12xf32>
    %152 = vector.broadcast %cst_62 : f32 to vector<12x12xf32>
    %153 = arith.select %150, %151, %152 : vector<12x12xi1>, vector<12x12xf32>
    %154 = vector.broadcast %145 : f32 to vector<12x12xf32>
    %155 = arith.mulf %154, %153 : vector<12x12xf32>
    %156 = arith.addf %99, %155 : vector<12x12xf32>
    %157 = vector.broadcast %140 : i32 to vector<12x1xi32>
    %158 = arith.cmpi eq, %20, %157 : vector<12x1xi32>
    %cst_63 = arith.constant 1.000000e+00 : f32
    %cst_64 = arith.constant 0.000000e+00 : f32
    %159 = vector.broadcast %cst_63 : f32 to vector<12x1xf32>
    %160 = vector.broadcast %cst_64 : f32 to vector<12x1xf32>
    %161 = arith.select %158, %159, %160 : vector<12x1xi1>, vector<12x1xf32>
    %162 = vector.broadcast %145 : f32 to vector<12x1xf32>
    %163 = arith.mulf %162, %161 : vector<12x1xf32>
    %164 = arith.addf %107, %163 : vector<12x1xf32>
    %c2_i32 = arith.constant 2 : i32
    %165 = vector.broadcast %c2_i32 : i32 to vector<16x12xi32>
    %166 = arith.cmpi eq, %16, %165 : vector<16x12xi32>
    %167 = vector.broadcast %142 : i32 to vector<16x12xi32>
    %168 = arith.cmpi eq, %17, %167 : vector<16x12xi32>
    %169 = arith.andi %166, %168 : vector<16x12xi1>
    %cst_65 = arith.constant 1.000000e+00 : f32
    %170 = vector.broadcast %cst_65 : f32 to vector<16x12xf32>
    %171 = arith.select %169, %170, %114 : vector<16x12xi1>, vector<16x12xf32>
    %c2_i32_66 = arith.constant 2 : i32
    %172 = vector.broadcast %c2_i32_66 : i32 to vector<16x12xi32>
    %173 = arith.cmpi eq, %16, %172 : vector<16x12xi32>
    %174 = vector.broadcast %143 : i32 to vector<16x12xi32>
    %175 = arith.cmpi eq, %17, %174 : vector<16x12xi32>
    %176 = arith.andi %173, %175 : vector<16x12xi1>
    %cst_67 = arith.constant 1.000000e+00 : f32
    %177 = vector.broadcast %cst_67 : f32 to vector<16x12xf32>
    %178 = arith.select %176, %177, %121 : vector<16x12xi1>, vector<16x12xf32>
    %c2_i32_68 = arith.constant 2 : i32
    %179 = vector.broadcast %c2_i32_68 : i32 to vector<12x32xi32>
    %180 = arith.cmpi eq, %19, %179 : vector<12x32xi32>
    %181 = vector.broadcast %140 : i32 to vector<12x32xi32>
    %182 = arith.cmpi eq, %18, %181 : vector<12x32xi32>
    %183 = arith.andi %180, %182 : vector<12x32xi1>
    %cst_69 = arith.constant 1.000000e+00 : f32
    %cst_70 = arith.constant 0.000000e+00 : f32
    %184 = vector.broadcast %cst_69 : f32 to vector<12x32xf32>
    %185 = vector.broadcast %cst_70 : f32 to vector<12x32xf32>
    %186 = arith.select %183, %184, %185 : vector<12x32xi1>, vector<12x32xf32>
    %c2_i32_71 = arith.constant 2 : i32
    %187 = vector.broadcast %c2_i32_71 : i32 to vector<12x32xi32>
    %188 = arith.cmpi eq, %19, %187 : vector<12x32xi32>
    %189 = vector.broadcast %141 : i32 to vector<12x32xi32>
    %190 = arith.cmpi eq, %18, %189 : vector<12x32xi32>
    %191 = arith.andi %188, %190 : vector<12x32xi1>
    %cst_72 = arith.constant 1.000000e+00 : f32
    %cst_73 = arith.constant 0.000000e+00 : f32
    %192 = vector.broadcast %cst_72 : f32 to vector<12x32xf32>
    %193 = vector.broadcast %cst_73 : f32 to vector<12x32xf32>
    %194 = arith.select %191, %192, %193 : vector<12x32xi1>, vector<12x32xf32>
    %195 = arith.addf %186, %194 : vector<12x32xf32>
    %196 = arith.addf %139, %195 : vector<12x32xf32>
    %c3_74 = arith.constant 3 : index
    %197 = memref.load %arg0[%c3_74] : memref<32xi32, #tpu.memory_space<smem>>
    %c19 = arith.constant 19 : index
    %198 = memref.load %arg0[%c19] : memref<32xi32, #tpu.memory_space<smem>>
    %c6_75 = arith.constant 6 : index
    %199 = memref.load %arg0[%c6_75] : memref<32xi32, #tpu.memory_space<smem>>
    %c7_76 = arith.constant 7 : index
    %200 = memref.load %arg0[%c7_76] : memref<32xi32, #tpu.memory_space<smem>>
    %201 = arith.cmpi ne, %197, %198 : i32
    %cst_77 = arith.constant 1.000000e+00 : f32
    %cst_78 = arith.constant 0.000000e+00 : f32
    %202 = arith.select %201, %cst_77, %cst_78 : f32
    %203 = vector.broadcast %198 : i32 to vector<12x12xi32>
    %204 = arith.cmpi eq, %14, %203 : vector<12x12xi32>
    %205 = vector.broadcast %197 : i32 to vector<12x12xi32>
    %206 = arith.cmpi eq, %15, %205 : vector<12x12xi32>
    %207 = arith.andi %204, %206 : vector<12x12xi1>
    %cst_79 = arith.constant 1.000000e+00 : f32
    %cst_80 = arith.constant 0.000000e+00 : f32
    %208 = vector.broadcast %cst_79 : f32 to vector<12x12xf32>
    %209 = vector.broadcast %cst_80 : f32 to vector<12x12xf32>
    %210 = arith.select %207, %208, %209 : vector<12x12xi1>, vector<12x12xf32>
    %211 = vector.broadcast %202 : f32 to vector<12x12xf32>
    %212 = arith.mulf %211, %210 : vector<12x12xf32>
    %213 = arith.addf %156, %212 : vector<12x12xf32>
    %214 = vector.broadcast %197 : i32 to vector<12x1xi32>
    %215 = arith.cmpi eq, %20, %214 : vector<12x1xi32>
    %cst_81 = arith.constant 1.000000e+00 : f32
    %cst_82 = arith.constant 0.000000e+00 : f32
    %216 = vector.broadcast %cst_81 : f32 to vector<12x1xf32>
    %217 = vector.broadcast %cst_82 : f32 to vector<12x1xf32>
    %218 = arith.select %215, %216, %217 : vector<12x1xi1>, vector<12x1xf32>
    %219 = vector.broadcast %202 : f32 to vector<12x1xf32>
    %220 = arith.mulf %219, %218 : vector<12x1xf32>
    %221 = arith.addf %164, %220 : vector<12x1xf32>
    %c3_i32 = arith.constant 3 : i32
    %222 = vector.broadcast %c3_i32 : i32 to vector<16x12xi32>
    %223 = arith.cmpi eq, %16, %222 : vector<16x12xi32>
    %224 = vector.broadcast %199 : i32 to vector<16x12xi32>
    %225 = arith.cmpi eq, %17, %224 : vector<16x12xi32>
    %226 = arith.andi %223, %225 : vector<16x12xi1>
    %cst_83 = arith.constant 1.000000e+00 : f32
    %227 = vector.broadcast %cst_83 : f32 to vector<16x12xf32>
    %228 = arith.select %226, %227, %171 : vector<16x12xi1>, vector<16x12xf32>
    %c3_i32_84 = arith.constant 3 : i32
    %229 = vector.broadcast %c3_i32_84 : i32 to vector<16x12xi32>
    %230 = arith.cmpi eq, %16, %229 : vector<16x12xi32>
    %231 = vector.broadcast %200 : i32 to vector<16x12xi32>
    %232 = arith.cmpi eq, %17, %231 : vector<16x12xi32>
    %233 = arith.andi %230, %232 : vector<16x12xi1>
    %cst_85 = arith.constant 1.000000e+00 : f32
    %234 = vector.broadcast %cst_85 : f32 to vector<16x12xf32>
    %235 = arith.select %233, %234, %178 : vector<16x12xi1>, vector<16x12xf32>
    %c3_i32_86 = arith.constant 3 : i32
    %236 = vector.broadcast %c3_i32_86 : i32 to vector<12x32xi32>
    %237 = arith.cmpi eq, %19, %236 : vector<12x32xi32>
    %238 = vector.broadcast %197 : i32 to vector<12x32xi32>
    %239 = arith.cmpi eq, %18, %238 : vector<12x32xi32>
    %240 = arith.andi %237, %239 : vector<12x32xi1>
    %cst_87 = arith.constant 1.000000e+00 : f32
    %cst_88 = arith.constant 0.000000e+00 : f32
    %241 = vector.broadcast %cst_87 : f32 to vector<12x32xf32>
    %242 = vector.broadcast %cst_88 : f32 to vector<12x32xf32>
    %243 = arith.select %240, %241, %242 : vector<12x32xi1>, vector<12x32xf32>
    %c3_i32_89 = arith.constant 3 : i32
    %244 = vector.broadcast %c3_i32_89 : i32 to vector<12x32xi32>
    %245 = arith.cmpi eq, %19, %244 : vector<12x32xi32>
    %246 = vector.broadcast %198 : i32 to vector<12x32xi32>
    %247 = arith.cmpi eq, %18, %246 : vector<12x32xi32>
    %248 = arith.andi %245, %247 : vector<12x32xi1>
    %cst_90 = arith.constant 1.000000e+00 : f32
    %cst_91 = arith.constant 0.000000e+00 : f32
    %249 = vector.broadcast %cst_90 : f32 to vector<12x32xf32>
    %250 = vector.broadcast %cst_91 : f32 to vector<12x32xf32>
    %251 = arith.select %248, %249, %250 : vector<12x32xi1>, vector<12x32xf32>
    %252 = arith.addf %243, %251 : vector<12x32xf32>
    %253 = arith.addf %196, %252 : vector<12x32xf32>
    %c4_92 = arith.constant 4 : index
    %254 = memref.load %arg0[%c4_92] : memref<32xi32, #tpu.memory_space<smem>>
    %c20 = arith.constant 20 : index
    %255 = memref.load %arg0[%c20] : memref<32xi32, #tpu.memory_space<smem>>
    %c8 = arith.constant 8 : index
    %256 = memref.load %arg0[%c8] : memref<32xi32, #tpu.memory_space<smem>>
    %c9 = arith.constant 9 : index
    %257 = memref.load %arg0[%c9] : memref<32xi32, #tpu.memory_space<smem>>
    %258 = arith.cmpi ne, %254, %255 : i32
    %cst_93 = arith.constant 1.000000e+00 : f32
    %cst_94 = arith.constant 0.000000e+00 : f32
    %259 = arith.select %258, %cst_93, %cst_94 : f32
    %260 = vector.broadcast %255 : i32 to vector<12x12xi32>
    %261 = arith.cmpi eq, %14, %260 : vector<12x12xi32>
    %262 = vector.broadcast %254 : i32 to vector<12x12xi32>
    %263 = arith.cmpi eq, %15, %262 : vector<12x12xi32>
    %264 = arith.andi %261, %263 : vector<12x12xi1>
    %cst_95 = arith.constant 1.000000e+00 : f32
    %cst_96 = arith.constant 0.000000e+00 : f32
    %265 = vector.broadcast %cst_95 : f32 to vector<12x12xf32>
    %266 = vector.broadcast %cst_96 : f32 to vector<12x12xf32>
    %267 = arith.select %264, %265, %266 : vector<12x12xi1>, vector<12x12xf32>
    %268 = vector.broadcast %259 : f32 to vector<12x12xf32>
    %269 = arith.mulf %268, %267 : vector<12x12xf32>
    %270 = arith.addf %213, %269 : vector<12x12xf32>
    %271 = vector.broadcast %254 : i32 to vector<12x1xi32>
    %272 = arith.cmpi eq, %20, %271 : vector<12x1xi32>
    %cst_97 = arith.constant 1.000000e+00 : f32
    %cst_98 = arith.constant 0.000000e+00 : f32
    %273 = vector.broadcast %cst_97 : f32 to vector<12x1xf32>
    %274 = vector.broadcast %cst_98 : f32 to vector<12x1xf32>
    %275 = arith.select %272, %273, %274 : vector<12x1xi1>, vector<12x1xf32>
    %276 = vector.broadcast %259 : f32 to vector<12x1xf32>
    %277 = arith.mulf %276, %275 : vector<12x1xf32>
    %278 = arith.addf %221, %277 : vector<12x1xf32>
    %c4_i32 = arith.constant 4 : i32
    %279 = vector.broadcast %c4_i32 : i32 to vector<16x12xi32>
    %280 = arith.cmpi eq, %16, %279 : vector<16x12xi32>
    %281 = vector.broadcast %256 : i32 to vector<16x12xi32>
    %282 = arith.cmpi eq, %17, %281 : vector<16x12xi32>
    %283 = arith.andi %280, %282 : vector<16x12xi1>
    %cst_99 = arith.constant 1.000000e+00 : f32
    %284 = vector.broadcast %cst_99 : f32 to vector<16x12xf32>
    %285 = arith.select %283, %284, %228 : vector<16x12xi1>, vector<16x12xf32>
    %c4_i32_100 = arith.constant 4 : i32
    %286 = vector.broadcast %c4_i32_100 : i32 to vector<16x12xi32>
    %287 = arith.cmpi eq, %16, %286 : vector<16x12xi32>
    %288 = vector.broadcast %257 : i32 to vector<16x12xi32>
    %289 = arith.cmpi eq, %17, %288 : vector<16x12xi32>
    %290 = arith.andi %287, %289 : vector<16x12xi1>
    %cst_101 = arith.constant 1.000000e+00 : f32
    %291 = vector.broadcast %cst_101 : f32 to vector<16x12xf32>
    %292 = arith.select %290, %291, %235 : vector<16x12xi1>, vector<16x12xf32>
    %c4_i32_102 = arith.constant 4 : i32
    %293 = vector.broadcast %c4_i32_102 : i32 to vector<12x32xi32>
    %294 = arith.cmpi eq, %19, %293 : vector<12x32xi32>
    %295 = vector.broadcast %254 : i32 to vector<12x32xi32>
    %296 = arith.cmpi eq, %18, %295 : vector<12x32xi32>
    %297 = arith.andi %294, %296 : vector<12x32xi1>
    %cst_103 = arith.constant 1.000000e+00 : f32
    %cst_104 = arith.constant 0.000000e+00 : f32
    %298 = vector.broadcast %cst_103 : f32 to vector<12x32xf32>
    %299 = vector.broadcast %cst_104 : f32 to vector<12x32xf32>
    %300 = arith.select %297, %298, %299 : vector<12x32xi1>, vector<12x32xf32>
    %c4_i32_105 = arith.constant 4 : i32
    %301 = vector.broadcast %c4_i32_105 : i32 to vector<12x32xi32>
    %302 = arith.cmpi eq, %19, %301 : vector<12x32xi32>
    %303 = vector.broadcast %255 : i32 to vector<12x32xi32>
    %304 = arith.cmpi eq, %18, %303 : vector<12x32xi32>
    %305 = arith.andi %302, %304 : vector<12x32xi1>
    %cst_106 = arith.constant 1.000000e+00 : f32
    %cst_107 = arith.constant 0.000000e+00 : f32
    %306 = vector.broadcast %cst_106 : f32 to vector<12x32xf32>
    %307 = vector.broadcast %cst_107 : f32 to vector<12x32xf32>
    %308 = arith.select %305, %306, %307 : vector<12x32xi1>, vector<12x32xf32>
    %309 = arith.addf %300, %308 : vector<12x32xf32>
    %310 = arith.addf %253, %309 : vector<12x32xf32>
    %c5_108 = arith.constant 5 : index
    %311 = memref.load %arg0[%c5_108] : memref<32xi32, #tpu.memory_space<smem>>
    %c21 = arith.constant 21 : index
    %312 = memref.load %arg0[%c21] : memref<32xi32, #tpu.memory_space<smem>>
    %c10 = arith.constant 10 : index
    %313 = memref.load %arg0[%c10] : memref<32xi32, #tpu.memory_space<smem>>
    %c11 = arith.constant 11 : index
    %314 = memref.load %arg0[%c11] : memref<32xi32, #tpu.memory_space<smem>>
    %315 = arith.cmpi ne, %311, %312 : i32
    %cst_109 = arith.constant 1.000000e+00 : f32
    %cst_110 = arith.constant 0.000000e+00 : f32
    %316 = arith.select %315, %cst_109, %cst_110 : f32
    %317 = vector.broadcast %312 : i32 to vector<12x12xi32>
    %318 = arith.cmpi eq, %14, %317 : vector<12x12xi32>
    %319 = vector.broadcast %311 : i32 to vector<12x12xi32>
    %320 = arith.cmpi eq, %15, %319 : vector<12x12xi32>
    %321 = arith.andi %318, %320 : vector<12x12xi1>
    %cst_111 = arith.constant 1.000000e+00 : f32
    %cst_112 = arith.constant 0.000000e+00 : f32
    %322 = vector.broadcast %cst_111 : f32 to vector<12x12xf32>
    %323 = vector.broadcast %cst_112 : f32 to vector<12x12xf32>
    %324 = arith.select %321, %322, %323 : vector<12x12xi1>, vector<12x12xf32>
    %325 = vector.broadcast %316 : f32 to vector<12x12xf32>
    %326 = arith.mulf %325, %324 : vector<12x12xf32>
    %327 = arith.addf %270, %326 : vector<12x12xf32>
    %328 = vector.broadcast %311 : i32 to vector<12x1xi32>
    %329 = arith.cmpi eq, %20, %328 : vector<12x1xi32>
    %cst_113 = arith.constant 1.000000e+00 : f32
    %cst_114 = arith.constant 0.000000e+00 : f32
    %330 = vector.broadcast %cst_113 : f32 to vector<12x1xf32>
    %331 = vector.broadcast %cst_114 : f32 to vector<12x1xf32>
    %332 = arith.select %329, %330, %331 : vector<12x1xi1>, vector<12x1xf32>
    %333 = vector.broadcast %316 : f32 to vector<12x1xf32>
    %334 = arith.mulf %333, %332 : vector<12x1xf32>
    %335 = arith.addf %278, %334 : vector<12x1xf32>
    %c5_i32 = arith.constant 5 : i32
    %336 = vector.broadcast %c5_i32 : i32 to vector<16x12xi32>
    %337 = arith.cmpi eq, %16, %336 : vector<16x12xi32>
    %338 = vector.broadcast %313 : i32 to vector<16x12xi32>
    %339 = arith.cmpi eq, %17, %338 : vector<16x12xi32>
    %340 = arith.andi %337, %339 : vector<16x12xi1>
    %cst_115 = arith.constant 1.000000e+00 : f32
    %341 = vector.broadcast %cst_115 : f32 to vector<16x12xf32>
    %342 = arith.select %340, %341, %285 : vector<16x12xi1>, vector<16x12xf32>
    %c5_i32_116 = arith.constant 5 : i32
    %343 = vector.broadcast %c5_i32_116 : i32 to vector<16x12xi32>
    %344 = arith.cmpi eq, %16, %343 : vector<16x12xi32>
    %345 = vector.broadcast %314 : i32 to vector<16x12xi32>
    %346 = arith.cmpi eq, %17, %345 : vector<16x12xi32>
    %347 = arith.andi %344, %346 : vector<16x12xi1>
    %cst_117 = arith.constant 1.000000e+00 : f32
    %348 = vector.broadcast %cst_117 : f32 to vector<16x12xf32>
    %349 = arith.select %347, %348, %292 : vector<16x12xi1>, vector<16x12xf32>
    %c5_i32_118 = arith.constant 5 : i32
    %350 = vector.broadcast %c5_i32_118 : i32 to vector<12x32xi32>
    %351 = arith.cmpi eq, %19, %350 : vector<12x32xi32>
    %352 = vector.broadcast %311 : i32 to vector<12x32xi32>
    %353 = arith.cmpi eq, %18, %352 : vector<12x32xi32>
    %354 = arith.andi %351, %353 : vector<12x32xi1>
    %cst_119 = arith.constant 1.000000e+00 : f32
    %cst_120 = arith.constant 0.000000e+00 : f32
    %355 = vector.broadcast %cst_119 : f32 to vector<12x32xf32>
    %356 = vector.broadcast %cst_120 : f32 to vector<12x32xf32>
    %357 = arith.select %354, %355, %356 : vector<12x32xi1>, vector<12x32xf32>
    %c5_i32_121 = arith.constant 5 : i32
    %358 = vector.broadcast %c5_i32_121 : i32 to vector<12x32xi32>
    %359 = arith.cmpi eq, %19, %358 : vector<12x32xi32>
    %360 = vector.broadcast %312 : i32 to vector<12x32xi32>
    %361 = arith.cmpi eq, %18, %360 : vector<12x32xi32>
    %362 = arith.andi %359, %361 : vector<12x32xi1>
    %cst_122 = arith.constant 1.000000e+00 : f32
    %cst_123 = arith.constant 0.000000e+00 : f32
    %363 = vector.broadcast %cst_122 : f32 to vector<12x32xf32>
    %364 = vector.broadcast %cst_123 : f32 to vector<12x32xf32>
    %365 = arith.select %362, %363, %364 : vector<12x32xi1>, vector<12x32xf32>
    %366 = arith.addf %357, %365 : vector<12x32xf32>
    %367 = arith.addf %310, %366 : vector<12x32xf32>
    %c6_124 = arith.constant 6 : index
    %368 = memref.load %arg0[%c6_124] : memref<32xi32, #tpu.memory_space<smem>>
    %c22 = arith.constant 22 : index
    %369 = memref.load %arg0[%c22] : memref<32xi32, #tpu.memory_space<smem>>
    %c12 = arith.constant 12 : index
    %370 = memref.load %arg0[%c12] : memref<32xi32, #tpu.memory_space<smem>>
    %c13 = arith.constant 13 : index
    %371 = memref.load %arg0[%c13] : memref<32xi32, #tpu.memory_space<smem>>
    %372 = arith.cmpi ne, %368, %369 : i32
    %cst_125 = arith.constant 1.000000e+00 : f32
    %cst_126 = arith.constant 0.000000e+00 : f32
    %373 = arith.select %372, %cst_125, %cst_126 : f32
    %374 = vector.broadcast %369 : i32 to vector<12x12xi32>
    %375 = arith.cmpi eq, %14, %374 : vector<12x12xi32>
    %376 = vector.broadcast %368 : i32 to vector<12x12xi32>
    %377 = arith.cmpi eq, %15, %376 : vector<12x12xi32>
    %378 = arith.andi %375, %377 : vector<12x12xi1>
    %cst_127 = arith.constant 1.000000e+00 : f32
    %cst_128 = arith.constant 0.000000e+00 : f32
    %379 = vector.broadcast %cst_127 : f32 to vector<12x12xf32>
    %380 = vector.broadcast %cst_128 : f32 to vector<12x12xf32>
    %381 = arith.select %378, %379, %380 : vector<12x12xi1>, vector<12x12xf32>
    %382 = vector.broadcast %373 : f32 to vector<12x12xf32>
    %383 = arith.mulf %382, %381 : vector<12x12xf32>
    %384 = arith.addf %327, %383 : vector<12x12xf32>
    %385 = vector.broadcast %368 : i32 to vector<12x1xi32>
    %386 = arith.cmpi eq, %20, %385 : vector<12x1xi32>
    %cst_129 = arith.constant 1.000000e+00 : f32
    %cst_130 = arith.constant 0.000000e+00 : f32
    %387 = vector.broadcast %cst_129 : f32 to vector<12x1xf32>
    %388 = vector.broadcast %cst_130 : f32 to vector<12x1xf32>
    %389 = arith.select %386, %387, %388 : vector<12x1xi1>, vector<12x1xf32>
    %390 = vector.broadcast %373 : f32 to vector<12x1xf32>
    %391 = arith.mulf %390, %389 : vector<12x1xf32>
    %392 = arith.addf %335, %391 : vector<12x1xf32>
    %c6_i32 = arith.constant 6 : i32
    %393 = vector.broadcast %c6_i32 : i32 to vector<16x12xi32>
    %394 = arith.cmpi eq, %16, %393 : vector<16x12xi32>
    %395 = vector.broadcast %370 : i32 to vector<16x12xi32>
    %396 = arith.cmpi eq, %17, %395 : vector<16x12xi32>
    %397 = arith.andi %394, %396 : vector<16x12xi1>
    %cst_131 = arith.constant 1.000000e+00 : f32
    %398 = vector.broadcast %cst_131 : f32 to vector<16x12xf32>
    %399 = arith.select %397, %398, %342 : vector<16x12xi1>, vector<16x12xf32>
    %c6_i32_132 = arith.constant 6 : i32
    %400 = vector.broadcast %c6_i32_132 : i32 to vector<16x12xi32>
    %401 = arith.cmpi eq, %16, %400 : vector<16x12xi32>
    %402 = vector.broadcast %371 : i32 to vector<16x12xi32>
    %403 = arith.cmpi eq, %17, %402 : vector<16x12xi32>
    %404 = arith.andi %401, %403 : vector<16x12xi1>
    %cst_133 = arith.constant 1.000000e+00 : f32
    %405 = vector.broadcast %cst_133 : f32 to vector<16x12xf32>
    %406 = arith.select %404, %405, %349 : vector<16x12xi1>, vector<16x12xf32>
    %c6_i32_134 = arith.constant 6 : i32
    %407 = vector.broadcast %c6_i32_134 : i32 to vector<12x32xi32>
    %408 = arith.cmpi eq, %19, %407 : vector<12x32xi32>
    %409 = vector.broadcast %368 : i32 to vector<12x32xi32>
    %410 = arith.cmpi eq, %18, %409 : vector<12x32xi32>
    %411 = arith.andi %408, %410 : vector<12x32xi1>
    %cst_135 = arith.constant 1.000000e+00 : f32
    %cst_136 = arith.constant 0.000000e+00 : f32
    %412 = vector.broadcast %cst_135 : f32 to vector<12x32xf32>
    %413 = vector.broadcast %cst_136 : f32 to vector<12x32xf32>
    %414 = arith.select %411, %412, %413 : vector<12x32xi1>, vector<12x32xf32>
    %c6_i32_137 = arith.constant 6 : i32
    %415 = vector.broadcast %c6_i32_137 : i32 to vector<12x32xi32>
    %416 = arith.cmpi eq, %19, %415 : vector<12x32xi32>
    %417 = vector.broadcast %369 : i32 to vector<12x32xi32>
    %418 = arith.cmpi eq, %18, %417 : vector<12x32xi32>
    %419 = arith.andi %416, %418 : vector<12x32xi1>
    %cst_138 = arith.constant 1.000000e+00 : f32
    %cst_139 = arith.constant 0.000000e+00 : f32
    %420 = vector.broadcast %cst_138 : f32 to vector<12x32xf32>
    %421 = vector.broadcast %cst_139 : f32 to vector<12x32xf32>
    %422 = arith.select %419, %420, %421 : vector<12x32xi1>, vector<12x32xf32>
    %423 = arith.addf %414, %422 : vector<12x32xf32>
    %424 = arith.addf %367, %423 : vector<12x32xf32>
    %c7_140 = arith.constant 7 : index
    %425 = memref.load %arg0[%c7_140] : memref<32xi32, #tpu.memory_space<smem>>
    %c23 = arith.constant 23 : index
    %426 = memref.load %arg0[%c23] : memref<32xi32, #tpu.memory_space<smem>>
    %c14 = arith.constant 14 : index
    %427 = memref.load %arg0[%c14] : memref<32xi32, #tpu.memory_space<smem>>
    %c15 = arith.constant 15 : index
    %428 = memref.load %arg0[%c15] : memref<32xi32, #tpu.memory_space<smem>>
    %429 = arith.cmpi ne, %425, %426 : i32
    %cst_141 = arith.constant 1.000000e+00 : f32
    %cst_142 = arith.constant 0.000000e+00 : f32
    %430 = arith.select %429, %cst_141, %cst_142 : f32
    %431 = vector.broadcast %426 : i32 to vector<12x12xi32>
    %432 = arith.cmpi eq, %14, %431 : vector<12x12xi32>
    %433 = vector.broadcast %425 : i32 to vector<12x12xi32>
    %434 = arith.cmpi eq, %15, %433 : vector<12x12xi32>
    %435 = arith.andi %432, %434 : vector<12x12xi1>
    %cst_143 = arith.constant 1.000000e+00 : f32
    %cst_144 = arith.constant 0.000000e+00 : f32
    %436 = vector.broadcast %cst_143 : f32 to vector<12x12xf32>
    %437 = vector.broadcast %cst_144 : f32 to vector<12x12xf32>
    %438 = arith.select %435, %436, %437 : vector<12x12xi1>, vector<12x12xf32>
    %439 = vector.broadcast %430 : f32 to vector<12x12xf32>
    %440 = arith.mulf %439, %438 : vector<12x12xf32>
    %441 = arith.addf %384, %440 : vector<12x12xf32>
    %442 = vector.broadcast %425 : i32 to vector<12x1xi32>
    %443 = arith.cmpi eq, %20, %442 : vector<12x1xi32>
    %cst_145 = arith.constant 1.000000e+00 : f32
    %cst_146 = arith.constant 0.000000e+00 : f32
    %444 = vector.broadcast %cst_145 : f32 to vector<12x1xf32>
    %445 = vector.broadcast %cst_146 : f32 to vector<12x1xf32>
    %446 = arith.select %443, %444, %445 : vector<12x1xi1>, vector<12x1xf32>
    %447 = vector.broadcast %430 : f32 to vector<12x1xf32>
    %448 = arith.mulf %447, %446 : vector<12x1xf32>
    %449 = arith.addf %392, %448 : vector<12x1xf32>
    %c7_i32 = arith.constant 7 : i32
    %450 = vector.broadcast %c7_i32 : i32 to vector<16x12xi32>
    %451 = arith.cmpi eq, %16, %450 : vector<16x12xi32>
    %452 = vector.broadcast %427 : i32 to vector<16x12xi32>
    %453 = arith.cmpi eq, %17, %452 : vector<16x12xi32>
    %454 = arith.andi %451, %453 : vector<16x12xi1>
    %cst_147 = arith.constant 1.000000e+00 : f32
    %455 = vector.broadcast %cst_147 : f32 to vector<16x12xf32>
    %456 = arith.select %454, %455, %399 : vector<16x12xi1>, vector<16x12xf32>
    %c7_i32_148 = arith.constant 7 : i32
    %457 = vector.broadcast %c7_i32_148 : i32 to vector<16x12xi32>
    %458 = arith.cmpi eq, %16, %457 : vector<16x12xi32>
    %459 = vector.broadcast %428 : i32 to vector<16x12xi32>
    %460 = arith.cmpi eq, %17, %459 : vector<16x12xi32>
    %461 = arith.andi %458, %460 : vector<16x12xi1>
    %cst_149 = arith.constant 1.000000e+00 : f32
    %462 = vector.broadcast %cst_149 : f32 to vector<16x12xf32>
    %463 = arith.select %461, %462, %406 : vector<16x12xi1>, vector<16x12xf32>
    %c7_i32_150 = arith.constant 7 : i32
    %464 = vector.broadcast %c7_i32_150 : i32 to vector<12x32xi32>
    %465 = arith.cmpi eq, %19, %464 : vector<12x32xi32>
    %466 = vector.broadcast %425 : i32 to vector<12x32xi32>
    %467 = arith.cmpi eq, %18, %466 : vector<12x32xi32>
    %468 = arith.andi %465, %467 : vector<12x32xi1>
    %cst_151 = arith.constant 1.000000e+00 : f32
    %cst_152 = arith.constant 0.000000e+00 : f32
    %469 = vector.broadcast %cst_151 : f32 to vector<12x32xf32>
    %470 = vector.broadcast %cst_152 : f32 to vector<12x32xf32>
    %471 = arith.select %468, %469, %470 : vector<12x32xi1>, vector<12x32xf32>
    %c7_i32_153 = arith.constant 7 : i32
    %472 = vector.broadcast %c7_i32_153 : i32 to vector<12x32xi32>
    %473 = arith.cmpi eq, %19, %472 : vector<12x32xi32>
    %474 = vector.broadcast %426 : i32 to vector<12x32xi32>
    %475 = arith.cmpi eq, %18, %474 : vector<12x32xi32>
    %476 = arith.andi %473, %475 : vector<12x32xi1>
    %cst_154 = arith.constant 1.000000e+00 : f32
    %cst_155 = arith.constant 0.000000e+00 : f32
    %477 = vector.broadcast %cst_154 : f32 to vector<12x32xf32>
    %478 = vector.broadcast %cst_155 : f32 to vector<12x32xf32>
    %479 = arith.select %476, %477, %478 : vector<12x32xi1>, vector<12x32xf32>
    %480 = arith.addf %471, %479 : vector<12x32xf32>
    %481 = arith.addf %424, %480 : vector<12x32xf32>
    %c8_156 = arith.constant 8 : index
    %482 = memref.load %arg0[%c8_156] : memref<32xi32, #tpu.memory_space<smem>>
    %c24 = arith.constant 24 : index
    %483 = memref.load %arg0[%c24] : memref<32xi32, #tpu.memory_space<smem>>
    %c16_157 = arith.constant 16 : index
    %484 = memref.load %arg0[%c16_157] : memref<32xi32, #tpu.memory_space<smem>>
    %c17_158 = arith.constant 17 : index
    %485 = memref.load %arg0[%c17_158] : memref<32xi32, #tpu.memory_space<smem>>
    %486 = arith.cmpi ne, %482, %483 : i32
    %cst_159 = arith.constant 1.000000e+00 : f32
    %cst_160 = arith.constant 0.000000e+00 : f32
    %487 = arith.select %486, %cst_159, %cst_160 : f32
    %488 = vector.broadcast %483 : i32 to vector<12x12xi32>
    %489 = arith.cmpi eq, %14, %488 : vector<12x12xi32>
    %490 = vector.broadcast %482 : i32 to vector<12x12xi32>
    %491 = arith.cmpi eq, %15, %490 : vector<12x12xi32>
    %492 = arith.andi %489, %491 : vector<12x12xi1>
    %cst_161 = arith.constant 1.000000e+00 : f32
    %cst_162 = arith.constant 0.000000e+00 : f32
    %493 = vector.broadcast %cst_161 : f32 to vector<12x12xf32>
    %494 = vector.broadcast %cst_162 : f32 to vector<12x12xf32>
    %495 = arith.select %492, %493, %494 : vector<12x12xi1>, vector<12x12xf32>
    %496 = vector.broadcast %487 : f32 to vector<12x12xf32>
    %497 = arith.mulf %496, %495 : vector<12x12xf32>
    %498 = arith.addf %441, %497 : vector<12x12xf32>
    %499 = vector.broadcast %482 : i32 to vector<12x1xi32>
    %500 = arith.cmpi eq, %20, %499 : vector<12x1xi32>
    %cst_163 = arith.constant 1.000000e+00 : f32
    %cst_164 = arith.constant 0.000000e+00 : f32
    %501 = vector.broadcast %cst_163 : f32 to vector<12x1xf32>
    %502 = vector.broadcast %cst_164 : f32 to vector<12x1xf32>
    %503 = arith.select %500, %501, %502 : vector<12x1xi1>, vector<12x1xf32>
    %504 = vector.broadcast %487 : f32 to vector<12x1xf32>
    %505 = arith.mulf %504, %503 : vector<12x1xf32>
    %506 = arith.addf %449, %505 : vector<12x1xf32>
    %c8_i32 = arith.constant 8 : i32
    %507 = vector.broadcast %c8_i32 : i32 to vector<16x12xi32>
    %508 = arith.cmpi eq, %16, %507 : vector<16x12xi32>
    %509 = vector.broadcast %484 : i32 to vector<16x12xi32>
    %510 = arith.cmpi eq, %17, %509 : vector<16x12xi32>
    %511 = arith.andi %508, %510 : vector<16x12xi1>
    %cst_165 = arith.constant 1.000000e+00 : f32
    %512 = vector.broadcast %cst_165 : f32 to vector<16x12xf32>
    %513 = arith.select %511, %512, %456 : vector<16x12xi1>, vector<16x12xf32>
    %c8_i32_166 = arith.constant 8 : i32
    %514 = vector.broadcast %c8_i32_166 : i32 to vector<16x12xi32>
    %515 = arith.cmpi eq, %16, %514 : vector<16x12xi32>
    %516 = vector.broadcast %485 : i32 to vector<16x12xi32>
    %517 = arith.cmpi eq, %17, %516 : vector<16x12xi32>
    %518 = arith.andi %515, %517 : vector<16x12xi1>
    %cst_167 = arith.constant 1.000000e+00 : f32
    %519 = vector.broadcast %cst_167 : f32 to vector<16x12xf32>
    %520 = arith.select %518, %519, %463 : vector<16x12xi1>, vector<16x12xf32>
    %c8_i32_168 = arith.constant 8 : i32
    %521 = vector.broadcast %c8_i32_168 : i32 to vector<12x32xi32>
    %522 = arith.cmpi eq, %19, %521 : vector<12x32xi32>
    %523 = vector.broadcast %482 : i32 to vector<12x32xi32>
    %524 = arith.cmpi eq, %18, %523 : vector<12x32xi32>
    %525 = arith.andi %522, %524 : vector<12x32xi1>
    %cst_169 = arith.constant 1.000000e+00 : f32
    %cst_170 = arith.constant 0.000000e+00 : f32
    %526 = vector.broadcast %cst_169 : f32 to vector<12x32xf32>
    %527 = vector.broadcast %cst_170 : f32 to vector<12x32xf32>
    %528 = arith.select %525, %526, %527 : vector<12x32xi1>, vector<12x32xf32>
    %c8_i32_171 = arith.constant 8 : i32
    %529 = vector.broadcast %c8_i32_171 : i32 to vector<12x32xi32>
    %530 = arith.cmpi eq, %19, %529 : vector<12x32xi32>
    %531 = vector.broadcast %483 : i32 to vector<12x32xi32>
    %532 = arith.cmpi eq, %18, %531 : vector<12x32xi32>
    %533 = arith.andi %530, %532 : vector<12x32xi1>
    %cst_172 = arith.constant 1.000000e+00 : f32
    %cst_173 = arith.constant 0.000000e+00 : f32
    %534 = vector.broadcast %cst_172 : f32 to vector<12x32xf32>
    %535 = vector.broadcast %cst_173 : f32 to vector<12x32xf32>
    %536 = arith.select %533, %534, %535 : vector<12x32xi1>, vector<12x32xf32>
    %537 = arith.addf %528, %536 : vector<12x32xf32>
    %538 = arith.addf %481, %537 : vector<12x32xf32>
    %c9_174 = arith.constant 9 : index
    %539 = memref.load %arg0[%c9_174] : memref<32xi32, #tpu.memory_space<smem>>
    %c25 = arith.constant 25 : index
    %540 = memref.load %arg0[%c25] : memref<32xi32, #tpu.memory_space<smem>>
    %c18_175 = arith.constant 18 : index
    %541 = memref.load %arg0[%c18_175] : memref<32xi32, #tpu.memory_space<smem>>
    %c19_176 = arith.constant 19 : index
    %542 = memref.load %arg0[%c19_176] : memref<32xi32, #tpu.memory_space<smem>>
    %543 = arith.cmpi ne, %539, %540 : i32
    %cst_177 = arith.constant 1.000000e+00 : f32
    %cst_178 = arith.constant 0.000000e+00 : f32
    %544 = arith.select %543, %cst_177, %cst_178 : f32
    %545 = vector.broadcast %540 : i32 to vector<12x12xi32>
    %546 = arith.cmpi eq, %14, %545 : vector<12x12xi32>
    %547 = vector.broadcast %539 : i32 to vector<12x12xi32>
    %548 = arith.cmpi eq, %15, %547 : vector<12x12xi32>
    %549 = arith.andi %546, %548 : vector<12x12xi1>
    %cst_179 = arith.constant 1.000000e+00 : f32
    %cst_180 = arith.constant 0.000000e+00 : f32
    %550 = vector.broadcast %cst_179 : f32 to vector<12x12xf32>
    %551 = vector.broadcast %cst_180 : f32 to vector<12x12xf32>
    %552 = arith.select %549, %550, %551 : vector<12x12xi1>, vector<12x12xf32>
    %553 = vector.broadcast %544 : f32 to vector<12x12xf32>
    %554 = arith.mulf %553, %552 : vector<12x12xf32>
    %555 = arith.addf %498, %554 : vector<12x12xf32>
    %556 = vector.broadcast %539 : i32 to vector<12x1xi32>
    %557 = arith.cmpi eq, %20, %556 : vector<12x1xi32>
    %cst_181 = arith.constant 1.000000e+00 : f32
    %cst_182 = arith.constant 0.000000e+00 : f32
    %558 = vector.broadcast %cst_181 : f32 to vector<12x1xf32>
    %559 = vector.broadcast %cst_182 : f32 to vector<12x1xf32>
    %560 = arith.select %557, %558, %559 : vector<12x1xi1>, vector<12x1xf32>
    %561 = vector.broadcast %544 : f32 to vector<12x1xf32>
    %562 = arith.mulf %561, %560 : vector<12x1xf32>
    %563 = arith.addf %506, %562 : vector<12x1xf32>
    %c9_i32 = arith.constant 9 : i32
    %564 = vector.broadcast %c9_i32 : i32 to vector<16x12xi32>
    %565 = arith.cmpi eq, %16, %564 : vector<16x12xi32>
    %566 = vector.broadcast %541 : i32 to vector<16x12xi32>
    %567 = arith.cmpi eq, %17, %566 : vector<16x12xi32>
    %568 = arith.andi %565, %567 : vector<16x12xi1>
    %cst_183 = arith.constant 1.000000e+00 : f32
    %569 = vector.broadcast %cst_183 : f32 to vector<16x12xf32>
    %570 = arith.select %568, %569, %513 : vector<16x12xi1>, vector<16x12xf32>
    %c9_i32_184 = arith.constant 9 : i32
    %571 = vector.broadcast %c9_i32_184 : i32 to vector<16x12xi32>
    %572 = arith.cmpi eq, %16, %571 : vector<16x12xi32>
    %573 = vector.broadcast %542 : i32 to vector<16x12xi32>
    %574 = arith.cmpi eq, %17, %573 : vector<16x12xi32>
    %575 = arith.andi %572, %574 : vector<16x12xi1>
    %cst_185 = arith.constant 1.000000e+00 : f32
    %576 = vector.broadcast %cst_185 : f32 to vector<16x12xf32>
    %577 = arith.select %575, %576, %520 : vector<16x12xi1>, vector<16x12xf32>
    %c9_i32_186 = arith.constant 9 : i32
    %578 = vector.broadcast %c9_i32_186 : i32 to vector<12x32xi32>
    %579 = arith.cmpi eq, %19, %578 : vector<12x32xi32>
    %580 = vector.broadcast %539 : i32 to vector<12x32xi32>
    %581 = arith.cmpi eq, %18, %580 : vector<12x32xi32>
    %582 = arith.andi %579, %581 : vector<12x32xi1>
    %cst_187 = arith.constant 1.000000e+00 : f32
    %cst_188 = arith.constant 0.000000e+00 : f32
    %583 = vector.broadcast %cst_187 : f32 to vector<12x32xf32>
    %584 = vector.broadcast %cst_188 : f32 to vector<12x32xf32>
    %585 = arith.select %582, %583, %584 : vector<12x32xi1>, vector<12x32xf32>
    %c9_i32_189 = arith.constant 9 : i32
    %586 = vector.broadcast %c9_i32_189 : i32 to vector<12x32xi32>
    %587 = arith.cmpi eq, %19, %586 : vector<12x32xi32>
    %588 = vector.broadcast %540 : i32 to vector<12x32xi32>
    %589 = arith.cmpi eq, %18, %588 : vector<12x32xi32>
    %590 = arith.andi %587, %589 : vector<12x32xi1>
    %cst_190 = arith.constant 1.000000e+00 : f32
    %cst_191 = arith.constant 0.000000e+00 : f32
    %591 = vector.broadcast %cst_190 : f32 to vector<12x32xf32>
    %592 = vector.broadcast %cst_191 : f32 to vector<12x32xf32>
    %593 = arith.select %590, %591, %592 : vector<12x32xi1>, vector<12x32xf32>
    %594 = arith.addf %585, %593 : vector<12x32xf32>
    %595 = arith.addf %538, %594 : vector<12x32xf32>
    %c10_192 = arith.constant 10 : index
    %596 = memref.load %arg0[%c10_192] : memref<32xi32, #tpu.memory_space<smem>>
    %c26 = arith.constant 26 : index
    %597 = memref.load %arg0[%c26] : memref<32xi32, #tpu.memory_space<smem>>
    %c20_193 = arith.constant 20 : index
    %598 = memref.load %arg0[%c20_193] : memref<32xi32, #tpu.memory_space<smem>>
    %c21_194 = arith.constant 21 : index
    %599 = memref.load %arg0[%c21_194] : memref<32xi32, #tpu.memory_space<smem>>
    %600 = arith.cmpi ne, %596, %597 : i32
    %cst_195 = arith.constant 1.000000e+00 : f32
    %cst_196 = arith.constant 0.000000e+00 : f32
    %601 = arith.select %600, %cst_195, %cst_196 : f32
    %602 = vector.broadcast %597 : i32 to vector<12x12xi32>
    %603 = arith.cmpi eq, %14, %602 : vector<12x12xi32>
    %604 = vector.broadcast %596 : i32 to vector<12x12xi32>
    %605 = arith.cmpi eq, %15, %604 : vector<12x12xi32>
    %606 = arith.andi %603, %605 : vector<12x12xi1>
    %cst_197 = arith.constant 1.000000e+00 : f32
    %cst_198 = arith.constant 0.000000e+00 : f32
    %607 = vector.broadcast %cst_197 : f32 to vector<12x12xf32>
    %608 = vector.broadcast %cst_198 : f32 to vector<12x12xf32>
    %609 = arith.select %606, %607, %608 : vector<12x12xi1>, vector<12x12xf32>
    %610 = vector.broadcast %601 : f32 to vector<12x12xf32>
    %611 = arith.mulf %610, %609 : vector<12x12xf32>
    %612 = arith.addf %555, %611 : vector<12x12xf32>
    %613 = vector.broadcast %596 : i32 to vector<12x1xi32>
    %614 = arith.cmpi eq, %20, %613 : vector<12x1xi32>
    %cst_199 = arith.constant 1.000000e+00 : f32
    %cst_200 = arith.constant 0.000000e+00 : f32
    %615 = vector.broadcast %cst_199 : f32 to vector<12x1xf32>
    %616 = vector.broadcast %cst_200 : f32 to vector<12x1xf32>
    %617 = arith.select %614, %615, %616 : vector<12x1xi1>, vector<12x1xf32>
    %618 = vector.broadcast %601 : f32 to vector<12x1xf32>
    %619 = arith.mulf %618, %617 : vector<12x1xf32>
    %620 = arith.addf %563, %619 : vector<12x1xf32>
    %c10_i32 = arith.constant 10 : i32
    %621 = vector.broadcast %c10_i32 : i32 to vector<16x12xi32>
    %622 = arith.cmpi eq, %16, %621 : vector<16x12xi32>
    %623 = vector.broadcast %598 : i32 to vector<16x12xi32>
    %624 = arith.cmpi eq, %17, %623 : vector<16x12xi32>
    %625 = arith.andi %622, %624 : vector<16x12xi1>
    %cst_201 = arith.constant 1.000000e+00 : f32
    %626 = vector.broadcast %cst_201 : f32 to vector<16x12xf32>
    %627 = arith.select %625, %626, %570 : vector<16x12xi1>, vector<16x12xf32>
    %c10_i32_202 = arith.constant 10 : i32
    %628 = vector.broadcast %c10_i32_202 : i32 to vector<16x12xi32>
    %629 = arith.cmpi eq, %16, %628 : vector<16x12xi32>
    %630 = vector.broadcast %599 : i32 to vector<16x12xi32>
    %631 = arith.cmpi eq, %17, %630 : vector<16x12xi32>
    %632 = arith.andi %629, %631 : vector<16x12xi1>
    %cst_203 = arith.constant 1.000000e+00 : f32
    %633 = vector.broadcast %cst_203 : f32 to vector<16x12xf32>
    %634 = arith.select %632, %633, %577 : vector<16x12xi1>, vector<16x12xf32>
    %c10_i32_204 = arith.constant 10 : i32
    %635 = vector.broadcast %c10_i32_204 : i32 to vector<12x32xi32>
    %636 = arith.cmpi eq, %19, %635 : vector<12x32xi32>
    %637 = vector.broadcast %596 : i32 to vector<12x32xi32>
    %638 = arith.cmpi eq, %18, %637 : vector<12x32xi32>
    %639 = arith.andi %636, %638 : vector<12x32xi1>
    %cst_205 = arith.constant 1.000000e+00 : f32
    %cst_206 = arith.constant 0.000000e+00 : f32
    %640 = vector.broadcast %cst_205 : f32 to vector<12x32xf32>
    %641 = vector.broadcast %cst_206 : f32 to vector<12x32xf32>
    %642 = arith.select %639, %640, %641 : vector<12x32xi1>, vector<12x32xf32>
    %c10_i32_207 = arith.constant 10 : i32
    %643 = vector.broadcast %c10_i32_207 : i32 to vector<12x32xi32>
    %644 = arith.cmpi eq, %19, %643 : vector<12x32xi32>
    %645 = vector.broadcast %597 : i32 to vector<12x32xi32>
    %646 = arith.cmpi eq, %18, %645 : vector<12x32xi32>
    %647 = arith.andi %644, %646 : vector<12x32xi1>
    %cst_208 = arith.constant 1.000000e+00 : f32
    %cst_209 = arith.constant 0.000000e+00 : f32
    %648 = vector.broadcast %cst_208 : f32 to vector<12x32xf32>
    %649 = vector.broadcast %cst_209 : f32 to vector<12x32xf32>
    %650 = arith.select %647, %648, %649 : vector<12x32xi1>, vector<12x32xf32>
    %651 = arith.addf %642, %650 : vector<12x32xf32>
    %652 = arith.addf %595, %651 : vector<12x32xf32>
    %c11_210 = arith.constant 11 : index
    %653 = memref.load %arg0[%c11_210] : memref<32xi32, #tpu.memory_space<smem>>
    %c27 = arith.constant 27 : index
    %654 = memref.load %arg0[%c27] : memref<32xi32, #tpu.memory_space<smem>>
    %c22_211 = arith.constant 22 : index
    %655 = memref.load %arg0[%c22_211] : memref<32xi32, #tpu.memory_space<smem>>
    %c23_212 = arith.constant 23 : index
    %656 = memref.load %arg0[%c23_212] : memref<32xi32, #tpu.memory_space<smem>>
    %657 = arith.cmpi ne, %653, %654 : i32
    %cst_213 = arith.constant 1.000000e+00 : f32
    %cst_214 = arith.constant 0.000000e+00 : f32
    %658 = arith.select %657, %cst_213, %cst_214 : f32
    %659 = vector.broadcast %654 : i32 to vector<12x12xi32>
    %660 = arith.cmpi eq, %14, %659 : vector<12x12xi32>
    %661 = vector.broadcast %653 : i32 to vector<12x12xi32>
    %662 = arith.cmpi eq, %15, %661 : vector<12x12xi32>
    %663 = arith.andi %660, %662 : vector<12x12xi1>
    %cst_215 = arith.constant 1.000000e+00 : f32
    %cst_216 = arith.constant 0.000000e+00 : f32
    %664 = vector.broadcast %cst_215 : f32 to vector<12x12xf32>
    %665 = vector.broadcast %cst_216 : f32 to vector<12x12xf32>
    %666 = arith.select %663, %664, %665 : vector<12x12xi1>, vector<12x12xf32>
    %667 = vector.broadcast %658 : f32 to vector<12x12xf32>
    %668 = arith.mulf %667, %666 : vector<12x12xf32>
    %669 = arith.addf %612, %668 : vector<12x12xf32>
    %670 = vector.broadcast %653 : i32 to vector<12x1xi32>
    %671 = arith.cmpi eq, %20, %670 : vector<12x1xi32>
    %cst_217 = arith.constant 1.000000e+00 : f32
    %cst_218 = arith.constant 0.000000e+00 : f32
    %672 = vector.broadcast %cst_217 : f32 to vector<12x1xf32>
    %673 = vector.broadcast %cst_218 : f32 to vector<12x1xf32>
    %674 = arith.select %671, %672, %673 : vector<12x1xi1>, vector<12x1xf32>
    %675 = vector.broadcast %658 : f32 to vector<12x1xf32>
    %676 = arith.mulf %675, %674 : vector<12x1xf32>
    %677 = arith.addf %620, %676 : vector<12x1xf32>
    %c11_i32 = arith.constant 11 : i32
    %678 = vector.broadcast %c11_i32 : i32 to vector<16x12xi32>
    %679 = arith.cmpi eq, %16, %678 : vector<16x12xi32>
    %680 = vector.broadcast %655 : i32 to vector<16x12xi32>
    %681 = arith.cmpi eq, %17, %680 : vector<16x12xi32>
    %682 = arith.andi %679, %681 : vector<16x12xi1>
    %cst_219 = arith.constant 1.000000e+00 : f32
    %683 = vector.broadcast %cst_219 : f32 to vector<16x12xf32>
    %684 = arith.select %682, %683, %627 : vector<16x12xi1>, vector<16x12xf32>
    %c11_i32_220 = arith.constant 11 : i32
    %685 = vector.broadcast %c11_i32_220 : i32 to vector<16x12xi32>
    %686 = arith.cmpi eq, %16, %685 : vector<16x12xi32>
    %687 = vector.broadcast %656 : i32 to vector<16x12xi32>
    %688 = arith.cmpi eq, %17, %687 : vector<16x12xi32>
    %689 = arith.andi %686, %688 : vector<16x12xi1>
    %cst_221 = arith.constant 1.000000e+00 : f32
    %690 = vector.broadcast %cst_221 : f32 to vector<16x12xf32>
    %691 = arith.select %689, %690, %634 : vector<16x12xi1>, vector<16x12xf32>
    %c11_i32_222 = arith.constant 11 : i32
    %692 = vector.broadcast %c11_i32_222 : i32 to vector<12x32xi32>
    %693 = arith.cmpi eq, %19, %692 : vector<12x32xi32>
    %694 = vector.broadcast %653 : i32 to vector<12x32xi32>
    %695 = arith.cmpi eq, %18, %694 : vector<12x32xi32>
    %696 = arith.andi %693, %695 : vector<12x32xi1>
    %cst_223 = arith.constant 1.000000e+00 : f32
    %cst_224 = arith.constant 0.000000e+00 : f32
    %697 = vector.broadcast %cst_223 : f32 to vector<12x32xf32>
    %698 = vector.broadcast %cst_224 : f32 to vector<12x32xf32>
    %699 = arith.select %696, %697, %698 : vector<12x32xi1>, vector<12x32xf32>
    %c11_i32_225 = arith.constant 11 : i32
    %700 = vector.broadcast %c11_i32_225 : i32 to vector<12x32xi32>
    %701 = arith.cmpi eq, %19, %700 : vector<12x32xi32>
    %702 = vector.broadcast %654 : i32 to vector<12x32xi32>
    %703 = arith.cmpi eq, %18, %702 : vector<12x32xi32>
    %704 = arith.andi %701, %703 : vector<12x32xi1>
    %cst_226 = arith.constant 1.000000e+00 : f32
    %cst_227 = arith.constant 0.000000e+00 : f32
    %705 = vector.broadcast %cst_226 : f32 to vector<12x32xf32>
    %706 = vector.broadcast %cst_227 : f32 to vector<12x32xf32>
    %707 = arith.select %704, %705, %706 : vector<12x32xi1>, vector<12x32xf32>
    %708 = arith.addf %699, %707 : vector<12x32xf32>
    %709 = arith.addf %652, %708 : vector<12x32xf32>
    %c12_228 = arith.constant 12 : index
    %710 = memref.load %arg0[%c12_228] : memref<32xi32, #tpu.memory_space<smem>>
    %c28 = arith.constant 28 : index
    %711 = memref.load %arg0[%c28] : memref<32xi32, #tpu.memory_space<smem>>
    %c24_229 = arith.constant 24 : index
    %712 = memref.load %arg0[%c24_229] : memref<32xi32, #tpu.memory_space<smem>>
    %c25_230 = arith.constant 25 : index
    %713 = memref.load %arg0[%c25_230] : memref<32xi32, #tpu.memory_space<smem>>
    %714 = arith.cmpi ne, %710, %711 : i32
    %cst_231 = arith.constant 1.000000e+00 : f32
    %cst_232 = arith.constant 0.000000e+00 : f32
    %715 = arith.select %714, %cst_231, %cst_232 : f32
    %716 = vector.broadcast %711 : i32 to vector<12x12xi32>
    %717 = arith.cmpi eq, %14, %716 : vector<12x12xi32>
    %718 = vector.broadcast %710 : i32 to vector<12x12xi32>
    %719 = arith.cmpi eq, %15, %718 : vector<12x12xi32>
    %720 = arith.andi %717, %719 : vector<12x12xi1>
    %cst_233 = arith.constant 1.000000e+00 : f32
    %cst_234 = arith.constant 0.000000e+00 : f32
    %721 = vector.broadcast %cst_233 : f32 to vector<12x12xf32>
    %722 = vector.broadcast %cst_234 : f32 to vector<12x12xf32>
    %723 = arith.select %720, %721, %722 : vector<12x12xi1>, vector<12x12xf32>
    %724 = vector.broadcast %715 : f32 to vector<12x12xf32>
    %725 = arith.mulf %724, %723 : vector<12x12xf32>
    %726 = arith.addf %669, %725 : vector<12x12xf32>
    %727 = vector.broadcast %710 : i32 to vector<12x1xi32>
    %728 = arith.cmpi eq, %20, %727 : vector<12x1xi32>
    %cst_235 = arith.constant 1.000000e+00 : f32
    %cst_236 = arith.constant 0.000000e+00 : f32
    %729 = vector.broadcast %cst_235 : f32 to vector<12x1xf32>
    %730 = vector.broadcast %cst_236 : f32 to vector<12x1xf32>
    %731 = arith.select %728, %729, %730 : vector<12x1xi1>, vector<12x1xf32>
    %732 = vector.broadcast %715 : f32 to vector<12x1xf32>
    %733 = arith.mulf %732, %731 : vector<12x1xf32>
    %734 = arith.addf %677, %733 : vector<12x1xf32>
    %c12_i32 = arith.constant 12 : i32
    %735 = vector.broadcast %c12_i32 : i32 to vector<16x12xi32>
    %736 = arith.cmpi eq, %16, %735 : vector<16x12xi32>
    %737 = vector.broadcast %712 : i32 to vector<16x12xi32>
    %738 = arith.cmpi eq, %17, %737 : vector<16x12xi32>
    %739 = arith.andi %736, %738 : vector<16x12xi1>
    %cst_237 = arith.constant 1.000000e+00 : f32
    %740 = vector.broadcast %cst_237 : f32 to vector<16x12xf32>
    %741 = arith.select %739, %740, %684 : vector<16x12xi1>, vector<16x12xf32>
    %c12_i32_238 = arith.constant 12 : i32
    %742 = vector.broadcast %c12_i32_238 : i32 to vector<16x12xi32>
    %743 = arith.cmpi eq, %16, %742 : vector<16x12xi32>
    %744 = vector.broadcast %713 : i32 to vector<16x12xi32>
    %745 = arith.cmpi eq, %17, %744 : vector<16x12xi32>
    %746 = arith.andi %743, %745 : vector<16x12xi1>
    %cst_239 = arith.constant 1.000000e+00 : f32
    %747 = vector.broadcast %cst_239 : f32 to vector<16x12xf32>
    %748 = arith.select %746, %747, %691 : vector<16x12xi1>, vector<16x12xf32>
    %c12_i32_240 = arith.constant 12 : i32
    %749 = vector.broadcast %c12_i32_240 : i32 to vector<12x32xi32>
    %750 = arith.cmpi eq, %19, %749 : vector<12x32xi32>
    %751 = vector.broadcast %710 : i32 to vector<12x32xi32>
    %752 = arith.cmpi eq, %18, %751 : vector<12x32xi32>
    %753 = arith.andi %750, %752 : vector<12x32xi1>
    %cst_241 = arith.constant 1.000000e+00 : f32
    %cst_242 = arith.constant 0.000000e+00 : f32
    %754 = vector.broadcast %cst_241 : f32 to vector<12x32xf32>
    %755 = vector.broadcast %cst_242 : f32 to vector<12x32xf32>
    %756 = arith.select %753, %754, %755 : vector<12x32xi1>, vector<12x32xf32>
    %c12_i32_243 = arith.constant 12 : i32
    %757 = vector.broadcast %c12_i32_243 : i32 to vector<12x32xi32>
    %758 = arith.cmpi eq, %19, %757 : vector<12x32xi32>
    %759 = vector.broadcast %711 : i32 to vector<12x32xi32>
    %760 = arith.cmpi eq, %18, %759 : vector<12x32xi32>
    %761 = arith.andi %758, %760 : vector<12x32xi1>
    %cst_244 = arith.constant 1.000000e+00 : f32
    %cst_245 = arith.constant 0.000000e+00 : f32
    %762 = vector.broadcast %cst_244 : f32 to vector<12x32xf32>
    %763 = vector.broadcast %cst_245 : f32 to vector<12x32xf32>
    %764 = arith.select %761, %762, %763 : vector<12x32xi1>, vector<12x32xf32>
    %765 = arith.addf %756, %764 : vector<12x32xf32>
    %766 = arith.addf %709, %765 : vector<12x32xf32>
    %c13_246 = arith.constant 13 : index
    %767 = memref.load %arg0[%c13_246] : memref<32xi32, #tpu.memory_space<smem>>
    %c29 = arith.constant 29 : index
    %768 = memref.load %arg0[%c29] : memref<32xi32, #tpu.memory_space<smem>>
    %c26_247 = arith.constant 26 : index
    %769 = memref.load %arg0[%c26_247] : memref<32xi32, #tpu.memory_space<smem>>
    %c27_248 = arith.constant 27 : index
    %770 = memref.load %arg0[%c27_248] : memref<32xi32, #tpu.memory_space<smem>>
    %771 = arith.cmpi ne, %767, %768 : i32
    %cst_249 = arith.constant 1.000000e+00 : f32
    %cst_250 = arith.constant 0.000000e+00 : f32
    %772 = arith.select %771, %cst_249, %cst_250 : f32
    %773 = vector.broadcast %768 : i32 to vector<12x12xi32>
    %774 = arith.cmpi eq, %14, %773 : vector<12x12xi32>
    %775 = vector.broadcast %767 : i32 to vector<12x12xi32>
    %776 = arith.cmpi eq, %15, %775 : vector<12x12xi32>
    %777 = arith.andi %774, %776 : vector<12x12xi1>
    %cst_251 = arith.constant 1.000000e+00 : f32
    %cst_252 = arith.constant 0.000000e+00 : f32
    %778 = vector.broadcast %cst_251 : f32 to vector<12x12xf32>
    %779 = vector.broadcast %cst_252 : f32 to vector<12x12xf32>
    %780 = arith.select %777, %778, %779 : vector<12x12xi1>, vector<12x12xf32>
    %781 = vector.broadcast %772 : f32 to vector<12x12xf32>
    %782 = arith.mulf %781, %780 : vector<12x12xf32>
    %783 = arith.addf %726, %782 : vector<12x12xf32>
    %784 = vector.broadcast %767 : i32 to vector<12x1xi32>
    %785 = arith.cmpi eq, %20, %784 : vector<12x1xi32>
    %cst_253 = arith.constant 1.000000e+00 : f32
    %cst_254 = arith.constant 0.000000e+00 : f32
    %786 = vector.broadcast %cst_253 : f32 to vector<12x1xf32>
    %787 = vector.broadcast %cst_254 : f32 to vector<12x1xf32>
    %788 = arith.select %785, %786, %787 : vector<12x1xi1>, vector<12x1xf32>
    %789 = vector.broadcast %772 : f32 to vector<12x1xf32>
    %790 = arith.mulf %789, %788 : vector<12x1xf32>
    %791 = arith.addf %734, %790 : vector<12x1xf32>
    %c13_i32 = arith.constant 13 : i32
    %792 = vector.broadcast %c13_i32 : i32 to vector<16x12xi32>
    %793 = arith.cmpi eq, %16, %792 : vector<16x12xi32>
    %794 = vector.broadcast %769 : i32 to vector<16x12xi32>
    %795 = arith.cmpi eq, %17, %794 : vector<16x12xi32>
    %796 = arith.andi %793, %795 : vector<16x12xi1>
    %cst_255 = arith.constant 1.000000e+00 : f32
    %797 = vector.broadcast %cst_255 : f32 to vector<16x12xf32>
    %798 = arith.select %796, %797, %741 : vector<16x12xi1>, vector<16x12xf32>
    %c13_i32_256 = arith.constant 13 : i32
    %799 = vector.broadcast %c13_i32_256 : i32 to vector<16x12xi32>
    %800 = arith.cmpi eq, %16, %799 : vector<16x12xi32>
    %801 = vector.broadcast %770 : i32 to vector<16x12xi32>
    %802 = arith.cmpi eq, %17, %801 : vector<16x12xi32>
    %803 = arith.andi %800, %802 : vector<16x12xi1>
    %cst_257 = arith.constant 1.000000e+00 : f32
    %804 = vector.broadcast %cst_257 : f32 to vector<16x12xf32>
    %805 = arith.select %803, %804, %748 : vector<16x12xi1>, vector<16x12xf32>
    %c13_i32_258 = arith.constant 13 : i32
    %806 = vector.broadcast %c13_i32_258 : i32 to vector<12x32xi32>
    %807 = arith.cmpi eq, %19, %806 : vector<12x32xi32>
    %808 = vector.broadcast %767 : i32 to vector<12x32xi32>
    %809 = arith.cmpi eq, %18, %808 : vector<12x32xi32>
    %810 = arith.andi %807, %809 : vector<12x32xi1>
    %cst_259 = arith.constant 1.000000e+00 : f32
    %cst_260 = arith.constant 0.000000e+00 : f32
    %811 = vector.broadcast %cst_259 : f32 to vector<12x32xf32>
    %812 = vector.broadcast %cst_260 : f32 to vector<12x32xf32>
    %813 = arith.select %810, %811, %812 : vector<12x32xi1>, vector<12x32xf32>
    %c13_i32_261 = arith.constant 13 : i32
    %814 = vector.broadcast %c13_i32_261 : i32 to vector<12x32xi32>
    %815 = arith.cmpi eq, %19, %814 : vector<12x32xi32>
    %816 = vector.broadcast %768 : i32 to vector<12x32xi32>
    %817 = arith.cmpi eq, %18, %816 : vector<12x32xi32>
    %818 = arith.andi %815, %817 : vector<12x32xi1>
    %cst_262 = arith.constant 1.000000e+00 : f32
    %cst_263 = arith.constant 0.000000e+00 : f32
    %819 = vector.broadcast %cst_262 : f32 to vector<12x32xf32>
    %820 = vector.broadcast %cst_263 : f32 to vector<12x32xf32>
    %821 = arith.select %818, %819, %820 : vector<12x32xi1>, vector<12x32xf32>
    %822 = arith.addf %813, %821 : vector<12x32xf32>
    %823 = arith.addf %766, %822 : vector<12x32xf32>
    %c14_264 = arith.constant 14 : index
    %824 = memref.load %arg0[%c14_264] : memref<32xi32, #tpu.memory_space<smem>>
    %c30 = arith.constant 30 : index
    %825 = memref.load %arg0[%c30] : memref<32xi32, #tpu.memory_space<smem>>
    %c28_265 = arith.constant 28 : index
    %826 = memref.load %arg0[%c28_265] : memref<32xi32, #tpu.memory_space<smem>>
    %c29_266 = arith.constant 29 : index
    %827 = memref.load %arg0[%c29_266] : memref<32xi32, #tpu.memory_space<smem>>
    %828 = arith.cmpi ne, %824, %825 : i32
    %cst_267 = arith.constant 1.000000e+00 : f32
    %cst_268 = arith.constant 0.000000e+00 : f32
    %829 = arith.select %828, %cst_267, %cst_268 : f32
    %830 = vector.broadcast %825 : i32 to vector<12x12xi32>
    %831 = arith.cmpi eq, %14, %830 : vector<12x12xi32>
    %832 = vector.broadcast %824 : i32 to vector<12x12xi32>
    %833 = arith.cmpi eq, %15, %832 : vector<12x12xi32>
    %834 = arith.andi %831, %833 : vector<12x12xi1>
    %cst_269 = arith.constant 1.000000e+00 : f32
    %cst_270 = arith.constant 0.000000e+00 : f32
    %835 = vector.broadcast %cst_269 : f32 to vector<12x12xf32>
    %836 = vector.broadcast %cst_270 : f32 to vector<12x12xf32>
    %837 = arith.select %834, %835, %836 : vector<12x12xi1>, vector<12x12xf32>
    %838 = vector.broadcast %829 : f32 to vector<12x12xf32>
    %839 = arith.mulf %838, %837 : vector<12x12xf32>
    %840 = arith.addf %783, %839 : vector<12x12xf32>
    %841 = vector.broadcast %824 : i32 to vector<12x1xi32>
    %842 = arith.cmpi eq, %20, %841 : vector<12x1xi32>
    %cst_271 = arith.constant 1.000000e+00 : f32
    %cst_272 = arith.constant 0.000000e+00 : f32
    %843 = vector.broadcast %cst_271 : f32 to vector<12x1xf32>
    %844 = vector.broadcast %cst_272 : f32 to vector<12x1xf32>
    %845 = arith.select %842, %843, %844 : vector<12x1xi1>, vector<12x1xf32>
    %846 = vector.broadcast %829 : f32 to vector<12x1xf32>
    %847 = arith.mulf %846, %845 : vector<12x1xf32>
    %848 = arith.addf %791, %847 : vector<12x1xf32>
    %c14_i32 = arith.constant 14 : i32
    %849 = vector.broadcast %c14_i32 : i32 to vector<16x12xi32>
    %850 = arith.cmpi eq, %16, %849 : vector<16x12xi32>
    %851 = vector.broadcast %826 : i32 to vector<16x12xi32>
    %852 = arith.cmpi eq, %17, %851 : vector<16x12xi32>
    %853 = arith.andi %850, %852 : vector<16x12xi1>
    %cst_273 = arith.constant 1.000000e+00 : f32
    %854 = vector.broadcast %cst_273 : f32 to vector<16x12xf32>
    %855 = arith.select %853, %854, %798 : vector<16x12xi1>, vector<16x12xf32>
    %c14_i32_274 = arith.constant 14 : i32
    %856 = vector.broadcast %c14_i32_274 : i32 to vector<16x12xi32>
    %857 = arith.cmpi eq, %16, %856 : vector<16x12xi32>
    %858 = vector.broadcast %827 : i32 to vector<16x12xi32>
    %859 = arith.cmpi eq, %17, %858 : vector<16x12xi32>
    %860 = arith.andi %857, %859 : vector<16x12xi1>
    %cst_275 = arith.constant 1.000000e+00 : f32
    %861 = vector.broadcast %cst_275 : f32 to vector<16x12xf32>
    %862 = arith.select %860, %861, %805 : vector<16x12xi1>, vector<16x12xf32>
    %c14_i32_276 = arith.constant 14 : i32
    %863 = vector.broadcast %c14_i32_276 : i32 to vector<12x32xi32>
    %864 = arith.cmpi eq, %19, %863 : vector<12x32xi32>
    %865 = vector.broadcast %824 : i32 to vector<12x32xi32>
    %866 = arith.cmpi eq, %18, %865 : vector<12x32xi32>
    %867 = arith.andi %864, %866 : vector<12x32xi1>
    %cst_277 = arith.constant 1.000000e+00 : f32
    %cst_278 = arith.constant 0.000000e+00 : f32
    %868 = vector.broadcast %cst_277 : f32 to vector<12x32xf32>
    %869 = vector.broadcast %cst_278 : f32 to vector<12x32xf32>
    %870 = arith.select %867, %868, %869 : vector<12x32xi1>, vector<12x32xf32>
    %c14_i32_279 = arith.constant 14 : i32
    %871 = vector.broadcast %c14_i32_279 : i32 to vector<12x32xi32>
    %872 = arith.cmpi eq, %19, %871 : vector<12x32xi32>
    %873 = vector.broadcast %825 : i32 to vector<12x32xi32>
    %874 = arith.cmpi eq, %18, %873 : vector<12x32xi32>
    %875 = arith.andi %872, %874 : vector<12x32xi1>
    %cst_280 = arith.constant 1.000000e+00 : f32
    %cst_281 = arith.constant 0.000000e+00 : f32
    %876 = vector.broadcast %cst_280 : f32 to vector<12x32xf32>
    %877 = vector.broadcast %cst_281 : f32 to vector<12x32xf32>
    %878 = arith.select %875, %876, %877 : vector<12x32xi1>, vector<12x32xf32>
    %879 = arith.addf %870, %878 : vector<12x32xf32>
    %880 = arith.addf %823, %879 : vector<12x32xf32>
    %c15_282 = arith.constant 15 : index
    %881 = memref.load %arg0[%c15_282] : memref<32xi32, #tpu.memory_space<smem>>
    %c31 = arith.constant 31 : index
    %882 = memref.load %arg0[%c31] : memref<32xi32, #tpu.memory_space<smem>>
    %c30_283 = arith.constant 30 : index
    %883 = memref.load %arg0[%c30_283] : memref<32xi32, #tpu.memory_space<smem>>
    %c31_284 = arith.constant 31 : index
    %884 = memref.load %arg0[%c31_284] : memref<32xi32, #tpu.memory_space<smem>>
    %885 = arith.cmpi ne, %881, %882 : i32
    %cst_285 = arith.constant 1.000000e+00 : f32
    %cst_286 = arith.constant 0.000000e+00 : f32
    %886 = arith.select %885, %cst_285, %cst_286 : f32
    %887 = vector.broadcast %882 : i32 to vector<12x12xi32>
    %888 = arith.cmpi eq, %14, %887 : vector<12x12xi32>
    %889 = vector.broadcast %881 : i32 to vector<12x12xi32>
    %890 = arith.cmpi eq, %15, %889 : vector<12x12xi32>
    %891 = arith.andi %888, %890 : vector<12x12xi1>
    %cst_287 = arith.constant 1.000000e+00 : f32
    %cst_288 = arith.constant 0.000000e+00 : f32
    %892 = vector.broadcast %cst_287 : f32 to vector<12x12xf32>
    %893 = vector.broadcast %cst_288 : f32 to vector<12x12xf32>
    %894 = arith.select %891, %892, %893 : vector<12x12xi1>, vector<12x12xf32>
    %895 = vector.broadcast %886 : f32 to vector<12x12xf32>
    %896 = arith.mulf %895, %894 : vector<12x12xf32>
    %897 = arith.addf %840, %896 : vector<12x12xf32>
    %898 = vector.broadcast %881 : i32 to vector<12x1xi32>
    %899 = arith.cmpi eq, %20, %898 : vector<12x1xi32>
    %cst_289 = arith.constant 1.000000e+00 : f32
    %cst_290 = arith.constant 0.000000e+00 : f32
    %900 = vector.broadcast %cst_289 : f32 to vector<12x1xf32>
    %901 = vector.broadcast %cst_290 : f32 to vector<12x1xf32>
    %902 = arith.select %899, %900, %901 : vector<12x1xi1>, vector<12x1xf32>
    %903 = vector.broadcast %886 : f32 to vector<12x1xf32>
    %904 = arith.mulf %903, %902 : vector<12x1xf32>
    %905 = arith.addf %848, %904 : vector<12x1xf32>
    %c15_i32 = arith.constant 15 : i32
    %906 = vector.broadcast %c15_i32 : i32 to vector<16x12xi32>
    %907 = arith.cmpi eq, %16, %906 : vector<16x12xi32>
    %908 = vector.broadcast %883 : i32 to vector<16x12xi32>
    %909 = arith.cmpi eq, %17, %908 : vector<16x12xi32>
    %910 = arith.andi %907, %909 : vector<16x12xi1>
    %cst_291 = arith.constant 1.000000e+00 : f32
    %911 = vector.broadcast %cst_291 : f32 to vector<16x12xf32>
    %912 = arith.select %910, %911, %855 : vector<16x12xi1>, vector<16x12xf32>
    %c15_i32_292 = arith.constant 15 : i32
    %913 = vector.broadcast %c15_i32_292 : i32 to vector<16x12xi32>
    %914 = arith.cmpi eq, %16, %913 : vector<16x12xi32>
    %915 = vector.broadcast %884 : i32 to vector<16x12xi32>
    %916 = arith.cmpi eq, %17, %915 : vector<16x12xi32>
    %917 = arith.andi %914, %916 : vector<16x12xi1>
    %cst_293 = arith.constant 1.000000e+00 : f32
    %918 = vector.broadcast %cst_293 : f32 to vector<16x12xf32>
    %919 = arith.select %917, %918, %862 : vector<16x12xi1>, vector<16x12xf32>
    %c15_i32_294 = arith.constant 15 : i32
    %920 = vector.broadcast %c15_i32_294 : i32 to vector<12x32xi32>
    %921 = arith.cmpi eq, %19, %920 : vector<12x32xi32>
    %922 = vector.broadcast %881 : i32 to vector<12x32xi32>
    %923 = arith.cmpi eq, %18, %922 : vector<12x32xi32>
    %924 = arith.andi %921, %923 : vector<12x32xi1>
    %cst_295 = arith.constant 1.000000e+00 : f32
    %cst_296 = arith.constant 0.000000e+00 : f32
    %925 = vector.broadcast %cst_295 : f32 to vector<12x32xf32>
    %926 = vector.broadcast %cst_296 : f32 to vector<12x32xf32>
    %927 = arith.select %924, %925, %926 : vector<12x32xi1>, vector<12x32xf32>
    %c15_i32_297 = arith.constant 15 : i32
    %928 = vector.broadcast %c15_i32_297 : i32 to vector<12x32xi32>
    %929 = arith.cmpi eq, %19, %928 : vector<12x32xi32>
    %930 = vector.broadcast %882 : i32 to vector<12x32xi32>
    %931 = arith.cmpi eq, %18, %930 : vector<12x32xi32>
    %932 = arith.andi %929, %931 : vector<12x32xi1>
    %cst_298 = arith.constant 1.000000e+00 : f32
    %cst_299 = arith.constant 0.000000e+00 : f32
    %933 = vector.broadcast %cst_298 : f32 to vector<12x32xf32>
    %934 = vector.broadcast %cst_299 : f32 to vector<12x32xf32>
    %935 = arith.select %932, %933, %934 : vector<12x32xi1>, vector<12x32xf32>
    %936 = arith.addf %927, %935 : vector<12x32xf32>
    %937 = arith.addf %880, %936 : vector<12x32xf32>
    %c0_300 = arith.constant 0 : index
    %c0_301 = arith.constant 0 : index
    %938 = vector.load %arg1[%c0_300, %c0_301] : memref<12x16xf32, #tpu.memory_space<vmem>>, vector<12x16xf32>
    %cst_302 = arith.constant 0.000000e+00 : f32
    %939 = vector.broadcast %cst_302 : f32 to vector<12x1xf32>
    %940 = arith.cmpf ogt, %905, %939 : vector<12x1xf32>
    %cst_303 = arith.constant 1.000000e+00 : f32
    %941 = vector.broadcast %cst_303 : f32 to vector<12x1xf32>
    %942 = arith.maximumf %905, %941 : vector<12x1xf32>
    %943 = math.rsqrt %942 : vector<12x1xf32>
    %cst_304 = arith.constant 0.000000e+00 : f32
    %944 = vector.broadcast %cst_304 : f32 to vector<12x1xf32>
    %945 = arith.select %940, %943, %944 : vector<12x1xi1>, vector<12x1xf32>
    %cst_305 = arith.constant 0.000000e+00 : f32
    %946 = vector.broadcast %cst_305 : f32 to vector<12x1xf32>
    %947 = arith.subf %946, %945 : vector<12x1xf32>
    %948 = vector.broadcast %945 : vector<12x1xf32> to vector<12x16xf32>
    %949 = arith.mulf %948, %938 : vector<12x16xf32>
    %cst_306 = arith.constant dense<0.000000e+00> : vector<12x16xf32>
    %950 = tpu.matmul %897, %949, %cst_306 {dimension_numbers = #tpu.dot_dimension_numbers<[1], [0], [0], [1], [0, 0, 1, 1], [], []>} : vector<12x12xf32>, vector<12x16xf32>, vector<12x16xf32> -> vector<12x16xf32>
    %951 = vector.broadcast %947 : vector<12x1xf32> to vector<12x16xf32>
    %952 = arith.mulf %951, %950 : vector<12x16xf32>
    %cst_307 = arith.constant dense<0.000000e+00> : vector<12x16xf32>
    %953 = tpu.matmul %938, %0, %cst_307 {dimension_numbers = #tpu.dot_dimension_numbers<[1], [0], [0], [1], [0, 0, 1, 1], [], []>} : vector<12x16xf32>, vector<16x16xf32>, vector<12x16xf32> -> vector<12x16xf32>
    %cst_308 = arith.constant dense<0.000000e+00> : vector<12x16xf32>
    %954 = tpu.matmul %952, %1, %cst_308 {dimension_numbers = #tpu.dot_dimension_numbers<[1], [0], [0], [1], [0, 0, 1, 1], [], []>} : vector<12x16xf32>, vector<16x16xf32>, vector<12x16xf32> -> vector<12x16xf32>
    %955 = arith.addf %953, %954 : vector<12x16xf32>
    %956 = vector.broadcast %7 : vector<1x16xf32> to vector<12x16xf32>
    %957 = arith.addf %955, %956 : vector<12x16xf32>
    %cst_309 = arith.constant 0.000000e+00 : f32
    %958 = vector.broadcast %cst_309 : f32 to vector<12x16xf32>
    %959 = arith.maximumf %957, %958 : vector<12x16xf32>
    %cst_310 = arith.constant dense<0.000000e+00> : vector<16x16xf32>
    %960 = tpu.matmul %912, %959, %cst_310 {dimension_numbers = #tpu.dot_dimension_numbers<[1], [0], [0], [1], [0, 0, 1, 1], [], []>} : vector<16x12xf32>, vector<12x16xf32>, vector<16x16xf32> -> vector<16x16xf32>
    %cst_311 = arith.constant dense<0.000000e+00> : vector<16x16xf32>
    %961 = tpu.matmul %919, %959, %cst_311 {dimension_numbers = #tpu.dot_dimension_numbers<[1], [0], [0], [1], [0, 0, 1, 1], [], []>} : vector<16x12xf32>, vector<12x16xf32>, vector<16x16xf32> -> vector<16x16xf32>
    %cst_312 = arith.constant dense<0.000000e+00> : vector<16x128xf32>
    %962 = tpu.matmul %960, %2, %cst_312 {dimension_numbers = #tpu.dot_dimension_numbers<[1], [0], [0], [1], [0, 0, 1, 1], [], []>} : vector<16x16xf32>, vector<16x128xf32>, vector<16x128xf32> -> vector<16x128xf32>
    %cst_313 = arith.constant dense<0.000000e+00> : vector<16x128xf32>
    %963 = tpu.matmul %961, %3, %cst_313 {dimension_numbers = #tpu.dot_dimension_numbers<[1], [0], [0], [1], [0, 0, 1, 1], [], []>} : vector<16x16xf32>, vector<16x128xf32>, vector<16x128xf32> -> vector<16x128xf32>
    %964 = arith.addf %962, %963 : vector<16x128xf32>
    %965 = vector.broadcast %6 : vector<1x128xf32> to vector<16x128xf32>
    %966 = arith.addf %964, %965 : vector<16x128xf32>
    %cst_314 = arith.constant 0.000000e+00 : f32
    %967 = vector.broadcast %cst_314 : f32 to vector<1x32xf32>
    %cst_315 = arith.constant 0.000000e+00 : f32
    %968 = vector.broadcast %cst_315 : f32 to vector<1x32xf32>
    %969 = vector.extract_strided_slice %966 {offsets = [0, 0], sizes = [1, 128], strides = [1, 1]} : vector<16x128xf32> to vector<1x128xf32>
    %cst_316 = arith.constant dense<0.000000e+00> : vector<1x128xf32>
    %970 = tpu.matmul %967, %4, %cst_316 {dimension_numbers = #tpu.dot_dimension_numbers<[1], [0], [0], [1], [0, 0, 1, 1], [], []>} : vector<1x32xf32>, vector<32x128xf32>, vector<1x128xf32> -> vector<1x128xf32>
    %971 = arith.addf %969, %970 : vector<1x128xf32>
    %972 = vector.extract_strided_slice %971 {offsets = [0, 0], sizes = [1, 96], strides = [1, 1]} : vector<1x128xf32> to vector<1x96xf32>
    %973 = arith.negf %972 : vector<1x96xf32>
    %974 = math.exp %973 : vector<1x96xf32>
    %cst_317 = arith.constant 1.000000e+00 : f32
    %975 = vector.broadcast %cst_317 : f32 to vector<1x96xf32>
    %976 = arith.addf %975, %974 : vector<1x96xf32>
    %977 = arith.divf %975, %976 : vector<1x96xf32>
    %978 = vector.extract_strided_slice %971 {offsets = [0, 96], sizes = [1, 32], strides = [1, 1]} : vector<1x128xf32> to vector<1x32xf32>
    %979 = math.tanh %978 : vector<1x32xf32>
    %980 = vector.extract_strided_slice %977 {offsets = [0, 0], sizes = [1, 32], strides = [1, 1]} : vector<1x96xf32> to vector<1x32xf32>
    %981 = vector.extract_strided_slice %977 {offsets = [0, 32], sizes = [1, 32], strides = [1, 1]} : vector<1x96xf32> to vector<1x32xf32>
    %982 = vector.extract_strided_slice %977 {offsets = [0, 64], sizes = [1, 32], strides = [1, 1]} : vector<1x96xf32> to vector<1x32xf32>
    %983 = arith.mulf %981, %968 : vector<1x32xf32>
    %984 = arith.mulf %980, %979 : vector<1x32xf32>
    %985 = arith.addf %983, %984 : vector<1x32xf32>
    %986 = math.tanh %985 : vector<1x32xf32>
    %987 = arith.mulf %982, %986 : vector<1x32xf32>
    %988 = vector.extract_strided_slice %966 {offsets = [1, 0], sizes = [1, 128], strides = [1, 1]} : vector<16x128xf32> to vector<1x128xf32>
    %cst_318 = arith.constant dense<0.000000e+00> : vector<1x128xf32>
    %989 = tpu.matmul %987, %4, %cst_318 {dimension_numbers = #tpu.dot_dimension_numbers<[1], [0], [0], [1], [0, 0, 1, 1], [], []>} : vector<1x32xf32>, vector<32x128xf32>, vector<1x128xf32> -> vector<1x128xf32>
    %990 = arith.addf %988, %989 : vector<1x128xf32>
    %991 = vector.extract_strided_slice %990 {offsets = [0, 0], sizes = [1, 96], strides = [1, 1]} : vector<1x128xf32> to vector<1x96xf32>
    %992 = arith.negf %991 : vector<1x96xf32>
    %993 = math.exp %992 : vector<1x96xf32>
    %cst_319 = arith.constant 1.000000e+00 : f32
    %994 = vector.broadcast %cst_319 : f32 to vector<1x96xf32>
    %995 = arith.addf %994, %993 : vector<1x96xf32>
    %996 = arith.divf %994, %995 : vector<1x96xf32>
    %997 = vector.extract_strided_slice %990 {offsets = [0, 96], sizes = [1, 32], strides = [1, 1]} : vector<1x128xf32> to vector<1x32xf32>
    %998 = math.tanh %997 : vector<1x32xf32>
    %999 = vector.extract_strided_slice %996 {offsets = [0, 0], sizes = [1, 32], strides = [1, 1]} : vector<1x96xf32> to vector<1x32xf32>
    %1000 = vector.extract_strided_slice %996 {offsets = [0, 32], sizes = [1, 32], strides = [1, 1]} : vector<1x96xf32> to vector<1x32xf32>
    %1001 = vector.extract_strided_slice %996 {offsets = [0, 64], sizes = [1, 32], strides = [1, 1]} : vector<1x96xf32> to vector<1x32xf32>
    %1002 = arith.mulf %1000, %985 : vector<1x32xf32>
    %1003 = arith.mulf %999, %998 : vector<1x32xf32>
    %1004 = arith.addf %1002, %1003 : vector<1x32xf32>
    %1005 = math.tanh %1004 : vector<1x32xf32>
    %1006 = arith.mulf %1001, %1005 : vector<1x32xf32>
    %1007 = vector.extract_strided_slice %966 {offsets = [2, 0], sizes = [1, 128], strides = [1, 1]} : vector<16x128xf32> to vector<1x128xf32>
    %cst_320 = arith.constant dense<0.000000e+00> : vector<1x128xf32>
    %1008 = tpu.matmul %1006, %4, %cst_320 {dimension_numbers = #tpu.dot_dimension_numbers<[1], [0], [0], [1], [0, 0, 1, 1], [], []>} : vector<1x32xf32>, vector<32x128xf32>, vector<1x128xf32> -> vector<1x128xf32>
    %1009 = arith.addf %1007, %1008 : vector<1x128xf32>
    %1010 = vector.extract_strided_slice %1009 {offsets = [0, 0], sizes = [1, 96], strides = [1, 1]} : vector<1x128xf32> to vector<1x96xf32>
    %1011 = arith.negf %1010 : vector<1x96xf32>
    %1012 = math.exp %1011 : vector<1x96xf32>
    %cst_321 = arith.constant 1.000000e+00 : f32
    %1013 = vector.broadcast %cst_321 : f32 to vector<1x96xf32>
    %1014 = arith.addf %1013, %1012 : vector<1x96xf32>
    %1015 = arith.divf %1013, %1014 : vector<1x96xf32>
    %1016 = vector.extract_strided_slice %1009 {offsets = [0, 96], sizes = [1, 32], strides = [1, 1]} : vector<1x128xf32> to vector<1x32xf32>
    %1017 = math.tanh %1016 : vector<1x32xf32>
    %1018 = vector.extract_strided_slice %1015 {offsets = [0, 0], sizes = [1, 32], strides = [1, 1]} : vector<1x96xf32> to vector<1x32xf32>
    %1019 = vector.extract_strided_slice %1015 {offsets = [0, 32], sizes = [1, 32], strides = [1, 1]} : vector<1x96xf32> to vector<1x32xf32>
    %1020 = vector.extract_strided_slice %1015 {offsets = [0, 64], sizes = [1, 32], strides = [1, 1]} : vector<1x96xf32> to vector<1x32xf32>
    %1021 = arith.mulf %1019, %1004 : vector<1x32xf32>
    %1022 = arith.mulf %1018, %1017 : vector<1x32xf32>
    %1023 = arith.addf %1021, %1022 : vector<1x32xf32>
    %1024 = math.tanh %1023 : vector<1x32xf32>
    %1025 = arith.mulf %1020, %1024 : vector<1x32xf32>
    %1026 = vector.extract_strided_slice %966 {offsets = [3, 0], sizes = [1, 128], strides = [1, 1]} : vector<16x128xf32> to vector<1x128xf32>
    %cst_322 = arith.constant dense<0.000000e+00> : vector<1x128xf32>
    %1027 = tpu.matmul %1025, %4, %cst_322 {dimension_numbers = #tpu.dot_dimension_numbers<[1], [0], [0], [1], [0, 0, 1, 1], [], []>} : vector<1x32xf32>, vector<32x128xf32>, vector<1x128xf32> -> vector<1x128xf32>
    %1028 = arith.addf %1026, %1027 : vector<1x128xf32>
    %1029 = vector.extract_strided_slice %1028 {offsets = [0, 0], sizes = [1, 96], strides = [1, 1]} : vector<1x128xf32> to vector<1x96xf32>
    %1030 = arith.negf %1029 : vector<1x96xf32>
    %1031 = math.exp %1030 : vector<1x96xf32>
    %cst_323 = arith.constant 1.000000e+00 : f32
    %1032 = vector.broadcast %cst_323 : f32 to vector<1x96xf32>
    %1033 = arith.addf %1032, %1031 : vector<1x96xf32>
    %1034 = arith.divf %1032, %1033 : vector<1x96xf32>
    %1035 = vector.extract_strided_slice %1028 {offsets = [0, 96], sizes = [1, 32], strides = [1, 1]} : vector<1x128xf32> to vector<1x32xf32>
    %1036 = math.tanh %1035 : vector<1x32xf32>
    %1037 = vector.extract_strided_slice %1034 {offsets = [0, 0], sizes = [1, 32], strides = [1, 1]} : vector<1x96xf32> to vector<1x32xf32>
    %1038 = vector.extract_strided_slice %1034 {offsets = [0, 32], sizes = [1, 32], strides = [1, 1]} : vector<1x96xf32> to vector<1x32xf32>
    %1039 = vector.extract_strided_slice %1034 {offsets = [0, 64], sizes = [1, 32], strides = [1, 1]} : vector<1x96xf32> to vector<1x32xf32>
    %1040 = arith.mulf %1038, %1023 : vector<1x32xf32>
    %1041 = arith.mulf %1037, %1036 : vector<1x32xf32>
    %1042 = arith.addf %1040, %1041 : vector<1x32xf32>
    %1043 = math.tanh %1042 : vector<1x32xf32>
    %1044 = arith.mulf %1039, %1043 : vector<1x32xf32>
    %1045 = vector.extract_strided_slice %966 {offsets = [4, 0], sizes = [1, 128], strides = [1, 1]} : vector<16x128xf32> to vector<1x128xf32>
    %cst_324 = arith.constant dense<0.000000e+00> : vector<1x128xf32>
    %1046 = tpu.matmul %1044, %4, %cst_324 {dimension_numbers = #tpu.dot_dimension_numbers<[1], [0], [0], [1], [0, 0, 1, 1], [], []>} : vector<1x32xf32>, vector<32x128xf32>, vector<1x128xf32> -> vector<1x128xf32>
    %1047 = arith.addf %1045, %1046 : vector<1x128xf32>
    %1048 = vector.extract_strided_slice %1047 {offsets = [0, 0], sizes = [1, 96], strides = [1, 1]} : vector<1x128xf32> to vector<1x96xf32>
    %1049 = arith.negf %1048 : vector<1x96xf32>
    %1050 = math.exp %1049 : vector<1x96xf32>
    %cst_325 = arith.constant 1.000000e+00 : f32
    %1051 = vector.broadcast %cst_325 : f32 to vector<1x96xf32>
    %1052 = arith.addf %1051, %1050 : vector<1x96xf32>
    %1053 = arith.divf %1051, %1052 : vector<1x96xf32>
    %1054 = vector.extract_strided_slice %1047 {offsets = [0, 96], sizes = [1, 32], strides = [1, 1]} : vector<1x128xf32> to vector<1x32xf32>
    %1055 = math.tanh %1054 : vector<1x32xf32>
    %1056 = vector.extract_strided_slice %1053 {offsets = [0, 0], sizes = [1, 32], strides = [1, 1]} : vector<1x96xf32> to vector<1x32xf32>
    %1057 = vector.extract_strided_slice %1053 {offsets = [0, 32], sizes = [1, 32], strides = [1, 1]} : vector<1x96xf32> to vector<1x32xf32>
    %1058 = vector.extract_strided_slice %1053 {offsets = [0, 64], sizes = [1, 32], strides = [1, 1]} : vector<1x96xf32> to vector<1x32xf32>
    %1059 = arith.mulf %1057, %1042 : vector<1x32xf32>
    %1060 = arith.mulf %1056, %1055 : vector<1x32xf32>
    %1061 = arith.addf %1059, %1060 : vector<1x32xf32>
    %1062 = math.tanh %1061 : vector<1x32xf32>
    %1063 = arith.mulf %1058, %1062 : vector<1x32xf32>
    %1064 = vector.extract_strided_slice %966 {offsets = [5, 0], sizes = [1, 128], strides = [1, 1]} : vector<16x128xf32> to vector<1x128xf32>
    %cst_326 = arith.constant dense<0.000000e+00> : vector<1x128xf32>
    %1065 = tpu.matmul %1063, %4, %cst_326 {dimension_numbers = #tpu.dot_dimension_numbers<[1], [0], [0], [1], [0, 0, 1, 1], [], []>} : vector<1x32xf32>, vector<32x128xf32>, vector<1x128xf32> -> vector<1x128xf32>
    %1066 = arith.addf %1064, %1065 : vector<1x128xf32>
    %1067 = vector.extract_strided_slice %1066 {offsets = [0, 0], sizes = [1, 96], strides = [1, 1]} : vector<1x128xf32> to vector<1x96xf32>
    %1068 = arith.negf %1067 : vector<1x96xf32>
    %1069 = math.exp %1068 : vector<1x96xf32>
    %cst_327 = arith.constant 1.000000e+00 : f32
    %1070 = vector.broadcast %cst_327 : f32 to vector<1x96xf32>
    %1071 = arith.addf %1070, %1069 : vector<1x96xf32>
    %1072 = arith.divf %1070, %1071 : vector<1x96xf32>
    %1073 = vector.extract_strided_slice %1066 {offsets = [0, 96], sizes = [1, 32], strides = [1, 1]} : vector<1x128xf32> to vector<1x32xf32>
    %1074 = math.tanh %1073 : vector<1x32xf32>
    %1075 = vector.extract_strided_slice %1072 {offsets = [0, 0], sizes = [1, 32], strides = [1, 1]} : vector<1x96xf32> to vector<1x32xf32>
    %1076 = vector.extract_strided_slice %1072 {offsets = [0, 32], sizes = [1, 32], strides = [1, 1]} : vector<1x96xf32> to vector<1x32xf32>
    %1077 = vector.extract_strided_slice %1072 {offsets = [0, 64], sizes = [1, 32], strides = [1, 1]} : vector<1x96xf32> to vector<1x32xf32>
    %1078 = arith.mulf %1076, %1061 : vector<1x32xf32>
    %1079 = arith.mulf %1075, %1074 : vector<1x32xf32>
    %1080 = arith.addf %1078, %1079 : vector<1x32xf32>
    %1081 = math.tanh %1080 : vector<1x32xf32>
    %1082 = arith.mulf %1077, %1081 : vector<1x32xf32>
    %1083 = vector.extract_strided_slice %966 {offsets = [6, 0], sizes = [1, 128], strides = [1, 1]} : vector<16x128xf32> to vector<1x128xf32>
    %cst_328 = arith.constant dense<0.000000e+00> : vector<1x128xf32>
    %1084 = tpu.matmul %1082, %4, %cst_328 {dimension_numbers = #tpu.dot_dimension_numbers<[1], [0], [0], [1], [0, 0, 1, 1], [], []>} : vector<1x32xf32>, vector<32x128xf32>, vector<1x128xf32> -> vector<1x128xf32>
    %1085 = arith.addf %1083, %1084 : vector<1x128xf32>
    %1086 = vector.extract_strided_slice %1085 {offsets = [0, 0], sizes = [1, 96], strides = [1, 1]} : vector<1x128xf32> to vector<1x96xf32>
    %1087 = arith.negf %1086 : vector<1x96xf32>
    %1088 = math.exp %1087 : vector<1x96xf32>
    %cst_329 = arith.constant 1.000000e+00 : f32
    %1089 = vector.broadcast %cst_329 : f32 to vector<1x96xf32>
    %1090 = arith.addf %1089, %1088 : vector<1x96xf32>
    %1091 = arith.divf %1089, %1090 : vector<1x96xf32>
    %1092 = vector.extract_strided_slice %1085 {offsets = [0, 96], sizes = [1, 32], strides = [1, 1]} : vector<1x128xf32> to vector<1x32xf32>
    %1093 = math.tanh %1092 : vector<1x32xf32>
    %1094 = vector.extract_strided_slice %1091 {offsets = [0, 0], sizes = [1, 32], strides = [1, 1]} : vector<1x96xf32> to vector<1x32xf32>
    %1095 = vector.extract_strided_slice %1091 {offsets = [0, 32], sizes = [1, 32], strides = [1, 1]} : vector<1x96xf32> to vector<1x32xf32>
    %1096 = vector.extract_strided_slice %1091 {offsets = [0, 64], sizes = [1, 32], strides = [1, 1]} : vector<1x96xf32> to vector<1x32xf32>
    %1097 = arith.mulf %1095, %1080 : vector<1x32xf32>
    %1098 = arith.mulf %1094, %1093 : vector<1x32xf32>
    %1099 = arith.addf %1097, %1098 : vector<1x32xf32>
    %1100 = math.tanh %1099 : vector<1x32xf32>
    %1101 = arith.mulf %1096, %1100 : vector<1x32xf32>
    %1102 = vector.extract_strided_slice %966 {offsets = [7, 0], sizes = [1, 128], strides = [1, 1]} : vector<16x128xf32> to vector<1x128xf32>
    %cst_330 = arith.constant dense<0.000000e+00> : vector<1x128xf32>
    %1103 = tpu.matmul %1101, %4, %cst_330 {dimension_numbers = #tpu.dot_dimension_numbers<[1], [0], [0], [1], [0, 0, 1, 1], [], []>} : vector<1x32xf32>, vector<32x128xf32>, vector<1x128xf32> -> vector<1x128xf32>
    %1104 = arith.addf %1102, %1103 : vector<1x128xf32>
    %1105 = vector.extract_strided_slice %1104 {offsets = [0, 0], sizes = [1, 96], strides = [1, 1]} : vector<1x128xf32> to vector<1x96xf32>
    %1106 = arith.negf %1105 : vector<1x96xf32>
    %1107 = math.exp %1106 : vector<1x96xf32>
    %cst_331 = arith.constant 1.000000e+00 : f32
    %1108 = vector.broadcast %cst_331 : f32 to vector<1x96xf32>
    %1109 = arith.addf %1108, %1107 : vector<1x96xf32>
    %1110 = arith.divf %1108, %1109 : vector<1x96xf32>
    %1111 = vector.extract_strided_slice %1104 {offsets = [0, 96], sizes = [1, 32], strides = [1, 1]} : vector<1x128xf32> to vector<1x32xf32>
    %1112 = math.tanh %1111 : vector<1x32xf32>
    %1113 = vector.extract_strided_slice %1110 {offsets = [0, 0], sizes = [1, 32], strides = [1, 1]} : vector<1x96xf32> to vector<1x32xf32>
    %1114 = vector.extract_strided_slice %1110 {offsets = [0, 32], sizes = [1, 32], strides = [1, 1]} : vector<1x96xf32> to vector<1x32xf32>
    %1115 = vector.extract_strided_slice %1110 {offsets = [0, 64], sizes = [1, 32], strides = [1, 1]} : vector<1x96xf32> to vector<1x32xf32>
    %1116 = arith.mulf %1114, %1099 : vector<1x32xf32>
    %1117 = arith.mulf %1113, %1112 : vector<1x32xf32>
    %1118 = arith.addf %1116, %1117 : vector<1x32xf32>
    %1119 = math.tanh %1118 : vector<1x32xf32>
    %1120 = arith.mulf %1115, %1119 : vector<1x32xf32>
    %1121 = vector.extract_strided_slice %966 {offsets = [8, 0], sizes = [1, 128], strides = [1, 1]} : vector<16x128xf32> to vector<1x128xf32>
    %cst_332 = arith.constant dense<0.000000e+00> : vector<1x128xf32>
    %1122 = tpu.matmul %1120, %4, %cst_332 {dimension_numbers = #tpu.dot_dimension_numbers<[1], [0], [0], [1], [0, 0, 1, 1], [], []>} : vector<1x32xf32>, vector<32x128xf32>, vector<1x128xf32> -> vector<1x128xf32>
    %1123 = arith.addf %1121, %1122 : vector<1x128xf32>
    %1124 = vector.extract_strided_slice %1123 {offsets = [0, 0], sizes = [1, 96], strides = [1, 1]} : vector<1x128xf32> to vector<1x96xf32>
    %1125 = arith.negf %1124 : vector<1x96xf32>
    %1126 = math.exp %1125 : vector<1x96xf32>
    %cst_333 = arith.constant 1.000000e+00 : f32
    %1127 = vector.broadcast %cst_333 : f32 to vector<1x96xf32>
    %1128 = arith.addf %1127, %1126 : vector<1x96xf32>
    %1129 = arith.divf %1127, %1128 : vector<1x96xf32>
    %1130 = vector.extract_strided_slice %1123 {offsets = [0, 96], sizes = [1, 32], strides = [1, 1]} : vector<1x128xf32> to vector<1x32xf32>
    %1131 = math.tanh %1130 : vector<1x32xf32>
    %1132 = vector.extract_strided_slice %1129 {offsets = [0, 0], sizes = [1, 32], strides = [1, 1]} : vector<1x96xf32> to vector<1x32xf32>
    %1133 = vector.extract_strided_slice %1129 {offsets = [0, 32], sizes = [1, 32], strides = [1, 1]} : vector<1x96xf32> to vector<1x32xf32>
    %1134 = vector.extract_strided_slice %1129 {offsets = [0, 64], sizes = [1, 32], strides = [1, 1]} : vector<1x96xf32> to vector<1x32xf32>
    %1135 = arith.mulf %1133, %1118 : vector<1x32xf32>
    %1136 = arith.mulf %1132, %1131 : vector<1x32xf32>
    %1137 = arith.addf %1135, %1136 : vector<1x32xf32>
    %1138 = math.tanh %1137 : vector<1x32xf32>
    %1139 = arith.mulf %1134, %1138 : vector<1x32xf32>
    %1140 = vector.extract_strided_slice %966 {offsets = [9, 0], sizes = [1, 128], strides = [1, 1]} : vector<16x128xf32> to vector<1x128xf32>
    %cst_334 = arith.constant dense<0.000000e+00> : vector<1x128xf32>
    %1141 = tpu.matmul %1139, %4, %cst_334 {dimension_numbers = #tpu.dot_dimension_numbers<[1], [0], [0], [1], [0, 0, 1, 1], [], []>} : vector<1x32xf32>, vector<32x128xf32>, vector<1x128xf32> -> vector<1x128xf32>
    %1142 = arith.addf %1140, %1141 : vector<1x128xf32>
    %1143 = vector.extract_strided_slice %1142 {offsets = [0, 0], sizes = [1, 96], strides = [1, 1]} : vector<1x128xf32> to vector<1x96xf32>
    %1144 = arith.negf %1143 : vector<1x96xf32>
    %1145 = math.exp %1144 : vector<1x96xf32>
    %cst_335 = arith.constant 1.000000e+00 : f32
    %1146 = vector.broadcast %cst_335 : f32 to vector<1x96xf32>
    %1147 = arith.addf %1146, %1145 : vector<1x96xf32>
    %1148 = arith.divf %1146, %1147 : vector<1x96xf32>
    %1149 = vector.extract_strided_slice %1142 {offsets = [0, 96], sizes = [1, 32], strides = [1, 1]} : vector<1x128xf32> to vector<1x32xf32>
    %1150 = math.tanh %1149 : vector<1x32xf32>
    %1151 = vector.extract_strided_slice %1148 {offsets = [0, 0], sizes = [1, 32], strides = [1, 1]} : vector<1x96xf32> to vector<1x32xf32>
    %1152 = vector.extract_strided_slice %1148 {offsets = [0, 32], sizes = [1, 32], strides = [1, 1]} : vector<1x96xf32> to vector<1x32xf32>
    %1153 = vector.extract_strided_slice %1148 {offsets = [0, 64], sizes = [1, 32], strides = [1, 1]} : vector<1x96xf32> to vector<1x32xf32>
    %1154 = arith.mulf %1152, %1137 : vector<1x32xf32>
    %1155 = arith.mulf %1151, %1150 : vector<1x32xf32>
    %1156 = arith.addf %1154, %1155 : vector<1x32xf32>
    %1157 = math.tanh %1156 : vector<1x32xf32>
    %1158 = arith.mulf %1153, %1157 : vector<1x32xf32>
    %1159 = vector.extract_strided_slice %966 {offsets = [10, 0], sizes = [1, 128], strides = [1, 1]} : vector<16x128xf32> to vector<1x128xf32>
    %cst_336 = arith.constant dense<0.000000e+00> : vector<1x128xf32>
    %1160 = tpu.matmul %1158, %4, %cst_336 {dimension_numbers = #tpu.dot_dimension_numbers<[1], [0], [0], [1], [0, 0, 1, 1], [], []>} : vector<1x32xf32>, vector<32x128xf32>, vector<1x128xf32> -> vector<1x128xf32>
    %1161 = arith.addf %1159, %1160 : vector<1x128xf32>
    %1162 = vector.extract_strided_slice %1161 {offsets = [0, 0], sizes = [1, 96], strides = [1, 1]} : vector<1x128xf32> to vector<1x96xf32>
    %1163 = arith.negf %1162 : vector<1x96xf32>
    %1164 = math.exp %1163 : vector<1x96xf32>
    %cst_337 = arith.constant 1.000000e+00 : f32
    %1165 = vector.broadcast %cst_337 : f32 to vector<1x96xf32>
    %1166 = arith.addf %1165, %1164 : vector<1x96xf32>
    %1167 = arith.divf %1165, %1166 : vector<1x96xf32>
    %1168 = vector.extract_strided_slice %1161 {offsets = [0, 96], sizes = [1, 32], strides = [1, 1]} : vector<1x128xf32> to vector<1x32xf32>
    %1169 = math.tanh %1168 : vector<1x32xf32>
    %1170 = vector.extract_strided_slice %1167 {offsets = [0, 0], sizes = [1, 32], strides = [1, 1]} : vector<1x96xf32> to vector<1x32xf32>
    %1171 = vector.extract_strided_slice %1167 {offsets = [0, 32], sizes = [1, 32], strides = [1, 1]} : vector<1x96xf32> to vector<1x32xf32>
    %1172 = vector.extract_strided_slice %1167 {offsets = [0, 64], sizes = [1, 32], strides = [1, 1]} : vector<1x96xf32> to vector<1x32xf32>
    %1173 = arith.mulf %1171, %1156 : vector<1x32xf32>
    %1174 = arith.mulf %1170, %1169 : vector<1x32xf32>
    %1175 = arith.addf %1173, %1174 : vector<1x32xf32>
    %1176 = math.tanh %1175 : vector<1x32xf32>
    %1177 = arith.mulf %1172, %1176 : vector<1x32xf32>
    %1178 = vector.extract_strided_slice %966 {offsets = [11, 0], sizes = [1, 128], strides = [1, 1]} : vector<16x128xf32> to vector<1x128xf32>
    %cst_338 = arith.constant dense<0.000000e+00> : vector<1x128xf32>
    %1179 = tpu.matmul %1177, %4, %cst_338 {dimension_numbers = #tpu.dot_dimension_numbers<[1], [0], [0], [1], [0, 0, 1, 1], [], []>} : vector<1x32xf32>, vector<32x128xf32>, vector<1x128xf32> -> vector<1x128xf32>
    %1180 = arith.addf %1178, %1179 : vector<1x128xf32>
    %1181 = vector.extract_strided_slice %1180 {offsets = [0, 0], sizes = [1, 96], strides = [1, 1]} : vector<1x128xf32> to vector<1x96xf32>
    %1182 = arith.negf %1181 : vector<1x96xf32>
    %1183 = math.exp %1182 : vector<1x96xf32>
    %cst_339 = arith.constant 1.000000e+00 : f32
    %1184 = vector.broadcast %cst_339 : f32 to vector<1x96xf32>
    %1185 = arith.addf %1184, %1183 : vector<1x96xf32>
    %1186 = arith.divf %1184, %1185 : vector<1x96xf32>
    %1187 = vector.extract_strided_slice %1180 {offsets = [0, 96], sizes = [1, 32], strides = [1, 1]} : vector<1x128xf32> to vector<1x32xf32>
    %1188 = math.tanh %1187 : vector<1x32xf32>
    %1189 = vector.extract_strided_slice %1186 {offsets = [0, 0], sizes = [1, 32], strides = [1, 1]} : vector<1x96xf32> to vector<1x32xf32>
    %1190 = vector.extract_strided_slice %1186 {offsets = [0, 32], sizes = [1, 32], strides = [1, 1]} : vector<1x96xf32> to vector<1x32xf32>
    %1191 = vector.extract_strided_slice %1186 {offsets = [0, 64], sizes = [1, 32], strides = [1, 1]} : vector<1x96xf32> to vector<1x32xf32>
    %1192 = arith.mulf %1190, %1175 : vector<1x32xf32>
    %1193 = arith.mulf %1189, %1188 : vector<1x32xf32>
    %1194 = arith.addf %1192, %1193 : vector<1x32xf32>
    %1195 = math.tanh %1194 : vector<1x32xf32>
    %1196 = arith.mulf %1191, %1195 : vector<1x32xf32>
    %1197 = vector.extract_strided_slice %966 {offsets = [12, 0], sizes = [1, 128], strides = [1, 1]} : vector<16x128xf32> to vector<1x128xf32>
    %cst_340 = arith.constant dense<0.000000e+00> : vector<1x128xf32>
    %1198 = tpu.matmul %1196, %4, %cst_340 {dimension_numbers = #tpu.dot_dimension_numbers<[1], [0], [0], [1], [0, 0, 1, 1], [], []>} : vector<1x32xf32>, vector<32x128xf32>, vector<1x128xf32> -> vector<1x128xf32>
    %1199 = arith.addf %1197, %1198 : vector<1x128xf32>
    %1200 = vector.extract_strided_slice %1199 {offsets = [0, 0], sizes = [1, 96], strides = [1, 1]} : vector<1x128xf32> to vector<1x96xf32>
    %1201 = arith.negf %1200 : vector<1x96xf32>
    %1202 = math.exp %1201 : vector<1x96xf32>
    %cst_341 = arith.constant 1.000000e+00 : f32
    %1203 = vector.broadcast %cst_341 : f32 to vector<1x96xf32>
    %1204 = arith.addf %1203, %1202 : vector<1x96xf32>
    %1205 = arith.divf %1203, %1204 : vector<1x96xf32>
    %1206 = vector.extract_strided_slice %1199 {offsets = [0, 96], sizes = [1, 32], strides = [1, 1]} : vector<1x128xf32> to vector<1x32xf32>
    %1207 = math.tanh %1206 : vector<1x32xf32>
    %1208 = vector.extract_strided_slice %1205 {offsets = [0, 0], sizes = [1, 32], strides = [1, 1]} : vector<1x96xf32> to vector<1x32xf32>
    %1209 = vector.extract_strided_slice %1205 {offsets = [0, 32], sizes = [1, 32], strides = [1, 1]} : vector<1x96xf32> to vector<1x32xf32>
    %1210 = vector.extract_strided_slice %1205 {offsets = [0, 64], sizes = [1, 32], strides = [1, 1]} : vector<1x96xf32> to vector<1x32xf32>
    %1211 = arith.mulf %1209, %1194 : vector<1x32xf32>
    %1212 = arith.mulf %1208, %1207 : vector<1x32xf32>
    %1213 = arith.addf %1211, %1212 : vector<1x32xf32>
    %1214 = math.tanh %1213 : vector<1x32xf32>
    %1215 = arith.mulf %1210, %1214 : vector<1x32xf32>
    %1216 = vector.extract_strided_slice %966 {offsets = [13, 0], sizes = [1, 128], strides = [1, 1]} : vector<16x128xf32> to vector<1x128xf32>
    %cst_342 = arith.constant dense<0.000000e+00> : vector<1x128xf32>
    %1217 = tpu.matmul %1215, %4, %cst_342 {dimension_numbers = #tpu.dot_dimension_numbers<[1], [0], [0], [1], [0, 0, 1, 1], [], []>} : vector<1x32xf32>, vector<32x128xf32>, vector<1x128xf32> -> vector<1x128xf32>
    %1218 = arith.addf %1216, %1217 : vector<1x128xf32>
    %1219 = vector.extract_strided_slice %1218 {offsets = [0, 0], sizes = [1, 96], strides = [1, 1]} : vector<1x128xf32> to vector<1x96xf32>
    %1220 = arith.negf %1219 : vector<1x96xf32>
    %1221 = math.exp %1220 : vector<1x96xf32>
    %cst_343 = arith.constant 1.000000e+00 : f32
    %1222 = vector.broadcast %cst_343 : f32 to vector<1x96xf32>
    %1223 = arith.addf %1222, %1221 : vector<1x96xf32>
    %1224 = arith.divf %1222, %1223 : vector<1x96xf32>
    %1225 = vector.extract_strided_slice %1218 {offsets = [0, 96], sizes = [1, 32], strides = [1, 1]} : vector<1x128xf32> to vector<1x32xf32>
    %1226 = math.tanh %1225 : vector<1x32xf32>
    %1227 = vector.extract_strided_slice %1224 {offsets = [0, 0], sizes = [1, 32], strides = [1, 1]} : vector<1x96xf32> to vector<1x32xf32>
    %1228 = vector.extract_strided_slice %1224 {offsets = [0, 32], sizes = [1, 32], strides = [1, 1]} : vector<1x96xf32> to vector<1x32xf32>
    %1229 = vector.extract_strided_slice %1224 {offsets = [0, 64], sizes = [1, 32], strides = [1, 1]} : vector<1x96xf32> to vector<1x32xf32>
    %1230 = arith.mulf %1228, %1213 : vector<1x32xf32>
    %1231 = arith.mulf %1227, %1226 : vector<1x32xf32>
    %1232 = arith.addf %1230, %1231 : vector<1x32xf32>
    %1233 = math.tanh %1232 : vector<1x32xf32>
    %1234 = arith.mulf %1229, %1233 : vector<1x32xf32>
    %1235 = vector.extract_strided_slice %966 {offsets = [14, 0], sizes = [1, 128], strides = [1, 1]} : vector<16x128xf32> to vector<1x128xf32>
    %cst_344 = arith.constant dense<0.000000e+00> : vector<1x128xf32>
    %1236 = tpu.matmul %1234, %4, %cst_344 {dimension_numbers = #tpu.dot_dimension_numbers<[1], [0], [0], [1], [0, 0, 1, 1], [], []>} : vector<1x32xf32>, vector<32x128xf32>, vector<1x128xf32> -> vector<1x128xf32>
    %1237 = arith.addf %1235, %1236 : vector<1x128xf32>
    %1238 = vector.extract_strided_slice %1237 {offsets = [0, 0], sizes = [1, 96], strides = [1, 1]} : vector<1x128xf32> to vector<1x96xf32>
    %1239 = arith.negf %1238 : vector<1x96xf32>
    %1240 = math.exp %1239 : vector<1x96xf32>
    %cst_345 = arith.constant 1.000000e+00 : f32
    %1241 = vector.broadcast %cst_345 : f32 to vector<1x96xf32>
    %1242 = arith.addf %1241, %1240 : vector<1x96xf32>
    %1243 = arith.divf %1241, %1242 : vector<1x96xf32>
    %1244 = vector.extract_strided_slice %1237 {offsets = [0, 96], sizes = [1, 32], strides = [1, 1]} : vector<1x128xf32> to vector<1x32xf32>
    %1245 = math.tanh %1244 : vector<1x32xf32>
    %1246 = vector.extract_strided_slice %1243 {offsets = [0, 0], sizes = [1, 32], strides = [1, 1]} : vector<1x96xf32> to vector<1x32xf32>
    %1247 = vector.extract_strided_slice %1243 {offsets = [0, 32], sizes = [1, 32], strides = [1, 1]} : vector<1x96xf32> to vector<1x32xf32>
    %1248 = vector.extract_strided_slice %1243 {offsets = [0, 64], sizes = [1, 32], strides = [1, 1]} : vector<1x96xf32> to vector<1x32xf32>
    %1249 = arith.mulf %1247, %1232 : vector<1x32xf32>
    %1250 = arith.mulf %1246, %1245 : vector<1x32xf32>
    %1251 = arith.addf %1249, %1250 : vector<1x32xf32>
    %1252 = math.tanh %1251 : vector<1x32xf32>
    %1253 = arith.mulf %1248, %1252 : vector<1x32xf32>
    %1254 = vector.extract_strided_slice %966 {offsets = [15, 0], sizes = [1, 128], strides = [1, 1]} : vector<16x128xf32> to vector<1x128xf32>
    %cst_346 = arith.constant dense<0.000000e+00> : vector<1x128xf32>
    %1255 = tpu.matmul %1253, %4, %cst_346 {dimension_numbers = #tpu.dot_dimension_numbers<[1], [0], [0], [1], [0, 0, 1, 1], [], []>} : vector<1x32xf32>, vector<32x128xf32>, vector<1x128xf32> -> vector<1x128xf32>
    %1256 = arith.addf %1254, %1255 : vector<1x128xf32>
    %1257 = vector.extract_strided_slice %1256 {offsets = [0, 0], sizes = [1, 96], strides = [1, 1]} : vector<1x128xf32> to vector<1x96xf32>
    %1258 = arith.negf %1257 : vector<1x96xf32>
    %1259 = math.exp %1258 : vector<1x96xf32>
    %cst_347 = arith.constant 1.000000e+00 : f32
    %1260 = vector.broadcast %cst_347 : f32 to vector<1x96xf32>
    %1261 = arith.addf %1260, %1259 : vector<1x96xf32>
    %1262 = arith.divf %1260, %1261 : vector<1x96xf32>
    %1263 = vector.extract_strided_slice %1256 {offsets = [0, 96], sizes = [1, 32], strides = [1, 1]} : vector<1x128xf32> to vector<1x32xf32>
    %1264 = math.tanh %1263 : vector<1x32xf32>
    %1265 = vector.extract_strided_slice %1262 {offsets = [0, 0], sizes = [1, 32], strides = [1, 1]} : vector<1x96xf32> to vector<1x32xf32>
    %1266 = vector.extract_strided_slice %1262 {offsets = [0, 32], sizes = [1, 32], strides = [1, 1]} : vector<1x96xf32> to vector<1x32xf32>
    %1267 = vector.extract_strided_slice %1262 {offsets = [0, 64], sizes = [1, 32], strides = [1, 1]} : vector<1x96xf32> to vector<1x32xf32>
    %1268 = arith.mulf %1266, %1251 : vector<1x32xf32>
    %1269 = arith.mulf %1265, %1264 : vector<1x32xf32>
    %1270 = arith.addf %1268, %1269 : vector<1x32xf32>
    %1271 = math.tanh %1270 : vector<1x32xf32>
    %1272 = arith.mulf %1267, %1271 : vector<1x32xf32>
    %cst_348 = arith.constant dense<0.000000e+00> : vector<12xf32>
    %1273 = vector.multi_reduction <add>, %937, %cst_348 [1] : vector<12x32xf32> to vector<12xf32>
    %1274 = vector.shape_cast %1273 : vector<12xf32> to vector<12x1xf32>
    %cst_349 = arith.constant 0.000000e+00 : f32
    %1275 = vector.broadcast %cst_349 : f32 to vector<12x1xf32>
    %1276 = arith.cmpf oeq, %1274, %1275 : vector<12x1xf32>
    %cst_350 = arith.constant 1.000000e+00 : f32
    %1277 = vector.broadcast %cst_350 : f32 to vector<12x1xf32>
    %1278 = arith.select %1276, %1277, %1274 : vector<12x1xi1>, vector<12x1xf32>
    %1279 = vector.broadcast %1272 : vector<1x32xf32> to vector<12x32xf32>
    %1280 = arith.mulf %937, %1279 : vector<12x32xf32>
    %cst_351 = arith.constant dense<0.000000e+00> : vector<12xf32>
    %1281 = vector.multi_reduction <add>, %1280, %cst_351 [1] : vector<12x32xf32> to vector<12xf32>
    %1282 = vector.shape_cast %1281 : vector<12xf32> to vector<12x1xf32>
    %1283 = arith.divf %1282, %1278 : vector<12x1xf32>
    %cst_352 = arith.constant dense<0.000000e+00> : vector<12x8xf32>
    %1284 = tpu.matmul %959, %5, %cst_352 {dimension_numbers = #tpu.dot_dimension_numbers<[1], [0], [0], [1], [0, 0, 1, 1], [], []>} : vector<12x16xf32>, vector<16x8xf32>, vector<12x8xf32> -> vector<12x8xf32>
    %1285 = vector.broadcast %1283 : vector<12x1xf32> to vector<12x8xf32>
    %1286 = vector.broadcast %8 : vector<1x8xf32> to vector<12x8xf32>
    %1287 = arith.mulf %1285, %1286 : vector<12x8xf32>
    %1288 = arith.addf %1284, %1287 : vector<12x8xf32>
    %1289 = vector.broadcast %9 : vector<1x8xf32> to vector<12x8xf32>
    %1290 = arith.mulf %1288, %1289 : vector<12x8xf32>
    %cst_353 = arith.constant dense<0.000000e+00> : vector<12xf32>
    %1291 = vector.multi_reduction <add>, %1290, %cst_353 [1] : vector<12x8xf32> to vector<12xf32>
    %1292 = vector.broadcast %10 : vector<1x8xf32> to vector<12x8xf32>
    %1293 = arith.mulf %1288, %1292 : vector<12x8xf32>
    %cst_354 = arith.constant dense<0.000000e+00> : vector<12xf32>
    %1294 = vector.multi_reduction <add>, %1293, %cst_354 [1] : vector<12x8xf32> to vector<12xf32>
    %1295 = vector.shape_cast %1294 : vector<12xf32> to vector<12x1xf32>
    %1296 = vector.shape_cast %1291 : vector<12xf32> to vector<1x12xf32>
    %1297 = vector.broadcast %1295 : vector<12x1xf32> to vector<12x12xf32>
    %1298 = vector.broadcast %1296 : vector<1x12xf32> to vector<12x12xf32>
    %1299 = arith.addf %1297, %1298 : vector<12x12xf32>
    %cst_355 = arith.constant 0.000000e+00 : f32
    %1300 = vector.broadcast %cst_355 : f32 to vector<12x12xf32>
    %1301 = arith.cmpf oge, %1299, %1300 : vector<12x12xf32>
    %cst_356 = arith.constant 2.000000e-01 : f32
    %1302 = vector.broadcast %cst_356 : f32 to vector<12x12xf32>
    %1303 = arith.mulf %1302, %1299 : vector<12x12xf32>
    %1304 = arith.select %1301, %1299, %1303 : vector<12x12xi1>, vector<12x12xf32>
    %1305 = arith.cmpi eq, %14, %15 : vector<12x12xi32>
    %cst_357 = arith.constant 1.000000e+00 : f32
    %cst_358 = arith.constant 0.000000e+00 : f32
    %1306 = vector.broadcast %cst_357 : f32 to vector<12x12xf32>
    %1307 = vector.broadcast %cst_358 : f32 to vector<12x12xf32>
    %1308 = arith.select %1305, %1306, %1307 : vector<12x12xi1>, vector<12x12xf32>
    %1309 = arith.addf %897, %1308 : vector<12x12xf32>
    %cst_359 = arith.constant 0.000000e+00 : f32
    %1310 = vector.broadcast %cst_359 : f32 to vector<12x12xf32>
    %1311 = arith.cmpf ogt, %1309, %1310 : vector<12x12xf32>
    %cst_360 = arith.constant -1.000000e+30 : f32
    %1312 = vector.broadcast %cst_360 : f32 to vector<12x12xf32>
    %1313 = arith.select %1311, %1304, %1312 : vector<12x12xi1>, vector<12x12xf32>
    %cst_361 = arith.constant dense<0xFF800000> : vector<12xf32>
    %1314 = vector.multi_reduction <maximumf>, %1313, %cst_361 [1] : vector<12x12xf32> to vector<12xf32>
    %1315 = vector.shape_cast %1314 : vector<12xf32> to vector<12x1xf32>
    %1316 = vector.broadcast %1315 : vector<12x1xf32> to vector<12x12xf32>
    %1317 = arith.subf %1313, %1316 : vector<12x12xf32>
    %1318 = math.exp %1317 : vector<12x12xf32>
    %1319 = arith.mulf %1309, %1318 : vector<12x12xf32>
    %cst_362 = arith.constant dense<0.000000e+00> : vector<12xf32>
    %1320 = vector.multi_reduction <add>, %1319, %cst_362 [1] : vector<12x12xf32> to vector<12xf32>
    %1321 = vector.shape_cast %1320 : vector<12xf32> to vector<12x1xf32>
    %1322 = vector.broadcast %1321 : vector<12x1xf32> to vector<12x12xf32>
    %1323 = arith.divf %1319, %1322 : vector<12x12xf32>
    %cst_363 = arith.constant dense<0.000000e+00> : vector<12x8xf32>
    %1324 = tpu.matmul %1323, %1288, %cst_363 {dimension_numbers = #tpu.dot_dimension_numbers<[1], [0], [0], [1], [0, 0, 1, 1], [], []>} : vector<12x12xf32>, vector<12x8xf32>, vector<12x8xf32> -> vector<12x8xf32>
    %1325 = vector.broadcast %11 : vector<1x8xf32> to vector<12x8xf32>
    %1326 = arith.addf %1324, %1325 : vector<12x8xf32>
    %cst_364 = arith.constant 0.000000e+00 : f32
    %1327 = vector.broadcast %cst_364 : f32 to vector<12x8xf32>
    %1328 = arith.maximumf %1326, %1327 : vector<12x8xf32>
    %cst_365 = arith.constant dense<0.000000e+00> : vector<8xf32>
    %1329 = vector.multi_reduction <add>, %1328, %cst_365 [0] : vector<12x8xf32> to vector<8xf32>
    %1330 = vector.shape_cast %1329 : vector<8xf32> to vector<1x8xf32>
    %cst_366 = arith.constant 0.0833333358 : f32
    %1331 = vector.broadcast %cst_366 : f32 to vector<1x8xf32>
    %1332 = arith.mulf %1330, %1331 : vector<1x8xf32>
    %1333 = arith.mulf %1332, %12 : vector<1x8xf32>
    %cst_367 = arith.constant dense<0.000000e+00> : vector<1xf32>
    %1334 = vector.multi_reduction <add>, %1333, %cst_367 [1] : vector<1x8xf32> to vector<1xf32>
    %1335 = vector.shape_cast %1334 : vector<1xf32> to vector<1x1xf32>
    %1336 = arith.addf %1335, %13 : vector<1x1xf32>
    %c0_368 = arith.constant 0 : index
    %c0_369 = arith.constant 0 : index
    %1337 = vector.load %arg4[%c0_368, %c0_369] : memref<1x1xf32, #tpu.memory_space<vmem>>, vector<1x1xf32>
    tpu.vector_store %arg4[%c0_368, %c0_369], %1336 {strides = array<i32>} : memref<1x1xf32, #tpu.memory_space<vmem>>, vector<1x1xf32>,
    return
  }
}

</mosaic_0001>

<bundles_post_ra>
// kernel: sequential_lstm_gnn_forward.1
= control target key start
LH: loop header
LB: loop body
LE: loop exit
PB: predicated region body
PF: predicated region fallthrough
CT: control target
= control target key end

     0   :  { %9 = vsyncpa [#allocation5], 0  ;;  %s4732_s0 = inlined_call_operand.hbm [shape: s32[32], index: 0, kind: input, shape index: {}]   ;;  %s4733_s1 = inlined_call_operand.hbm [shape: f32[12,16], index: 1, kind: input, shape index: {}]   ;;  %s4734_s2 = inlined_call_operand.hbm [shape: f32[112,128], index: 2, kind: input, shape index: {}]   ;;  %s4735_s3 = inlined_call_operand.hbm [shape: f32[8,128], index: 3, kind: input, shape index: {}]   ;;  %s4736_s4 = inlined_call_operand.hbm [shape: f32[1,1], index: 4, kind: output, shape index: {}]  }
   0x1   :  { %10 = vsyncpa [#allocation3], 0 }
   0x2   :  { %11 = vsyncpa [#allocation8], 0 }
   0x3   :  { %12 = vsyncpa [#allocation4], 0  ;;  %s39_s17 = sshll.u32 %s4734_s2, 4  ;;  %s2891_s18 = smov [#allocation7]   ;;  %s40_s17 = int_to_ptr.hbm [resolvable:$true] %s39_s17 }
   0x4   :  { %s41_s19 = sshll.u32 %s2891_s18, 4  ;;  %s18_s22 = sshll.u32 %s4732_s0, 4  ;;  %s42_s19 = int_to_ptr.vmem [resolvable:$true] %s41_s19  ;;  %s19_s22 = int_to_ptr.hbm [resolvable:$true] %s18_s22 }
   0x5   :  { %s2892_s23 = smov 128   ;;  %s2893_s24 = smov 8  }
   0x6   :  { %47 = dma.hbm_to_vmem [thread:$0]  %s40_s17, 1792, %s42_s19, [#allocation8], %s2892_s23, %s2892_s23, %s2893_s24  }
   0x7   :  { %s2894_s25 = smov [#allocation2]   ;;  %s26_s28 = sshll.u32 %s4733_s1, 4  ;;  %s27_s28 = int_to_ptr.hbm [resolvable:$true] %s26_s28 }
   0x8   :  { %21 = dma.hbm_to_smem %s19_s22, 16, %s2894_s25, [#allocation5]  }
   0x9   :  { %s2895_s2 = smov [#allocation6]   ;;  %s53_s6 = sshll.u32 %s4735_s3, 4  ;;  %s54_s6 = int_to_ptr.hbm [resolvable:$true] %s53_s6 }
   0xa   :  { %s28_s29 = sshll.u32 %s2895_s2, 4  ;;  %s2896_s0 = smov [#allocation9]   ;;  %s29_s29 = int_to_ptr.vmem [resolvable:$true] %s28_s29 }
   0xb   :  { %34 = dma.hbm_to_vmem [thread:$0]  %s27_s28, 256, %s29_s29, [#allocation3], %s2892_s23, %s2892_s23, %s2893_s24  }
   0xc   :  { %s55_s7 = sshll.u32 %s2896_s0, 4  ;;  %s56_s7 = int_to_ptr.vmem [resolvable:$true] %s55_s7 }
   0xd   :  { %58 = dma.hbm_to_vmem [thread:$0]  %s54_s6, 128, %s56_s7, [#allocation8]  }
   0xe   :  { %2883 = dma.done.wait [#allocation5], 16  }
   0xf   :  { %2884 = vsyncadd [#allocation5], 4294967280 }
  0x10   :  { %2885 = dma.done.wait [#allocation3], 256  }
  0x11   :  { %2886 = vsyncadd [#allocation3], 4294967040 }
  0x12   :  { %2887 = dma.done.wait [#allocation8], 1920  }
  0x13   :  { %2888 = vsyncadd [#allocation8], 4294965376 }
  0x14   :  { %75 = sfence }
  0x15   :  { %v98_v0 = vlaneseq  ;;  %s103_s1 = sld [smem:[#allocation2]]  ;;  %v4790_v5 = vmov 0.0  }
  0x16   :  { %s2938_s8 = sld [smem:[#allocation2 + $0x10]] }
  0x17   :  { %v2941_v1 = vshrl.u32 %v98_v0, 7  ;;  %s2532_s3 = sld [smem:[#allocation2 + $0x1]]  ;;  %v3159_v54 = vand.u32 127, %v98_v0 }
  0x18   :  { %s2943_s9 = sld [smem:[#allocation2 + $0x11]] }
  0x19   :  { %4846 = vst [vmem:[#allocation15_spill] sm:$0xff] %v2941_v1  ;;  %v2946_v2 = vadd.s32 8, %v2941_v1  ;;  %s2948_s10 = sld [smem:[#allocation2 + $0x2]] }
  0x1a   :  { %s2950_s11 = sld [smem:[#allocation2 + $0x3]] }
  0x1b   :  { %v2952_v3 = vstv %s103_s1  ;;  %s2954_s12 = sld [smem:[#allocation2 + $0x12]] }
  0x1c   :  { %p106_p0 = scmp.ne.s32.totalorder %s103_s1, %s2938_s8  ;;  %vm4747_vm0 = vcmp.eq.s32.totalorder %v2946_v2, %v2952_v3  ;;  %s2959_s13 = sld [smem:[#allocation2 + $0x4]]  ;;  %vm4774_vm1 = vcmp.eq.s32.totalorder %v2941_v1, %v2952_v3  ;;  %v3133_v47 = vstv %s2938_s8 }
  0x1d   :  { %v2963_v4 = vstv %s2532_s3  ;;  %s2965_s14 = sld [smem:[#allocation2 + $0x5]]  ;;  %v125_v6 = vsel %vm4747_vm0, 1.0, %v4790_v5  ;;  %v124_v8 = vsel %vm4774_vm1, 1.0, %v4790_v5  ;;  %4847 = vst [vmem:[#allocation16_spill] sm:$0xff] %v3133_v47 }
  0x1e   :  { %s107_s15 = scalar_select %p106_p0, 1.0, 0.0  ;;  %vm4745_vm2 = vcmp.eq.s32.totalorder %v2946_v2, %v2963_v4  ;;  %vm4772_vm3 = vcmp.eq.s32.totalorder %v2941_v1, %v2963_v4 }
  0x1f   :  { %p158_p1 = scmp.ne.s32.totalorder %s2532_s3, %s2943_s9  ;;  %v2977_v7 = vstv %s2948_s10  ;;  %s2979_s16 = sld [smem:[#allocation2 + $0x13]]  ;;  %v175_v12 = vsel %vm4745_vm2, 1.0, %v4790_v5  ;;  %v174_v13 = vsel %vm4772_vm3, 1.0, %v4790_v5 }
  0x20   :  { %v2985_v9 = vstv %s107_s15  ;;  %v2988_v10 = vstv %s2950_s11  ;;  %vm4744_vm4 = vcmp.eq.s32.totalorder %v2946_v2, %v2977_v7  ;;  %s2992_s17 = sld [smem:[#allocation2 + $0x6]]  ;;  %vm4769_vm5 = vcmp.eq.s32.totalorder %v2941_v1, %v2977_v7 }
  0x21   :  { %v127_v11 = vmul.f32 %v125_v6, %v2985_v9  ;;  %s159_s18 = scalar_select %p158_p1, 1.0, 0.0  ;;  %vm4743_vm6 = vcmp.eq.s32.totalorder %v2946_v2, %v2988_v10  ;;  %v126_v15 = vmul.f32 %v124_v8, %v2985_v9  ;;  %vm4766_vm7 = vcmp.eq.s32.totalorder %v2941_v1, %v2988_v10 }
  0x22   :  { %p210_p2 = scmp.ne.s32.totalorder %s2948_s10, %s2954_s12  ;;  %v3008_v14 = vstv %s2959_s13  ;;  %s3010_s19 = sld [smem:[#allocation2 + $0x7]]  ;;  %v227_v17 = vsel %vm4744_vm4, 1.0, %v4790_v5  ;;  %v226_v21 = vsel %vm4769_vm5, 1.0, %v4790_v5  ;;  %v279_v22 = vsel %vm4743_vm6, 1.0, %v4790_v5 }
  0x23   :  { %v3017_v16 = vstv %s159_s18  ;;  %v3024_v18 = vstv %s2965_s14  ;;  %s3026_s20 = sld [smem:[#allocation2 + $0x14]]  ;;  %vm4741_vm8 = vcmp.eq.s32.totalorder %v2946_v2, %v3008_v14  ;;  %v278_v23 = vsel %vm4766_vm7, 1.0, %v4790_v5 }
  0x24   :  { %v177_v19 = vmul.f32 %v175_v12, %v3017_v16  ;;  %s211_s21 = scalar_select %p210_p2, 1.0, 0.0  ;;  %v176_v20 = vmul.f32 %v174_v13, %v3017_v16  ;;  %vm4739_vm9 = vcmp.eq.s32.totalorder %v2946_v2, %v3024_v18  ;;  %v331_v29 = vsel %vm4741_vm8, 1.0, %v4790_v5 }
  0x25   :  { %p262_p3 = scmp.ne.s32.totalorder %s2950_s11, %s2979_s16  ;;  %s3042_s22 = sld [smem:[#allocation2 + $0x8]]  ;;  %vm4764_vm10 = vcmp.eq.s32.totalorder %v2941_v1, %v3008_v14  ;;  %v383_v32 = vsel %vm4739_vm9, 1.0, %v4790_v5  ;;  %vm4763_vm12 = vcmp.eq.s32.totalorder %v2941_v1, %v3024_v18  ;;  %vm4773_vm6 = vcmp.eq.s32.totalorder %v2941_v1, %v3133_v47 }
  0x26   :  { %v179_v24 = vadd.f32 %v177_v19, %v127_v11  ;;  %v3050_v25 = vstv %s211_s21  ;;  %v3053_v26 = vstv %s2992_s17  ;;  %s3055_s23 = sld [smem:[#allocation2 + $0x9]]  ;;  %v178_v27 = vadd.f32 %v176_v20, %v126_v15 }
  0x27   :  { %v229_v28 = vmul.f32 %v227_v17, %v3050_v25  ;;  %s263_s24 = scalar_select %p262_p3, 1.0, 0.0  ;;  %v228_v30 = vmul.f32 %v226_v21, %v3050_v25  ;;  %vm4738_vm11 = vcmp.eq.s32.totalorder %v2946_v2, %v3053_v26  ;;  %vm4761_vm14 = vcmp.eq.s32.totalorder %v2941_v1, %v3053_v26 }
  0x28   :  { %v3066_v31 = vstv %s3010_s19  ;;  %s3068_s25 = sld [smem:[#allocation2 + $0x15]]  ;;  %v330_v38 = vsel %vm4764_vm10, 1.0, %v4790_v5  ;;  %v435_v40 = vsel %vm4738_vm11, 1.0, %v4790_v5  ;;  %v382_v42 = vsel %vm4763_vm12, 1.0, %v4790_v5 }
  0x29   :  { %v231_v33 = vadd.f32 %v229_v28, %v179_v24  ;;  %v3078_v34 = vstv %s263_s24  ;;  %p314_p4 = scmp.ne.s32.totalorder %s2959_s13, %s3026_s20  ;;  %s3082_s26 = sld [smem:[#allocation2 + $0xa]]  ;;  %vm4737_vm13 = vcmp.eq.s32.totalorder %v2946_v2, %v3066_v31  ;;  %v230_v36 = vadd.f32 %v228_v30, %v178_v27 }
  0x2a   :  { %v281_v35 = vmul.f32 %v279_v22, %v3078_v34  ;;  %s3089_s27 = sld [smem:[#allocation2 + $0xb]]  ;;  %v280_v37 = vmul.f32 %v278_v23, %v3078_v34  ;;  %v3107_v41 = vsel %vm4737_vm13, 1.0, %v4790_v5  ;;  %v434_v44 = vsel %vm4761_vm14, 1.0, %v4790_v5  ;;  %s2898_s24 = smov 32  }
  0x2b   :  { %s315_s28 = scalar_select %p314_p4, 1.0, 0.0  ;;  %v3097_v39 = vstv %s3042_s22  ;;  %vm4760_vm13 = vcmp.eq.s32.totalorder %v2941_v1, %v3066_v31  ;;  %vm4778_vm14 = vcmp.eq.s32.totalorder %v3159_v54, %v3008_v14  ;;  %vm4777_vm12 = vcmp.eq.s32.totalorder %v3159_v54, %v3024_v18 }
  0x2c   :  { %v3114_v43 = vstv %s3055_s23  ;;  %s3116_s2 = sld [smem:[#allocation2 + $0x16]]  ;;  %vm4740_vm15 = vcmp.eq.s32.totalorder %v2946_v2, %v3097_v39  ;;  %v283_v45 = vadd.f32 %v281_v35, %v231_v33  ;;  %v282_v49 = vadd.f32 %v280_v37, %v230_v36 }
  0x2d   :  { %v3126_v46 = vstv %s315_s28  ;;  %s3128_s29 = sld [smem:[#allocation2 + $0xc]]  ;;  %vm4742_vm11 = vcmp.eq.s32.totalorder %v2946_v2, %v3114_v43  ;;  %vm4754_vm9 = vcmp.eq.s32.totalorder %v2941_v1, %v3097_v39  ;;  %v3152_v52 = vsel %vm4740_vm15, 1.0, %v4790_v5 }
  0x2e   :  { %v333_v48 = vmul.f32 %v331_v29, %v3126_v46  ;;  %p366_p5 = scmp.ne.s32.totalorder %s2965_s14, %s3068_s25  ;;  %s3138_s30 = sld [smem:[#allocation2 + $0xd]]  ;;  %v332_v50 = vmul.f32 %v330_v38, %v3126_v46  ;;  %v486_v53 = vsel %vm4760_vm13, 1.0, %v4790_v5  ;;  %v3168_v56 = vsel %vm4742_vm11, 1.0, %v4790_v5 }
  0x2f   :  { %v3144_v51 = vstv %s3082_s26  ;;  %s3146_s5 = sld [smem:[#allocation2 + $0x17]]  ;;  %v3176_v57 = vsel %vm4754_vm9, 1.0, %v4790_v5  ;;  %vm4751_vm11 = vcmp.eq.s32.totalorder %v2941_v1, %v3114_v43  ;;  %vm4779_vm13 = vcmp.eq.s32.totalorder %v3159_v54, %v2988_v10 }
  0x30   :  { %s367_s6 = scalar_select %p366_p5, 1.0, 0.0  ;;  %v3162_v55 = vstv %s3089_s27  ;;  %vm4746_vm15 = vcmp.eq.s32.totalorder %v2946_v2, %v3144_v51  ;;  %v335_v58 = vadd.f32 %v333_v48, %v283_v45  ;;  %v334_v61 = vadd.f32 %v332_v50, %v282_v49 }
  0x31   :  { %4848 = vst [vmem:[#allocation17_spill] sm:$0xff] %v3162_v55  ;;  %s3178_s0 = sld [smem:[#allocation2 + $0xe]]  ;;  %vm4748_vm8 = vcmp.eq.s32.totalorder %v2946_v2, %v3162_v55  ;;  %v3196_v60 = vsel %vm4746_vm15, 1.0, %v4790_v5  ;;  %vm4749_vm4 = vcmp.eq.s32.totalorder %v2941_v1, %v3144_v51  ;;  %vm4750_vm2 = vcmp.eq.s32.totalorder %v2941_v1, %v3162_v55 }
  0x32   :  { %v3186_v59 = vstv %s367_s6  ;;  %p418_p6 = scmp.ne.s32.totalorder %s2992_s17, %s3116_s2  ;;  %s3190_s7 = sld [smem:[#allocation2 + $0xf]]  ;;  %v3216_v8 = vsel %vm4748_vm8, 1.0, %v4790_v5  ;;  %v3224_v11 = vsel %vm4751_vm11, 1.0, %v4790_v5  ;;  %v3236_v13 = vsel %vm4749_vm4, 1.0, %v4790_v5 }
  0x33   :  { %v385_v62 = vmul.f32 %v383_v32, %v3186_v59  ;;  %v3202_v63 = vstv %s3128_s29  ;;  %s3204_s1 = sld [smem:[#allocation2 + $0x18]]  ;;  %v384_v0 = vmul.f32 %v382_v42, %v3186_v59  ;;  %vm112_vm8 = vcmp.eq.s32.totalorder %v3159_v54, %v2952_v3 }
  0x34   :  { %4849 = vst [vmem:[#allocation18_spill] sm:$0xff] %v3202_v63  ;;  %s419_s8 = scalar_select %p418_p6, 1.0, 0.0  ;;  %v3210_v6 = vstv %s3138_s30  ;;  %vm4752_vm15 = vcmp.eq.s32.totalorder %v2946_v2, %v3202_v63  ;;  %v3248_v19 = vsel %vm4750_vm2, 1.0, %v4790_v5  ;;  %vm4755_vm4 = vcmp.eq.s32.totalorder %v2941_v1, %v3202_v63 }
  0x35   :  { %v387_v12 = vadd.f32 %v385_v62, %v335_v58  ;;  %p470_p7 = scmp.ne.s32.totalorder %s3010_s19, %s3146_s5  ;;  %s3228_s3 = sld [smem:[#allocation2 + $0x19]]  ;;  %vm4753_vm0 = vcmp.eq.s32.totalorder %v2946_v2, %v3210_v6  ;;  %v386_v17 = vadd.f32 %v384_v0, %v334_v61  ;;  %v3260_v22 = vsel %vm4752_vm15, 1.0, %v4790_v5  ;;  %vm113_vm15 = vmand %vm4773_vm6, %vm112_vm8 }
  0x36   :  { %v3240_v15 = vstv %s419_s8  ;;  %s3242_s10 = sld [smem:[#allocation2 + $0x1a]]  ;;  %v3272_v27 = vsel %vm4753_vm0, 1.0, %v4790_v5  ;;  %vm4759_vm11 = vcmp.eq.s32.totalorder %v2941_v1, %v3210_v6  ;;  %v3296_v30 = vsel %vm4755_vm4, 1.0, %v4790_v5 }
  0x37   :  { %v437_v20 = vmul.f32 %v435_v40, %v3240_v15  ;;  %s471_s11 = scalar_select %p470_p7, 1.0, 0.0  ;;  %v3254_v21 = vstv %s3178_s0  ;;  %v436_v23 = vmul.f32 %v434_v44, %v3240_v15  ;;  %v3315_v37 = vsel %vm4759_vm11, 1.0, %v4790_v5 }
  0x38   :  { %v3264_v24 = vstv %s3190_s7  ;;  %s3266_s13 = sld [smem:[#allocation2 + $0x1b]]  ;;  %vm4757_vm2 = vcmp.eq.s32.totalorder %v2946_v2, %v3254_v21  ;;  %vm4758_vm9 = vcmp.eq.s32.totalorder %v2941_v1, %v3254_v21  ;;  %v115_v38 = vsel %vm113_vm15, 1.0, %v4790_v5 }
  0x39   :  { %v439_v28 = vadd.f32 %v437_v20, %v387_v12  ;;  %v3284_v29 = vstv %s471_s11  ;;  %p520_p8 = scmp.ne.s32.totalorder %s3042_s22, %s3204_s1  ;;  %s3288_s14 = sld [smem:[#allocation2 + $0x1c]]  ;;  %vm4756_vm0 = vcmp.eq.s32.totalorder %v2946_v2, %v3264_v24  ;;  %v438_v33 = vadd.f32 %v436_v23, %v386_v17 }
  0x3a   :  { %v489_v32 = vmul.f32 %v3107_v41, %v3284_v29  ;;  %s3300_s15 = sld [smem:[#allocation2 + $0x1d]]  ;;  %v488_v35 = vmul.f32 %v486_v53, %v3284_v29  ;;  %v3309_v36 = vsel %vm4757_vm2, 1.0, %v4790_v5  ;;  %vm137_vm4 = vcmp.eq.s32.totalorder %v3159_v54, %v2963_v4 }
  0x3b   :  { %s521_s17 = scalar_select %p520_p8, 1.0, 0.0  ;;  %v3328_v41 = vsel %vm4756_vm0, 1.0, %v4790_v5  ;;  %v3331_v44 = vstv %s2943_s9  ;;  %v3341_v48 = vsel %vm4758_vm9, 1.0, %v4790_v5  ;;  %vm4784_vm0 = vcmp.eq.s32.totalorder %v3159_v54, %v2977_v7 }
  0x3c   :  { %v491_v40 = vadd.f32 %v489_v32, %v439_v28  ;;  %p568_p9 = scmp.ne.s32.totalorder %s3055_s23, %s3228_s3  ;;  %p616_p10 = scmp.ne.s32.totalorder %s3082_s26, %s3242_s10  ;;  %v490_v42 = vadd.f32 %v488_v35, %v438_v33  ;;  %4850 = vst [vmem:[#allocation19_spill] sm:$0xff] %v3331_v44  ;;  %vm4770_vm15 = vcmp.eq.s32.totalorder %v2941_v1, %v3331_v44  ;;  %v118_v53 = vmul.f32 %v2985_v9, %v115_v38 }
  0x3d   :  { %v3333_v45 = vstv %s521_s17  ;;  %s3335_s18 = sld [smem:[#allocation2 + $0x1e]]  ;;  %vm163_vm2 = vmand %vm4770_vm15, %vm137_vm4  ;;  %v3359_v58 = vstv %s2954_s12  ;;  %vm4762_vm9 = vcmp.eq.s32.totalorder %v2941_v1, %v3264_v24  ;;  %vm4792_vm5 = vcmp.eq.s32.totalorder %v3159_v54, %v3114_v43  ;;  %s2900_s26 = smov [#allocation10]  }
  0x3e   :  { %4851 = vst [vmem:[#allocation20_spill] sm:$0xff] %v3333_v45  ;;  %v539_v49 = vmul.f32 %v3152_v52, %v3333_v45  ;;  %s569_s9 = scalar_select %p568_p9, 1.0, 0.0  ;;  %v538_v50 = vmul.f32 %v3176_v57, %v3333_v45  ;;  %v165_v52 = vsel %vm163_vm2, 1.0, %v4790_v5  ;;  %vm4768_vm11 = vcmp.eq.s32.totalorder %v2941_v1, %v3359_v58 }
  0x3f   :  { %4852 = vst [vmem:[#allocation21_spill] sm:$0xff] %v3359_v58  ;;  %s617_s19 = scalar_select %p616_p10, 1.0, 0.0  ;;  %v3370_v57 = vstv %s2979_s16  ;;  %v168_v12 = vmul.f32 %v3017_v16, %v165_v52  ;;  %vm215_vm2 = vmand %vm4768_vm11, %vm4784_vm0  ;;  %vm4783_vm11 = vcmp.eq.s32.totalorder %v3159_v54, %v3097_v39  ;;  %vm443_vm6 = vcmp.eq.s32.totalorder %v3159_v54, %v3202_v63 }
  0x40   :  { %v541_v61 = vadd.f32 %v539_v49, %v491_v40  ;;  %v3372_v62 = vstv %s569_s9  ;;  %p664_p11 = scmp.ne.s32.totalorder %s3089_s27, %s3266_s13  ;;  %p712_p12 = scmp.ne.s32.totalorder %s3128_s29, %s3288_s14  ;;  %v540_v0 = vadd.f32 %v538_v50, %v490_v42  ;;  %v217_v28 = vsel %vm215_vm2, 1.0, %v4790_v5 }
  0x41   :  { %4853 = vst [vmem:[#allocation22_spill] sm:$0xff] %v3372_v62  ;;  %v587_v17 = vmul.f32 %v3168_v56, %v3372_v62  ;;  %v3387_v20 = vstv %s617_s19  ;;  %p760_p13 = scmp.ne.s32.totalorder %s3138_s30, %s3300_s15  ;;  %s3391_s12 = sld [smem:[#allocation2 + $0x1f]]  ;;  %v586_v23 = vmul.f32 %v3224_v11, %v3372_v62  ;;  %v170_v33 = vadd.f32 %v168_v12, %v118_v53 }
  0x42   :  { %4854 = vst [vmem:[#allocation23_spill] sm:$0xff] %v3387_v20  ;;  %v635_v32 = vmul.f32 %v3196_v60, %v3387_v20  ;;  %s665_s16 = scalar_select %p664_p11, 1.0, 0.0  ;;  %v634_v56 = vmul.f32 %v3236_v13, %v3387_v20  ;;  %v220_v38 = vmul.f32 %v3050_v25, %v217_v28  ;;  %vm4765_vm2 = vcmp.eq.s32.totalorder %v2941_v1, %v3370_v57 }
  0x43   :  { %v589_v35 = vadd.f32 %v587_v17, %v541_v61  ;;  %s713_s21 = scalar_select %p712_p12, 1.0, 0.0  ;;  %v588_v11 = vadd.f32 %v586_v23, %v540_v0  ;;  %v872_v13 = vsel %vm4762_vm9, 1.0, %v4790_v5  ;;  %v3420_v40 = vstv %s3026_s20  ;;  %vm267_vm9 = vmand %vm4765_vm2, %vm4779_vm13 }
  0x44   :  { %v3408_v60 = vstv %s665_s16  ;;  %s761_s22 = scalar_select %p760_p13, 1.0, 0.0  ;;  %v222_v23 = vadd.f32 %v220_v38, %v170_v33  ;;  %vm4767_vm10 = vcmp.eq.s32.totalorder %v2941_v1, %v3420_v40  ;;  %vm4776_vm2 = vcmp.eq.s32.totalorder %v3159_v54, %v3053_v26 }
  0x45   :  { %v637_v42 = vadd.f32 %v635_v32, %v589_v35  ;;  %v683_v49 = vmul.f32 %v3216_v8, %v3408_v60  ;;  %v3424_v50 = vstv %s713_s21  ;;  %p808_p0 = scmp.ne.s32.totalorder %s3178_s0, %s3335_s18  ;;  %v636_v53 = vadd.f32 %v634_v56, %v588_v11  ;;  %vm319_vm7 = vmand %vm4767_vm10, %vm4778_vm14  ;;  %s2517_s27 = sshll.u32 %s2900_s26, 4  ;;  %s2518_s27 = int_to_ptr.vmem [resolvable:$true] %s2517_s27 }
  0x46   :  { %v731_v52 = vmul.f32 %v3260_v22, %v3424_v50  ;;  %v3436_v61 = vstv %s761_s22  ;;  %v682_v0 = vmul.f32 %v3248_v19, %v3408_v60  ;;  %v730_v17 = vmul.f32 %v3296_v30, %v3424_v50  ;;  %s2519_s29 = sshll.u32 %s4736_s4, 4  ;;  %s2520_s29 = int_to_ptr.hbm [resolvable:$true] %s2519_s29 }
  0x47   :  { %4855 = vst [vmem:[#allocation24_spill] sm:$0xff] %v3436_v61  ;;  %v685_v8 = vadd.f32 %v683_v49, %v637_v42  ;;  %v779_v12 = vmul.f32 %v3272_v27, %v3436_v61  ;;  %s809_s20 = scalar_select %p808_p0, 1.0, 0.0  ;;  %v778_v22 = vmul.f32 %v3315_v37, %v3436_v61  ;;  %v269_v19 = vsel %vm267_vm9, 1.0, %v4790_v5 }
  0x48   :  { %p856_p1 = scmp.ne.s32.totalorder %s3190_s7, %s3391_s12  ;;  %v684_v28 = vadd.f32 %v682_v0, %v636_v53  ;;  %v272_v27 = vmul.f32 %v3078_v34, %v269_v19  ;;  %v321_v35 = vsel %vm319_vm7, 1.0, %v4790_v5  ;;  %v3471_v49 = vstv %s3068_s25  ;;  %s2899_s25 = smov 64  }
  0x49   :  { %v733_v32 = vadd.f32 %v731_v52, %v685_v8  ;;  %v3453_v56 = vstv %s809_s20  ;;  %v324_v42 = vmul.f32 %v3126_v46, %v321_v35  ;;  %vm4781_vm9 = vcmp.eq.s32.totalorder %v3159_v54, %v3066_v31 }
  0x4a   :  { %v827_v30 = vmul.f32 %v3309_v36, %v3453_v56  ;;  %s857_s23 = scalar_select %p856_p1, 1.0, 0.0  ;;  %v732_v37 = vadd.f32 %v730_v17, %v684_v28  ;;  %v826_v33 = vmul.f32 %v3341_v48, %v3453_v56  ;;  %v274_v38 = vadd.f32 %v272_v27, %v222_v23 }
  0x4b   :  { %v781_v11 = vadd.f32 %v779_v12, %v733_v32  ;;  %vm4771_vm10 = vcmp.eq.s32.totalorder %v2941_v1, %v3471_v49  ;;  %v3492_v23 = vstv %s3116_s2  ;;  %vm449_vm1 = vcmp.eq.s32.totalorder %v3159_v54, %v3210_v6 }
  0x4c   :  { %v3473_v53 = vstv %s857_s23  ;;  %v780_v52 = vadd.f32 %v778_v22, %v732_v37  ;;  %v326_v8 = vadd.f32 %v324_v42, %v274_v38  ;;  %vm371_vm7 = vmand %vm4771_vm10, %vm4777_vm12  ;;  %vm4775_vm15 = vcmp.eq.s32.totalorder %v2941_v1, %v3492_v23 }
  0x4d   :  { %v829_v36 = vadd.f32 %v827_v30, %v781_v11  ;;  %v875_v48 = vmul.f32 %v3328_v41, %v3473_v53  ;;  %v874_v0 = vmul.f32 %v872_v13, %v3473_v53  ;;  %v373_v17 = vsel %vm371_vm7, 1.0, %v4790_v5  ;;  %vm423_vm3 = vmand %vm4775_vm15, %vm4776_vm2 }
  0x4e   :  { %v828_v12 = vadd.f32 %v826_v33, %v780_v52  ;;  %v376_v13 = vmul.f32 %v3186_v59, %v373_v17  ;;  %vm4787_vm10 = vcmp.eq.s32.totalorder %v3159_v54, %v3144_v51  ;;  %vm4789_vm7 = vcmp.eq.s32.totalorder %v3159_v54, %v3162_v55 }
  0x4f   :  { %v3494_v41 = vadd.f32 %v875_v48, %v829_v36  ;;  %v3514_v22 = vstv %s3146_s5  ;;  %v425_v27 = vsel %vm423_vm3, 1.0, %v4790_v5  ;;  %vm495_vm12 = vcmp.eq.s32.totalorder %v3159_v54, %v3254_v21 }
  0x50   :  { %v3501_v28 = vadd.f32 %v874_v0, %v828_v12  ;;  %v378_v32 = vadd.f32 %v376_v13, %v326_v8  ;;  %v428_v37 = vmul.f32 %v3240_v15, %v425_v27  ;;  %vm4780_vm15 = vcmp.eq.s32.totalorder %v2941_v1, %v3514_v22 }
  0x51   :  { %v908_v19 = vmax.f32 %v3494_v41, 1.0  ;;  %vm475_vm3 = vmand %vm4780_vm15, %vm4781_vm9  ;;  %v3535_v33 = vstv %s3204_s1  ;;  %v3542_v42 = vstv %s3228_s3  ;;  %v3545_v52 = vstv %s3242_s10 }
  0x52   :  { %v907_v30 = vmax.f32 %v3501_v28, 1.0  ;;  %v430_v35 = vadd.f32 %v428_v37, %v378_v32  ;;  %v477_v11 = vsel %vm475_vm3, 1.0, %v4790_v5  ;;  %vm4782_vm13 = vcmp.eq.s32.totalorder %v2941_v1, %v3535_v33 }
  0x53   :  { %2631 = vrsqrt.f32 %v908_v19  ;;  %vm925_vm2 = vweird.f32 %v908_v19  ;;  %v480_v38 = vmul.f32 %v3284_v29, %v477_v11  ;;  %vm525_vm15 = vmand %vm4782_vm13, %vm4783_vm11  ;;  %vm4786_vm3 = vcmp.eq.s32.totalorder %v2941_v1, %v3542_v42 }
  0x54   :  { %2633 = vrsqrt.f32 %v907_v30  ;;  %vm915_vm14 = vweird.f32 %v907_v30  ;;  %vm4785_vm9 = vcmp.eq.s32.totalorder %v2941_v1, %v3545_v52  ;;  %v3558_v36 = vstv %s3266_s13  ;;  %vm573_vm13 = vmand %vm4786_vm3, %vm4792_vm5 }
  0x55   :  { %v3561_v48 = vstv %s3288_s14  ;;  %v482_v0 = vadd.f32 %v480_v38, %v430_v35  ;;  %v527_v8 = vsel %vm525_vm15, 1.0, %v4790_v5  ;;  %vm4788_vm11 = vcmp.eq.s32.totalorder %v2941_v1, %v3558_v36  ;;  %vm621_vm15 = vmand %vm4785_vm9, %vm4787_vm10 }
  0x56   :  { %4856 = vst [vmem:[#allocation25_spill] sm:$0xff] %v3561_v48  ;;  %vm4795_vm0 = vcmp.eq.s32.totalorder %v2941_v1, %v3561_v48  ;;  %v530_v12 = vmul.f32 %v3333_v45, %v527_v8  ;;  %v575_v17 = vsel %vm573_vm13, 1.0, %v4790_v5  ;;  %v3583_v13 = vstv %s3300_s15  ;;  %vm669_vm13 = vmand %vm4788_vm11, %vm4789_vm7 }
  0x57   :  { %v3586_v32 = vstv %s3335_s18  ;;  %v578_v37 = vmul.f32 %v3372_v62, %v575_v17  ;;  %v623_v35 = vsel %vm621_vm15, 1.0, %v4790_v5  ;;  %vm4803_vm9 = vcmp.eq.s32.totalorder %v2941_v1, %v3583_v13  ;;  %vm717_vm11 = vmand %vm4795_vm0, %vm443_vm6 }
  0x58   :  { %vm4804_vm3 = vcmp.eq.s32.totalorder %v2941_v1, %v3586_v32  ;;  %v532_v8 = vadd.f32 %v530_v12, %v482_v0  ;;  %v626_v17 = vmul.f32 %v3387_v20, %v623_v35  ;;  %vm905_vm5 = vcmp.gt.f32.partialorder %v3501_v28, 0.0 }
  0x59   :  { %v3588_v27 = vpop.eup %2631  ;;  %v4859_v0 = vmov 0.0  }
  0x5a   :  { %v3602_v11 = vpop.eup %2633  ;;  %v920_v38 = vmul.f32 %v3588_v27, %v908_v19  ;;  %vm926_vm15 = vweird.f32 %v3588_v27  ;;  %v671_v12 = vsel %vm669_vm13, 1.0, %v4859_v0  ;;  %v719_v35 = vsel %vm717_vm11, 1.0, %v4859_v0 }
  0x5b   :  { %vm3615_vm7 = vmor %vm925_vm2, %vm926_vm15  ;;  %v910_v62 = vmul.f32 %v3602_v11, %v907_v30  ;;  %vm916_vm10 = vweird.f32 %v3602_v11  ;;  %vm4834_vm2 = vcmp.eq.s32.totalorder %v3159_v54, %v3264_v24  ;;  %v580_v63 = vadd.f32 %v578_v37, %v532_v8 }
  0x5c   :  { %v921_v20 = vmul.f32 %v3588_v27, %v920_v38  ;;  %vm3626_vm0 = vmor %vm915_vm14, %vm916_vm10  ;;  %v674_v55 = vmul.f32 %v3408_v60, %v671_v12  ;;  %vm4823_vm15 = vcmask 1043456   ;;  %v722_v48 = vmul.f32 %v3424_v50, %v719_v35 }
  0x5d   :  { %v911_v45 = vmul.f32 %v3602_v11, %v910_v62  ;;  %vm765_vm10 = vmand %vm4803_vm9, %vm449_vm1  ;;  %v3642_v30 = vstv %s3391_s12  ;;  %vm4809_vm11 = vcmp.eq.s32.totalorder %v2946_v2, %v3133_v47  ;;  %v628_v38 = vadd.f32 %v626_v17, %v580_v63 }
  0x5e   :  { %v922_v37 = vmul.f32 0.5, %v921_v20  ;;  %v767_v8 = vsel %vm765_vm10, 1.0, %v4859_v0  ;;  %vm813_vm14 = vmand %vm4804_vm3, %vm495_vm12  ;;  %vm4808_vm13 = vcmp.eq.s32.totalorder %v2941_v1, %v3642_v30  ;;  %vm4812_vm9 = vcmp.eq.s32.totalorder %v2946_v2, %v3331_v44 }
  0x5f   :  { %v912_v62 = vmul.f32 0.5, %v911_v45  ;;  %v770_v12 = vmul.f32 %v3436_v61, %v767_v8  ;;  %v815_v35 = vsel %vm813_vm14, 1.0, %v4859_v0  ;;  %vm861_vm10 = vmand %vm4808_vm13, %vm4834_vm2  ;;  %v676_v20 = vadd.f32 %v674_v55, %v628_v38 }
  0x60   :  { %v923_v63 = vsub.f32 1.5, %v922_v37  ;;  %v818_v17 = vmul.f32 %v3453_v56, %v815_v35  ;;  %v863_v45 = vsel %vm861_vm10, 1.0, %v4859_v0  ;;  %vm4833_vm3 = vcmask 97280   ;;  %vm114_vm14 = vmand %vm4809_vm11, %vm112_vm8  ;;  %v3692_v35 = vld [vmem:[#allocation6 + $0x8] sm:$0xf] }
  0x61   :  { %v913_v8 = vsub.f32 1.5, %v912_v62  ;;  %v866_v1 = vmul.f32 %v3473_v53, %v863_v45  ;;  %v116_v61 = vsel %vm114_vm14, 1.0, %v4859_v0  ;;  %vm164_vm10 = vmand %vm4812_vm9, %vm137_vm4  ;;  %vm4817_vm13 = vcmp.eq.s32.totalorder %v2946_v2, %v3359_v58 }
  0x62   :  { %v924_v55 = vmul.f32 %v3588_v27, %v923_v63  ;;  %v724_v37 = vadd.f32 %v722_v48, %v676_v20  ;;  %v119_v38 = vmul.f32 %v2985_v9, %v116_v61  ;;  %v166_v62 = vsel %vm164_vm10, 1.0, %v4859_v0  ;;  %v77_v9 = vld [vmem:[#allocation7 + $0x8] sm:$0xff]  ;;  %v76_v61 = vld [vmem:[#allocation7] sm:$0xff]  ;;  %v903_v20 = vld [vmem:[#allocation6] sm:$0xff] }
  0x63   :  { %vm4862_vm14 = vcmp.eq.s32.totalorder %v3159_v54, %v2977_v7  ;;  %v914_v45 = vmul.f32 %v3602_v11, %v913_v8  ;;  %v169_v44 = vmul.f32 %v3017_v16, %v166_v62  ;;  %vm4819_vm9 = vcmp.eq.s32.totalorder %v2946_v2, %v3370_v57  ;;  %1021 = vmatpush.msra.mxu2 %v77_v9 }
  0x64   :  { %vm216_vm11 = vmand %vm4817_vm13, %vm4862_vm14  ;;  %v928_v48 = vsel %vm3615_vm7, %v3588_v27, %v924_v55  ;;  %v772_v58 = vadd.f32 %v770_v12, %v724_v37  ;;  %vm4863_vm10 = vcmp.eq.s32.totalorder %v3159_v54, %v2988_v10  ;;  %vm4818_vm14 = vcmp.eq.s32.totalorder %v2946_v2, %v3420_v40 }
  0x65   :  { %v218_v63 = vsel %vm216_vm11, 1.0, %v4859_v0  ;;  %vm268_vm11 = vmand %vm4819_vm9, %vm4863_vm10  ;;  %vm4864_vm13 = vcmp.gt.f32.partialorder %v3494_v41, 0.0  ;;  %v918_v5 = vsel %vm3626_vm0, %v3602_v11, %v914_v45  ;;  %vm4865_vm7 = vcmp.eq.s32.totalorder %v3159_v54, %v3008_v14  ;;  %1022 = vmatpush.msra.mxu2 %v76_v61  ;;  %v4874_v61 = vld [vmem:[#allocation20_spill] sm:$0xff] }
  0x66   :  { %v221_v47 = vmul.f32 %v3050_v25, %v218_v63  ;;  %v3713_v16 = vsel %vm4864_vm13, %v928_v48, 0.0  ;;  %v171_v25 = vadd.f32 %v169_v44, %v119_v38  ;;  %v270_v27 = vsel %vm268_vm11, 1.0, %v4859_v0  ;;  %vm320_vm10 = vmand %vm4818_vm14, %vm4865_vm7  ;;  %v4873_v63 = vld [vmem:[#allocation25_spill] sm:$0xff] }
  0x67   :  { %v934_v12 = vmul.f32 %v3713_v16, %v3692_v35  ;;  %v3729_v41 = vsel %vm905_vm5, %v918_v5, 0.0  ;;  %v820_v8 = vadd.f32 %v818_v17, %v772_v58  ;;  %v273_v11 = vmul.f32 %v3078_v34, %v270_v27  ;;  %v4875_v5 = vld [vmem:[#allocation17_spill] sm:$0xff]  ;;  %v4877_v27 = vld [vmem:[#allocation22_spill] sm:$0xff] }
  0x68   :  { %v933_v44 = vmul.f32 %v3729_v41, %v903_v20  ;;  %v223_v19 = vadd.f32 %v221_v47, %v171_v25  ;;  %v322_v55 = vsel %vm320_vm10, 1.0, %v4859_v0  ;;  %vm4820_vm0 = vcmp.eq.s32.totalorder %v2946_v2, %v3471_v49 }
  0x69   :  { %2562 = vmatpush.msk.msra.mxu0 %vm4823_vm15, %v934_v12  ;;  %v3737_v37 = vadd.f32 %v866_v1, %v820_v8  ;;  %v325_v28 = vmul.f32 %v3126_v46, %v322_v55  ;;  %vm4867_vm5 = vcmp.eq.s32.totalorder %v3159_v54, %v3024_v18  ;;  %vm4821_vm11 = vcmp.eq.s32.totalorder %v2946_v2, %v3492_v23  ;;  %v4878_v8 = vld [vmem:[#allocation18_spill] sm:$0xff] }
  0x6a   :  { %vm372_vm13 = vmand %vm4820_vm0, %vm4867_vm5  ;;  %vm4822_vm7 = vcmp.eq.s32.totalorder %v2946_v2, %v3514_v22  ;;  %v275_v34 = vadd.f32 %v273_v11, %v223_v19  ;;  %vm4868_vm10 = vcmp.eq.s32.totalorder %v3159_v54, %v3053_v26  ;;  %vm4824_vm9 = vcmp.eq.s32.totalorder %v2946_v2, %v3535_v33 }
  0x6b   :  { %4866 = vst [vmem:[#allocation26_spill] sm:$0xff] %v3737_v37  ;;  %v374_v47 = vsel %vm372_vm13, 1.0, %v4859_v0  ;;  %vm424_vm14 = vmand %vm4821_vm11, %vm4868_vm10  ;;  %vm4825_vm5 = vcmp.eq.s32.totalorder %v2946_v2, %v3542_v42  ;;  %961 = vmatpush.msra.mxu0 %v933_v44  ;;  %vm4869_vm13 = vcmp.eq.s32.totalorder %v3159_v54, %v3066_v31  ;;  %vm4831_vm10 = vcmp.eq.s32.totalorder %v2946_v2, %v3545_v52  ;;  %v4879_v44 = vld [vmem:[#allocation23_spill] sm:$0xff] }
  0x6c   :  { %v377_v1 = vmul.f32 %v3186_v59, %v374_v47  ;;  %v426_v46 = vsel %vm424_vm14, 1.0, %v4859_v0  ;;  %vm476_vm0 = vmand %vm4822_vm7, %vm4869_vm13  ;;  %2563 = vmatmul.msk.f32.vlgmr.msra.gmra.mxu0 %vm4833_vm3, %v3737_v37  ;;  %v327_v58 = vadd.f32 %v325_v28, %v275_v34  ;;  %vm4870_vm14 = vcmp.eq.s32.totalorder %v3159_v54, %v3097_v39 }
  0x6d   :  { %v429_v17 = vmul.f32 %v3240_v15, %v426_v46  ;;  %v478_v59 = vsel %vm476_vm0, 1.0, %v4859_v0  ;;  %vm526_vm11 = vmand %vm4824_vm9, %vm4870_vm14  ;;  %vm4871_vm13 = vcmp.eq.s32.totalorder %v3159_v54, %v3114_v43  ;;  %vm4830_vm15 = vcmp.eq.s32.totalorder %v2946_v2, %v3558_v36 }
  0x6e   :  { %v528_v38 = vsel %vm526_vm11, 1.0, %v4859_v0  ;;  %vm574_vm7 = vmand %vm4825_vm5, %vm4871_vm13  ;;  %v379_v15 = vadd.f32 %v377_v1, %v327_v58  ;;  %v481_v62 = vmul.f32 %v3284_v29, %v478_v59  ;;  %vm4872_vm0 = vcmp.eq.s32.totalorder %v3159_v54, %v3144_v51 }
  0x6f   :  { %vm622_vm11 = vmand %vm4831_vm10, %vm4872_vm0  ;;  %v576_v45 = vsel %vm574_vm7, 1.0, %v4859_v0  ;;  %vm4826_vm14 = vcmp.eq.s32.totalorder %v2946_v2, %v4873_v63  ;;  %vm4832_vm9 = vcmask 130048   ;;  %v531_v48 = vmul.f32 %v4874_v61, %v528_v38 }
  0x70   :  { %v431_v9 = vadd.f32 %v429_v17, %v379_v15  ;;  %vm4876_vm13 = vcmp.eq.s32.totalorder %v3159_v54, %v4875_v5  ;;  %2567 = vmatmul.msk.f32.vlgmr.msra.gmra.mxu2 %vm4832_vm9, %v903_v20  ;;  %v624_v29 = vsel %vm622_vm11, 1.0, %v4859_v0  ;;  %vm4829_vm7 = vcmp.eq.s32.totalorder %v2946_v2, %v3583_v13  ;;  %vm718_vm0 = vmand %vm4826_vm14, %vm443_vm6  ;;  %v4880_v17 = vld [vmem:[#allocation24_spill] sm:$0xff] }
  0x71   :  { %vm670_vm5 = vmand %vm4830_vm15, %vm4876_vm13  ;;  %v579_v12 = vmul.f32 %v4877_v27, %v576_v45  ;;  %vm4828_vm13 = vcmp.eq.s32.totalorder %v2946_v2, %v3586_v32  ;;  %v627_v19 = vmul.f32 %v4879_v44, %v624_v29  ;;  %v720_v55 = vsel %vm718_vm0, 1.0, %v4859_v0  ;;  %v83_v44 = vld [vmem:[#allocation7 + $0x38] sm:$0xff] }
  0x72   :  { %v483_v25 = vadd.f32 %v481_v62, %v431_v9  ;;  %v672_v11 = vsel %vm670_vm5, 1.0, %v4859_v0  ;;  %vm766_vm11 = vmand %vm4829_vm7, %vm449_vm1  ;;  %vm4827_vm14 = vcmp.eq.s32.totalorder %v2946_v2, %v3642_v30  ;;  %v723_v46 = vmul.f32 %v3424_v50, %v720_v55  ;;  %v3862_v55 = vld [vmem:[#allocation7 + $0x58] sm:$0xff] }
  0x73   :  { %v675_v34 = vmul.f32 %v3408_v60, %v672_v11  ;;  %vm814_vm5 = vmand %vm4828_vm13, %vm495_vm12  ;;  %v768_v47 = vsel %vm766_vm11, 1.0, %v4859_v0  ;;  %v931_v29 = vsub.f32 0.0, %v3729_v41  ;;  %v81_v11 = vld [vmem:[#allocation7 + $0x28] sm:$0xff]  ;;  %vm4883_vm13 = vcmp.eq.s32.totalorder %v3159_v54, %v2977_v7  ;;  %v4927_v41 = vld [vmem:[#allocation19_spill] sm:$0xff] }
  0x74   :  { %v533_v20 = vadd.f32 %v531_v48, %v483_v25  ;;  %vm862_vm0 = vmand %vm4827_vm14, %vm4834_vm2  ;;  %v816_v60 = vsel %vm814_vm5, 1.0, %v4859_v0  ;;  %v771_v59 = vmul.f32 %v4880_v17, %v768_v47  ;;  %v78_v48 = vld [vmem:[#allocation7 + $0x10] sm:$0xff]  ;;  %1145 = vmatpush.msrb.mxu2 %v81_v11  ;;  %vm4889_vm15 = vcmp.eq.s32.totalorder %v3159_v54, %v3008_v14 }
  0x75   :  { %v864_v38 = vsel %vm862_vm0, 1.0, %v4859_v0  ;;  %v819_v50 = vmul.f32 %v3453_v56, %v816_v60  ;;  %v932_v56 = vsub.f32 0.0, %v3713_v16  ;;  %v3872_v16 = vld [vmem:[#allocation7 + $0x50] sm:$0xff]  ;;  %v4890_v60 = vld [vmem:[#allocation16_spill] sm:$0xff]  ;;  %vm4899_vm2 = vcmp.eq.s32.totalorder %v3159_v54, %v3097_v39 }
  0x76   :  { %v581_v28 = vadd.f32 %v579_v12, %v533_v20  ;;  %v867_v45 = vmul.f32 %v3473_v53, %v864_v38  ;;  %v4882_v20 = vld [vmem:[#allocation15_spill] sm:$0xff]  ;;  %vm544_vm10 = vcmp.eq.s32.totalorder %v3159_v54, %v4890_v60 }
  0x77   :  { %vm130_vm11 = vcmp.eq.s32.totalorder %v4882_v20, 0  ;;  %vm180_vm0 = vcmp.eq.s32.totalorder %v4882_v20, 1 }
  0x78   :  { %v629_v1 = vadd.f32 %v627_v19, %v581_v28  ;;  %2568 = vmatmul.msk.f32.gmra.mxu2 %vm4832_vm9, %v3692_v35  ;;  %v79_v35 = vld [vmem:[#allocation7 + $0x18] sm:$0xff]  ;;  %v80_v19 = vld [vmem:[#allocation7 + $0x20] sm:$0xff]  ;;  %vm132_vm5 = vmand %vm130_vm11, %vm112_vm8  ;;  %vm232_vm8 = vcmp.eq.s32.totalorder %v4882_v20, 2 }
  0x79   :  { %992 = vmatpush.msra.mxu1 %v79_v35  ;;  %1146 = vmatpush.msrb.mxu2 %v80_v19  ;;  %vm138_vm14 = vmand %vm130_vm11, %vm137_vm4  ;;  %v134_v28 = vsel %vm132_vm5, 1.0, %v4859_v0  ;;  %vm4886_vm4 = vcmp.eq.s32.totalorder %v3159_v54, %v2988_v10 }
  0x7a   :  { %v677_v58 = vadd.f32 %v675_v34, %v629_v1  ;;  %vm3878_vm7 = vmand %vm180_vm0, %vm4883_vm13  ;;  %v140_v34 = vsel %vm138_vm14, 1.0, %v4859_v0  ;;  %v3892_v1 = vld [vmem:[#allocation7 + $0x48] sm:$0xff]  ;;  %vm284_vm13 = vcmp.eq.s32.totalorder %v4882_v20, 3  ;;  %vm4836_vm14 = vcmp.eq.s32.totalorder %v2946_v2, 8 }
  0x7b   :  { %993 = vmatpush.msra.mxu1 %v78_v48  ;;  %1446 = vmatpush.msra.mxu2 %v3862_v55  ;;  %vm3888_vm11 = vmand %vm180_vm0, %vm4886_vm4  ;;  %vm4891_vm0 = vcmp.eq.s32.totalorder %v3159_v54, %v3024_v18 }
  0x7c   :  { %v725_v15 = vadd.f32 %v723_v46, %v677_v58  ;;  %vm236_vm5 = vmand %vm232_vm8, %vm4889_vm15  ;;  %v186_v58 = vsel %vm3878_vm7, 1.0, %v134_v28  ;;  %v192_v17 = vsel %vm3888_vm11, 1.0, %v140_v34  ;;  %vm4835_vm11 = vcmp.eq.s32.totalorder %v2946_v2, 9  ;;  %v82_v28 = vld [vmem:[#allocation7 + $0x30] sm:$0xff] }
  0x7d   :  { %1116 = vmatpush.msrb.mxu1 %v83_v44  ;;  %1447 = vmatpush.msra.mxu2 %v3872_v16  ;;  %vm242_vm4 = vmand %vm232_vm8, %vm4891_vm0  ;;  %vm4896_vm0 = vcmp.eq.s32.totalorder %v3159_v54, %v3066_v31 }
  0x7e   :  { %v773_v62 = vadd.f32 %v771_v59, %v725_v15  ;;  %vm546_vm7 = vmand %vm4836_vm14, %vm544_vm10  ;;  %v4895_v15 = vld [vmem:[#allocation21_spill] sm:$0xff]  ;;  %vm687_vm14 = vcmp.eq.s32.totalorder %v2946_v2, 11 }
  0x7f   :  { %1448 = vmatpush.msra.mxu2 %v3892_v1  ;;  %vm592_vm8 = vcmp.eq.s32.totalorder %v3159_v54, %v4895_v15  ;;  %v548_v35 = vsel %vm546_vm7, 1.0, %v4859_v0  ;;  %1117 = vmatpush.msrb.mxu1 %v82_v28 }
  0x80   :  { %v821_v9 = vadd.f32 %v819_v50, %v773_v62  ;;  %v238_v50 = vsel %vm236_vm5, 1.0, %v186_v58  ;;  %v244_v62 = vsel %vm242_vm4, 1.0, %v192_v17  ;;  %vm388_vm5 = vcmp.eq.s32.totalorder %v4882_v20, 5  ;;  %vm3946_vm4 = vmand %vm4835_vm11, %vm592_vm8 }
  0x81   :  { %vm4905_vm8 = vcmp.eq.s32.totalorder %v3159_v54, %v3144_v51 }
  0x82   :  { %v3853_v61 = vadd.f32 %v867_v45, %v821_v9  ;;  %vm3967_vm11 = vmand %vm388_vm5, %vm4905_vm8  ;;  %vm736_vm8 = vcmp.eq.s32.totalorder %v3159_v54, %v3535_v33 }
  0x84   :  { %4881 = vst [vmem:[#allocation25_spill] sm:$0xff] %v3853_v61  ;;  %2564 = vmatmul.msk.f32.gmra.mxu0 %vm4833_vm3, %v3853_v61  ;;  %vm336_vm3 = vcmp.eq.s32.totalorder %v4882_v20, 4 }
  0x85   :  { %vm3938_vm10 = vmand %vm336_vm3, %vm4899_vm2  ;;  %vm4904_vm2 = vcmp.eq.s32.totalorder %v3159_v54, %v3114_v43 }
  0x86   :  { %vm346_vm7 = vmand %vm336_vm3, %vm4904_vm2  ;;  %vm688_vm3 = vcmp.eq.s32.totalorder %v3159_v54, %v3492_v23  ;;  %vm4908_vm2 = vcmp.eq.s32.totalorder %v3159_v54, %v4875_v5 }
  0xe9   :  { %v963_v25 = vpop.f32.mrf.mxu0 }
  0xea   :  { %v969_v27 = vmul.f32 %v963_v25, %v931_v29 }
  0xec   :  { %2565 = vmatmul.msk.f32.vlgmr.msra.gmra.mxu1 %vm4832_vm9, %v969_v27  ;;  %v4154_v27 = vld [vmem:[#allocation9] ss:$0 sm:$0xff] }
  0xed   :  { %1376 = vmatpush.msra.mxu1 %v3862_v55 }
  0xef   :  { %1377 = vmatpush.msra.mxu1 %v3872_v16 }
  0xf1   :  { %1378 = vmatpush.msra.mxu1 %v3892_v1 }
  0xf3   :  { %v1024_v46 = vpop.f32.mrf.mxu2 }
  0xfb   :  { %v1027_v11 = vpop.f32.mrf.mxu2 }
 0x101   :  { %v966_v12 = vpop.f32.mrf.mxu0 }
 0x102   :  { %v970_v53 = vmul.f32 %v966_v12, %v932_v56  ;;  %v596_v56 = vsel %vm3946_vm4, 1.0, %v548_v35  ;;  %vm3986_vm4 = vmand %vm388_vm5, %vm4908_vm2  ;;  %vm735_vm5 = vcmp.eq.s32.totalorder %v2946_v2, 12 }
 0x104   :  { %2566 = vmatmul.msk.f32.gmra.mxu1 %vm4832_vm9, %v970_v53  ;;  %vm4892_vm9 = vcmp.eq.s32.totalorder %v3159_v54, %v3053_v26  ;;  %v2625_v53 = vld [vmem:[#allocation9 + $0x1] ss:$0 sm:$0xff] }
 0x105   :  { %vm3914_vm15 = vmand %vm284_vm13, %vm4892_vm9 }
 0x106   :  { %vm3929_vm9 = vmand %vm284_vm13, %vm4896_vm0  ;;  %vm639_vm13 = vcmp.eq.s32.totalorder %v2946_v2, 10  ;;  %vm640_vm0 = vcmp.eq.s32.totalorder %v3159_v54, %v3420_v40  ;;  %v290_v29 = vsel %vm3914_vm15, 1.0, %v238_v50  ;;  %vm440_vm15 = vcmp.eq.s32.totalorder %v4882_v20, 6 }
 0x107   :  { %v296_v25 = vsel %vm3929_vm9, 1.0, %v244_v62  ;;  %vm642_vm9 = vmand %vm639_vm13, %vm640_vm0  ;;  %v342_v44 = vsel %vm3938_vm10, 1.0, %v290_v29  ;;  %vm492_vm10 = vcmp.eq.s32.totalorder %v4882_v20, 7 }
 0x108   :  { %v348_v19 = vsel %vm346_vm7, 1.0, %v296_v25  ;;  %vm3995_vm0 = vmand %vm440_vm15, %vm443_vm6  ;;  %v644_v47 = vsel %vm642_vm9, 1.0, %v596_v56  ;;  %v394_v17 = vsel %vm3967_vm11, 1.0, %v342_v44 }
 0x109   :  { %vm4002_vm7 = vmand %vm687_vm14, %vm688_vm3  ;;  %vm783_vm3 = vcmp.eq.s32.totalorder %v2946_v2, 13  ;;  %v446_v9 = vsel %vm3995_vm0, 1.0, %v394_v17  ;;  %vm832_vm0 = vcmp.eq.s32.totalorder %v3159_v54, %v4873_v63 }
 0x10a   :  { %vm450_vm6 = vmand %vm440_vm15, %vm449_vm1  ;;  %v692_v45 = vsel %vm4002_vm7, 1.0, %v644_v47  ;;  %vm784_vm1 = vcmp.eq.s32.totalorder %v3159_v54, %v3545_v52 }
 0x10b   :  { %vm4023_vm9 = vmand %vm492_vm10, %vm495_vm12  ;;  %vm4917_vm12 = vcmp.eq.s32.totalorder %v3159_v54, %v3264_v24 }
 0x10c   :  { %vm738_vm11 = vmand %vm735_vm5, %vm736_vm8 }
 0x10d   :  { %vm4041_vm15 = vmand %vm492_vm10, %vm4917_vm12  ;;  %v740_v25 = vsel %vm738_vm11, 1.0, %v692_v45  ;;  %vm4922_vm10 = vcmask 1043456   ;;  %vm880_vm11 = vcmp.eq.s32.totalorder %v3159_v54, %v3586_v32 }
 0x10e   :  { %vm4049_vm2 = vmand %vm783_vm3, %vm784_vm1  ;;  %vm4924_vm1 = vcmask 97280  }
 0x10f   :  { %vm4923_vm7 = vmmov %vm4922_vm10 }
 0x169   :  { %v995_v59 = vpop.f32.mrf.mxu1 }
 0x16a   :  { %v1025_v12 = vadd.f32 %v1024_v46, %v995_v59  ;;  %v400_v59 = vsel %vm3986_vm4, 1.0, %v348_v19  ;;  %vm831_vm4 = vcmp.eq.s32.totalorder %v2946_v2, 14 }
 0x16b   :  { %v452_v35 = vsel %vm450_vm6, 1.0, %v400_v59  ;;  %vm834_vm8 = vmand %vm831_vm4, %vm832_vm0  ;;  %vm879_vm6 = vcmp.eq.s32.totalorder %v2946_v2, 15  ;;  %vm4928_vm0 = vcmp.eq.s32.totalorder %v2946_v2, 8 }
 0x16c   :  { %v1031_v38 = vadd.f32 %v2625_v53, %v1025_v12  ;;  %v498_v12 = vsel %vm4023_vm9, 1.0, %v446_v9  ;;  %vm4925_vm9 = vmmov %vm4924_vm1 }
 0x16d   :  { %vm882_vm12 = vmand %vm879_vm6, %vm880_vm11 }
 0x16e   :  { %v4056_v56 = vmax.f32 %v1031_v38, 0.0 }
 0x181   :  { %v998_v34 = vpop.f32.mrf.mxu1 }
 0x182   :  { %v1028_v58 = vadd.f32 %v1027_v11, %v998_v34  ;;  %v788_v11 = vsel %vm4049_vm2, 1.0, %v740_v25  ;;  %vm549_vm2 = vcmp.eq.s32.totalorder %v3159_v54, %v4927_v41  ;;  %v4092_v34 = vld [vmem:[#allocation7 + $0x40] sm:$0xff] }
 0x183   :  { %v836_v44 = vsel %vm834_vm8, 1.0, %v788_v11  ;;  %vm4929_vm8 = vcmp.eq.s32.totalorder %v2946_v2, 9  ;;  %1449 = vmatpush.msra.mxu2 %v4092_v34  ;;  %1379 = vmatpush.msra.mxu1 %v4092_v34 }
 0x184   :  { %v1032_v62 = vadd.f32 %v2625_v53, %v1028_v58  ;;  %v504_v53 = vsel %vm4041_vm15, 1.0, %v452_v35  ;;  %v884_v19 = vsel %vm882_vm12, 1.0, %v836_v44  ;;  %vm4926_vm15 = vmmov %vm4924_vm1  ;;  %vm741_vm12 = vcmp.eq.s32.totalorder %v3159_v54, %v3542_v42 }
 0x186   :  { %v4045_v29 = vmax.f32 %v1032_v62, 0.0 }
 0x188   :  { %2569 = vmatpush.msk.msra.mxu3 %vm4922_vm10, %v4045_v29  ;;  %2572 = vmatpush.msk.msrb.mxu0 %vm4923_vm7, %v4045_v29  ;;  %vm551_vm10 = vmand %vm4928_vm0, %vm549_vm2  ;;  %vm597_vm7 = vcmp.eq.s32.totalorder %v3159_v54, %v3370_v57  ;;  %vm789_vm2 = vcmp.eq.s32.totalorder %v3159_v54, %v3558_v36 }
 0x189   :  { %v553_v47 = vsel %vm551_vm10, 1.0, %v4859_v0  ;;  %vm599_vm11 = vmand %vm4929_vm8, %vm597_vm7  ;;  %vm837_vm10 = vcmp.eq.s32.totalorder %v3159_v54, %v3583_v13  ;;  %vm885_vm7 = vcmp.eq.s32.totalorder %v3159_v54, %v3642_v30 }
 0x18a   :  { %1059 = vmatpush.msra.mxu3 %v4056_v56  ;;  %1088 = vmatpush.msrb.mxu0 %v4056_v56  ;;  %v601_v46 = vsel %vm599_vm11, 1.0, %v553_v47  ;;  %vm839_vm8 = vmand %vm831_vm4, %vm837_vm10  ;;  %vm4931_vm4 = vcmask 130048  }
 0x18b   :  { %2570 = vmatmul.msk.f32.vlgmr.msra.gmra.mxu3 %vm4924_vm1, %v498_v12  ;;  %2573 = vmatmul.msk.f32.vlgmr.msrb.gmra.mxu0 %vm4925_vm9, %v504_v53  ;;  %vm645_vm1 = vcmp.eq.s32.totalorder %v3159_v54, %v3471_v49  ;;  %vm693_vm9 = vcmp.eq.s32.totalorder %v3159_v54, %v3514_v22  ;;  %vm4933_vm11 = vmmov %vm4931_vm4 }
 0x18c   :  { %1173 = vmatpush.msrb.mxu3 %v3862_v55  ;;  %1306 = vmatpush.msra.mxu0 %v3862_v55  ;;  %vm695_vm0 = vmand %vm687_vm14, %vm693_vm9 }
 0x18d   :  { %vm791_vm14 = vmand %vm783_vm3, %vm789_vm2  ;;  %vm4930_vm3 = vcmask 97280  }
 0x18e   :  { %1174 = vmatpush.msrb.mxu3 %v3872_v16  ;;  %1307 = vmatpush.msra.mxu0 %v3872_v16 }
 0x190   :  { %1175 = vmatpush.msrb.mxu3 %v3892_v1  ;;  %1308 = vmatpush.msra.mxu0 %v3892_v1 }
 0x192   :  { %1176 = vmatpush.msrb.mxu3 %v4092_v34  ;;  %1309 = vmatpush.msra.mxu0 %v4092_v34 }
 0x193   :  { %2571 = vmatmul.msk.f32.gmra.mxu3 %vm4926_vm15, %v884_v19  ;;  %vm647_vm15 = vmand %vm639_vm13, %vm645_vm1 }
 0x194   :  { %v649_v58 = vsel %vm647_vm15, 1.0, %v601_v46  ;;  %vm743_vm13 = vmand %vm735_vm5, %vm741_vm12  ;;  %1236 = vmatpush.msra.mxu3 %v3862_v55  ;;  %1586 = vmatpush.msrb.mxu0 %v3862_v55 }
 0x195   :  { %v697_v17 = vsel %vm695_vm0, 1.0, %v649_v58  ;;  %vm887_vm5 = vmand %vm879_vm6, %vm885_vm7  ;;  %vm1157_vm0 = vcmask 261120  }
 0x196   :  { %v745_v59 = vsel %vm743_vm13, 1.0, %v697_v17  ;;  %1237 = vmatpush.msra.mxu3 %v3872_v16  ;;  %1587 = vmatpush.msrb.mxu0 %v3872_v16  ;;  %vm4932_vm6 = vmmov %vm4931_vm4 }
 0x197   :  { %v793_v38 = vsel %vm791_vm14, 1.0, %v745_v59  ;;  %vm4934_vm1 = vmmov %vm4931_vm4 }
 0x198   :  { %v841_v50 = vsel %vm839_vm8, 1.0, %v793_v38  ;;  %1238 = vmatpush.msra.mxu3 %v3892_v1  ;;  %1588 = vmatpush.msrb.mxu0 %v3892_v1 }
 0x199   :  { %v889_v62 = vsel %vm887_vm5, 1.0, %v841_v50 }
 0x19a   :  { %2574 = vmatmul.msk.f32.gmra.mxu0 %vm4930_vm3, %v889_v62  ;;  %1239 = vmatpush.msra.mxu3 %v4092_v34 }
 0x19b   :  { %1177 = vmatmul.f32.vlgmr.msrb.gmra.mxu3 %v4859_v0  ;;  %1589 = vmatpush.msrb.mxu0 %v4092_v34 }
 0x19c   :  { %1516 = vmatpush.msrb.mxu3 %v3862_v55 }
 0x19e   :  { %1517 = vmatpush.msrb.mxu3 %v3872_v16 }
 0x1a0   :  { %1518 = vmatpush.msrb.mxu3 %v3892_v1 }
 0x1a2   :  { %1519 = vmatpush.msrb.mxu3 %v4092_v34 }
 0x208   :  { %v1090_v45 = vpop.f32.mrf.mxu0 }
 0x209   :  { %2575 = vmatmul.msk.f32.vlgmr.msrb.gmra.mxu1 %vm4931_vm4, %v1090_v45 }
 0x20a   :  { %1656 = vmatpush.msrb.mxu1 %v3862_v55 }
 0x20c   :  { %1657 = vmatpush.msrb.mxu1 %v3872_v16 }
 0x20e   :  { %v1061_v9 = vpop.f32.mrf.mxu3  ;;  %1658 = vmatpush.msrb.mxu1 %v3892_v1 }
 0x20f   :  { %2577 = vmatmul.msk.f32.vlgmr.msrb.gmra.mxu2 %vm4932_vm6, %v1061_v9 }
 0x210   :  { %1659 = vmatpush.msrb.mxu1 %v4092_v34  ;;  %1726 = vmatpush.msrb.mxu2 %v3862_v55 }
 0x212   :  { %1727 = vmatpush.msrb.mxu2 %v3872_v16 }
 0x214   :  { %1728 = vmatpush.msrb.mxu2 %v3892_v1 }
 0x216   :  { %v1064_v35 = vpop.f32.mrf.mxu3  ;;  %1729 = vmatpush.msrb.mxu2 %v4092_v34 }
 0x217   :  { %2578 = vmatmul.msk.f32.gmra.mxu2 %vm4933_vm11, %v1064_v35  ;;  %v1093_v48 = vpop.f32.mrf.mxu0 }
 0x218   :  { %2576 = vmatmul.msk.f32.gmra.mxu1 %vm4934_vm1, %v1093_v48 }
 0x21e   :  { %v1178_v11 = vpop.f32.mrf.mxu3 }
 0x286   :  { %v1119_v25 = vpop.f32.mrf.mxu1 }
 0x292   :  { %v1148_v12 = vpop.f32.mrf.mxu2 }
 0x293   :  { %v1149_v53 = vadd.f32 %v1148_v12, %v1119_v25 }
 0x295   :  { %v4157_v44 = vadd.f32 %v4154_v27, %v1149_v53 }
 0x297   :  { %v1181_v19 = vadd.f32 %v1178_v11, %v4157_v44 }
 0x299   :  { %2635 = vtanh.f32 %v1181_v19  ;;  %v2579_v47 = vmul.f32 -1.442695, %v1181_v19 }
 0x29b   :  { %2637 = vpow2.f32 %v2579_v47 }
 0x29f   :  { %v2636_v28 = vpop.eup %2635 }
 0x2a0   :  { %1204 = vrot.lane.b32.xlu0 %v2636_v28, %s2898_s24 }
 0x2a1   :  { %v2638_v46 = vpop.eup %2637 }
 0x2a2   :  { %v1185_v58 = vadd.f32 1.0, %v2638_v46 }
 0x2a4   :  { %2639 = vrcp.f32 %v1185_v58  ;;  %v1197_v45 = vand.u32 2147483648, %v1185_v58  ;;  %vm1191_vm12 = vweird.f32 %v1185_v58  ;;  %v1195_v9 = vand.u32 2147483647, %v1185_v58 }
 0x2a6   :  { %v1198_v48 = vor.u32 1.1754944e-38, %v1197_v45  ;;  %vm1196_vm2 = vcmp.eq.f32.partialorder %v1195_v9, 8.507059e+37 }
 0x2aa   :  { %v2640_v17 = vpop.eup %2639 }
 0x2ab   :  { %v1187_v59 = vmul.f32 %v2640_v17, %v1185_v58  ;;  %vm1192_vm9 = vweird.f32 %v2640_v17 }
 0x2ac   :  { %vm1193_vm15 = vmor %vm1191_vm12, %vm1192_vm9 }
 0x2ad   :  { %v1188_v38 = vsub.f32 1.0, %v1187_v59 }
 0x2af   :  { %v1189_v50 = vmul.f32 %v2640_v17, %v1188_v38 }
 0x2b1   :  { %v1190_v62 = vadd.f32 %v2640_v17, %v1189_v50 }
 0x2b3   :  { %v1194_v35 = vsel %vm1193_vm15, %v2640_v17, %v1190_v62 }
 0x2b4   :  { %v1199_v12 = vsel %vm1196_vm2, %v1198_v48, %v1194_v35 }
 0x2b5   :  { %v1202_v11 = vmul.f32 0.0, %v1199_v12 }
 0x312   :  { %v1205_v25 = vpop.permute.xlu0 %1204 }
 0x313   :  { %v1207_v53 = vmul.f32 %v1205_v25, %v1199_v12 }
 0x315   :  { %1209 = vrot.lane.b32.xlu0 %v1207_v53, %s2898_s24 }
 0x387   :  { %v1210_v19 = vpop.permute.xlu0 %1209 }
 0x388   :  { %v1212_v28 = vadd.f32 %v1210_v19, %v1202_v11 }
 0x38a   :  { %2641 = vtanh.f32 %v1212_v28 }
 0x390   :  { %v2642_v47 = vpop.eup %2641 }
 0x391   :  { %1215 = vrot.lane.b32.xlu1 %v2642_v47, %s2898_s24 }
 0x403   :  { %v1216_v46 = vpop.permute.xlu1 %1215 }
 0x404   :  { %v1218_v59 = vmul.f32 %v1216_v46, %v1199_v12 }
 0x406   :  { %1220 = vrot.lane.b32.xlu1 %v1218_v59, %s2899_s25 }
 0x478   :  { %v1221_v58 = vpop.permute.xlu1 %1220 }
 0x479   :  { %2580 = vmatmul.msk.f32.vlgmr.msra.gmra.mxu3 %vm1157_vm0, %v1221_v58 }
 0x47a   :  { %1792 = vmatpush.msra.mxu3 %v3862_v55 }
 0x47c   :  { %1793 = vmatpush.msra.mxu3 %v3872_v16 }
 0x47e   :  { %1794 = vmatpush.msra.mxu3 %v3892_v1 }
 0x480   :  { %1795 = vmatpush.msra.mxu3 %v4092_v34 }
 0x4fc   :  { %v1241_v17 = vpop.f32.mrf.mxu3 }
 0x4fd   :  { %v1245_v38 = vrot.slane %v1241_v17, 7 }
 0x4ff   :  { %v1247_v50 = vadd.f32 %v1245_v38, %v4157_v44 }
 0x501   :  { %2643 = vtanh.f32 %v1247_v50  ;;  %v2581_v45 = vmul.f32 -1.442695, %v1247_v50  ;;  %v1269_v50 = vrot.slane %v1212_v28, 7 }
 0x503   :  { %2645 = vpow2.f32 %v2581_v45 }
 0x507   :  { %v2644_v62 = vpop.eup %2643 }
 0x508   :  { %1273 = vrot.lane.b32.xlu2 %v2644_v62, %s2898_s24 }
 0x509   :  { %v2646_v9 = vpop.eup %2645 }
 0x50a   :  { %v1251_v35 = vadd.f32 1.0, %v2646_v9 }
 0x50c   :  { %2647 = vrcp.f32 %v1251_v35  ;;  %v1263_v19 = vand.u32 2147483648, %v1251_v35  ;;  %vm1257_vm13 = vweird.f32 %v1251_v35  ;;  %v1261_v47 = vand.u32 2147483647, %v1251_v35 }
 0x50e   :  { %v1264_v59 = vor.u32 1.1754944e-38, %v1263_v19  ;;  %vm1262_vm14 = vcmp.eq.f32.partialorder %v1261_v47, 8.507059e+37 }
 0x512   :  { %v2648_v48 = vpop.eup %2647 }
 0x513   :  { %v1253_v25 = vmul.f32 %v2648_v48, %v1251_v35  ;;  %vm1258_vm10 = vweird.f32 %v2648_v48 }
 0x514   :  { %vm1259_vm7 = vmor %vm1257_vm13, %vm1258_vm10 }
 0x515   :  { %v1254_v12 = vsub.f32 1.0, %v1253_v25 }
 0x517   :  { %v1255_v53 = vmul.f32 %v2648_v48, %v1254_v12 }
 0x519   :  { %v1256_v11 = vadd.f32 %v2648_v48, %v1255_v53 }
 0x51b   :  { %v1260_v46 = vsel %vm1259_vm7, %v2648_v48, %v1256_v11 }
 0x51c   :  { %v1265_v17 = vsel %vm1262_vm14, %v1264_v59, %v1260_v46 }
 0x51d   :  { %v1271_v62 = vmul.f32 %v1269_v50, %v1265_v17 }
 0x562   :  { %v1274_v58 = vpop.permute.xlu2 %1273 }
 0x563   :  { %v1276_v38 = vmul.f32 %v1274_v58, %v1265_v17 }
 0x565   :  { %1278 = vrot.lane.b32.xlu2 %v1276_v38, %s2898_s24 }
 0x5bf   :  { %v1279_v45 = vpop.permute.xlu2 %1278 }
 0x5c0   :  { %v1281_v9 = vadd.f32 %v1279_v45, %v1271_v62 }
 0x5c2   :  { %2649 = vtanh.f32 %v1281_v9 }
 0x5c8   :  { %v2650_v25 = vpop.eup %2649 }
 0x5c9   :  { %1284 = vrot.lane.b32.xlu0 %v2650_v25, %s2898_s24 }
 0x63b   :  { %v1285_v12 = vpop.permute.xlu0 %1284 }
 0x63c   :  { %v1287_v53 = vmul.f32 %v1285_v12, %v1265_v17 }
 0x63e   :  { %v1289_v35 = vrot.slane %v1287_v53, 1 }
 0x640   :  { %1290 = vrot.lane.b32.xlu1 %v1289_v35, %s2899_s25 }
 0x6b2   :  { %v1291_v48 = vpop.permute.xlu1 %1290 }
 0x6b3   :  { %2582 = vmatmul.msk.f32.vlgmr.msra.gmra.mxu0 %vm1157_vm0, %v1291_v48 }
 0x6b4   :  { %1862 = vmatpush.msra.mxu0 %v3862_v55 }
 0x6b6   :  { %1863 = vmatpush.msra.mxu0 %v3872_v16 }
 0x6b8   :  { %1864 = vmatpush.msra.mxu0 %v3892_v1 }
 0x6ba   :  { %1865 = vmatpush.msra.mxu0 %v4092_v34 }
 0x730   :  { %v1311_v28 = vpop.f32.mrf.mxu0 }
 0x731   :  { %v1315_v11 = vrot.slane %v1311_v28, 6 }
 0x733   :  { %v1317_v19 = vadd.f32 %v1315_v11, %v4157_v44 }
 0x735   :  { %2651 = vtanh.f32 %v1317_v19  ;;  %v2583_v46 = vmul.f32 -1.442695, %v1317_v19  ;;  %v1339_v19 = vrot.slane %v1281_v9, 7  ;;  %v4189_v9 = vpop.f32.mrf.mxu1 }
 0x737   :  { %2653 = vpow2.f32 %v2583_v46 }
 0x73b   :  { %v2652_v47 = vpop.eup %2651 }
 0x73c   :  { %1343 = vrot.lane.b32.xlu2 %v2652_v47, %s2898_s24 }
 0x73d   :  { %v2654_v59 = vpop.eup %2653 }
 0x73e   :  { %v1321_v58 = vadd.f32 1.0, %v2654_v59 }
 0x740   :  { %2655 = vrcp.f32 %v1321_v58  ;;  %v1333_v25 = vand.u32 2147483648, %v1321_v58  ;;  %vm1327_vm5 = vweird.f32 %v1321_v58  ;;  %v1331_v12 = vand.u32 2147483647, %v1321_v58 }
 0x742   :  { %v1334_v35 = vor.u32 1.1754944e-38, %v1333_v25  ;;  %vm1332_vm4 = vcmp.eq.f32.partialorder %v1331_v12, 8.507059e+37 }
 0x746   :  { %v2656_v17 = vpop.eup %2655 }
 0x747   :  { %v1323_v38 = vmul.f32 %v2656_v17, %v1321_v58  ;;  %vm1328_vm8 = vweird.f32 %v2656_v17 }
 0x748   :  { %vm1329_vm3 = vmor %vm1327_vm5, %vm1328_vm8 }
 0x749   :  { %v1324_v50 = vsub.f32 1.0, %v1323_v38 }
 0x74b   :  { %v1325_v62 = vmul.f32 %v2656_v17, %v1324_v50 }
 0x74d   :  { %v1326_v45 = vadd.f32 %v2656_v17, %v1325_v62 }
 0x74f   :  { %v1330_v53 = vsel %vm1329_vm3, %v2656_v17, %v1326_v45 }
 0x750   :  { %v1335_v28 = vsel %vm1332_vm4, %v1334_v35, %v1330_v53 }
 0x751   :  { %v1341_v47 = vmul.f32 %v1339_v19, %v1335_v28 }
 0x796   :  { %v1344_v48 = vpop.permute.xlu2 %1343 }
 0x797   :  { %v1346_v11 = vmul.f32 %v1344_v48, %v1335_v28 }
 0x799   :  { %1348 = vrot.lane.b32.xlu0 %v1346_v11, %s2898_s24 }
 0x80b   :  { %v1349_v46 = vpop.permute.xlu0 %1348 }
 0x80c   :  { %v1351_v59 = vadd.f32 %v1349_v46, %v1341_v47 }
 0x80e   :  { %2657 = vtanh.f32 %v1351_v59 }
 0x814   :  { %v2658_v38 = vpop.eup %2657 }
 0x815   :  { %1354 = vrot.lane.b32.xlu1 %v2658_v38, %s2898_s24 }
 0x887   :  { %v1355_v50 = vpop.permute.xlu1 %1354 }
 0x888   :  { %v1357_v62 = vmul.f32 %v1355_v50, %v1335_v28 }
 0x88a   :  { %v1359_v58 = vrot.slane %v1357_v62, 2 }
 0x88c   :  { %1360 = vrot.lane.b32.xlu2 %v1359_v58, %s2899_s25 }
 0x8e6   :  { %v1361_v17 = vpop.permute.xlu2 %1360 }
 0x8e7   :  { %2584 = vmatmul.msk.f32.vlgmr.msra.gmra.mxu1 %vm1157_vm0, %v1361_v17 }
 0x8e8   :  { %1932 = vmatpush.msra.mxu1 %v3862_v55 }
 0x8ea   :  { %1933 = vmatpush.msra.mxu1 %v3872_v16 }
 0x8ec   :  { %1934 = vmatpush.msra.mxu1 %v3892_v1 }
 0x8ee   :  { %1935 = vmatpush.msra.mxu1 %v4092_v34 }
 0x964   :  { %v1381_v45 = vpop.f32.mrf.mxu1 }
 0x965   :  { %v1385_v25 = vrot.slane %v1381_v45, 5 }
 0x967   :  { %v1387_v12 = vadd.f32 %v1385_v25, %v4157_v44 }
 0x969   :  { %2659 = vtanh.f32 %v1387_v12  ;;  %v2585_v35 = vmul.f32 -1.442695, %v1387_v12 }
 0x96b   :  { %2661 = vpow2.f32 %v2585_v35 }
 0x96f   :  { %v2660_v53 = vpop.eup %2659 }
 0x970   :  { %1413 = vrot.lane.b32.xlu0 %v2660_v53, %s2898_s24  ;;  %v1409_v53 = vrot.slane %v1351_v59, 7  ;;  %v4201_v59 = vpop.f32.mrf.mxu2 }
 0x971   :  { %v2662_v48 = vpop.eup %2661 }
 0x972   :  { %v1391_v28 = vadd.f32 1.0, %v2662_v48 }
 0x974   :  { %2663 = vrcp.f32 %v1391_v28  ;;  %v1403_v50 = vand.u32 2147483648, %v1391_v28  ;;  %vm1397_vm11 = vweird.f32 %v1391_v28  ;;  %v1401_v62 = vand.u32 2147483647, %v1391_v28 }
 0x976   :  { %v1404_v17 = vor.u32 1.1754944e-38, %v1403_v50  ;;  %vm1402_vm9 = vcmp.eq.f32.partialorder %v1401_v62, 8.507059e+37 }
 0x97a   :  { %v2664_v11 = vpop.eup %2663 }
 0x97b   :  { %v1393_v19 = vmul.f32 %v2664_v11, %v1391_v28  ;;  %vm1398_vm6 = vweird.f32 %v2664_v11 }
 0x97c   :  { %vm1399_vm1 = vmor %vm1397_vm11, %vm1398_vm6 }
 0x97d   :  { %v1394_v47 = vsub.f32 1.0, %v1393_v19 }
 0x97f   :  { %v1395_v46 = vmul.f32 %v2664_v11, %v1394_v47 }
 0x981   :  { %v1396_v38 = vadd.f32 %v2664_v11, %v1395_v46 }
 0x983   :  { %v1400_v58 = vsel %vm1399_vm1, %v2664_v11, %v1396_v38 }
 0x984   :  { %v1405_v25 = vsel %vm1402_vm9, %v1404_v17, %v1400_v58 }
 0x985   :  { %v1411_v35 = vmul.f32 %v1409_v53, %v1405_v25 }
 0x9e2   :  { %v1414_v45 = vpop.permute.xlu0 %1413 }
 0x9e3   :  { %v1416_v12 = vmul.f32 %v1414_v45, %v1405_v25 }
 0x9e5   :  { %1418 = vrot.lane.b32.xlu1 %v1416_v12, %s2898_s24 }
 0xa57   :  { %v1419_v48 = vpop.permute.xlu1 %1418 }
 0xa58   :  { %v1421_v61 = vadd.f32 %v1419_v48, %v1411_v35 }
 0xa5a   :  { %2665 = vtanh.f32 %v1421_v61 }
 0xa60   :  { %v2666_v19 = vpop.eup %2665 }
 0xa61   :  { %1424 = vrot.lane.b32.xlu2 %v2666_v19, %s2898_s24 }
 0xabb   :  { %v1425_v47 = vpop.permute.xlu2 %1424 }
 0xabc   :  { %v1427_v46 = vmul.f32 %v1425_v47, %v1405_v25 }
 0xabe   :  { %v1429_v28 = vrot.slane %v1427_v46, 3 }
 0xac0   :  { %1430 = vrot.lane.b32.xlu0 %v1429_v28, %s2899_s25 }
 0xb32   :  { %v1431_v11 = vpop.permute.xlu0 %1430 }
 0xb33   :  { %2586 = vmatmul.msk.f32.vlgmr.msra.gmra.mxu2 %vm1157_vm0, %v1431_v11 }
 0xb34   :  { %2002 = vmatpush.msra.mxu2 %v3862_v55 }
 0xb36   :  { %2003 = vmatpush.msra.mxu2 %v3872_v16 }
 0xb38   :  { %2004 = vmatpush.msra.mxu2 %v3892_v1 }
 0xb3a   :  { %2005 = vmatpush.msra.mxu2 %v4092_v34 }
 0xbb6   :  { %v1451_v38 = vpop.f32.mrf.mxu2 }
 0xbb7   :  { %v1455_v50 = vrot.slane %v1451_v38, 4 }
 0xbb9   :  { %v1457_v62 = vadd.f32 %v1455_v50, %v4157_v44 }
 0xbbb   :  { %2667 = vtanh.f32 %v1457_v62  ;;  %v2587_v17 = vmul.f32 -1.442695, %v1457_v62 }
 0xbbd   :  { %2669 = vpow2.f32 %v2587_v17 }
 0xbc1   :  { %v2668_v58 = vpop.eup %2667 }
 0xbc2   :  { %1483 = vrot.lane.b32.xlu1 %v2668_v58, %s2898_s24  ;;  %v1479_v58 = vrot.slane %v1421_v61, 7 }
 0xbc3   :  { %v2670_v45 = vpop.eup %2669 }
 0xbc4   :  { %v1461_v25 = vadd.f32 1.0, %v2670_v45 }
 0xbc6   :  { %2671 = vrcp.f32 %v1461_v25  ;;  %v1473_v47 = vand.u32 2147483648, %v1461_v25  ;;  %vm1467_vm15 = vweird.f32 %v1461_v25  ;;  %v1471_v46 = vand.u32 2147483647, %v1461_v25 }
 0xbc8   :  { %v1474_v11 = vor.u32 1.1754944e-38, %v1473_v47  ;;  %vm1472_vm10 = vcmp.eq.f32.partialorder %v1471_v46, 8.507059e+37 }
 0xbcc   :  { %v2672_v12 = vpop.eup %2671 }
 0xbcd   :  { %v1463_v53 = vmul.f32 %v2672_v12, %v1461_v25  ;;  %vm1468_vm12 = vweird.f32 %v2672_v12 }
 0xbce   :  { %vm1469_vm2 = vmor %vm1467_vm15, %vm1468_vm12 }
 0xbcf   :  { %v1464_v35 = vsub.f32 1.0, %v1463_v53 }
 0xbd1   :  { %v1465_v48 = vmul.f32 %v2672_v12, %v1464_v35 }
 0xbd3   :  { %v1466_v19 = vadd.f32 %v2672_v12, %v1465_v48 }
 0xbd5   :  { %v1470_v28 = vsel %vm1469_vm2, %v2672_v12, %v1466_v19 }
 0xbd6   :  { %v1475_v50 = vsel %vm1472_vm10, %v1474_v11, %v1470_v28 }
 0xbd7   :  { %v1481_v17 = vmul.f32 %v1479_v58, %v1475_v50 }
 0xc34   :  { %v1484_v38 = vpop.permute.xlu1 %1483 }
 0xc35   :  { %v1486_v62 = vmul.f32 %v1484_v38, %v1475_v50 }
 0xc37   :  { %1488 = vrot.lane.b32.xlu2 %v1486_v62, %s2898_s24 }
 0xc91   :  { %v1489_v45 = vpop.permute.xlu2 %1488 }
 0xc92   :  { %v1491_v37 = vadd.f32 %v1489_v45, %v1481_v17 }
 0xc94   :  { %2673 = vtanh.f32 %v1491_v37 }
 0xc9a   :  { %v2674_v53 = vpop.eup %2673 }
 0xc9b   :  { %1494 = vrot.lane.b32.xlu0 %v2674_v53, %s2898_s24 }
 0xd0d   :  { %v1495_v35 = vpop.permute.xlu0 %1494 }
 0xd0e   :  { %v1497_v48 = vmul.f32 %v1495_v35, %v1475_v50 }
 0xd10   :  { %v1499_v25 = vrot.slane %v1497_v48, 4 }
 0xd12   :  { %1500 = vrot.lane.b32.xlu1 %v1499_v25, %s2899_s25 }
 0xd84   :  { %v1501_v12 = vpop.permute.xlu1 %1500 }
 0xd85   :  { %2588 = vmatmul.msk.f32.vlgmr.msrb.gmra.mxu3 %vm1157_vm0, %v1501_v12 }
 0xd86   :  { %2072 = vmatpush.msrb.mxu3 %v3862_v55 }
 0xd88   :  { %2073 = vmatpush.msrb.mxu3 %v3872_v16 }
 0xd8a   :  { %2074 = vmatpush.msrb.mxu3 %v3892_v1 }
 0xd8c   :  { %2075 = vmatpush.msrb.mxu3 %v4092_v34 }
 0xe08   :  { %v1521_v61 = vpop.f32.mrf.mxu3 }
 0xe09   :  { %v1525_v19 = vrot.slane %v1521_v61, 3 }
 0xe0b   :  { %v1527_v47 = vadd.f32 %v1525_v19, %v4157_v44 }
 0xe0d   :  { %2675 = vtanh.f32 %v1527_v47  ;;  %v2589_v28 = vmul.f32 -1.442695, %v1527_v47  ;;  %v1549_v47 = vrot.slane %v1491_v37, 7 }
 0xe0f   :  { %2677 = vpow2.f32 %v2589_v28 }
 0xe13   :  { %v2676_v46 = vpop.eup %2675 }
 0xe14   :  { %1553 = vrot.lane.b32.xlu2 %v2676_v46, %s2898_s24 }
 0xe15   :  { %v2678_v11 = vpop.eup %2677 }
 0xe16   :  { %v1531_v38 = vadd.f32 1.0, %v2678_v11 }
 0xe18   :  { %2679 = vrcp.f32 %v1531_v38  ;;  %v1543_v53 = vand.u32 2147483648, %v1531_v38  ;;  %vm1537_vm7 = vweird.f32 %v1531_v38  ;;  %v1541_v35 = vand.u32 2147483647, %v1531_v38 }
 0xe1a   :  { %v1544_v25 = vor.u32 1.1754944e-38, %v1543_v53  ;;  %vm1542_vm8 = vcmp.eq.f32.partialorder %v1541_v35, 8.507059e+37 }
 0xe1e   :  { %v2680_v50 = vpop.eup %2679 }
 0xe1f   :  { %v1533_v62 = vmul.f32 %v2680_v50, %v1531_v38  ;;  %vm1538_vm13 = vweird.f32 %v2680_v50 }
 0xe20   :  { %vm1539_vm14 = vmor %vm1537_vm7, %vm1538_vm13 }
 0xe21   :  { %v1534_v58 = vsub.f32 1.0, %v1533_v62 }
 0xe23   :  { %v1535_v17 = vmul.f32 %v2680_v50, %v1534_v58 }
 0xe25   :  { %v1536_v45 = vadd.f32 %v2680_v50, %v1535_v17 }
 0xe27   :  { %v1540_v48 = vsel %vm1539_vm14, %v2680_v50, %v1536_v45 }
 0xe28   :  { %v1545_v61 = vsel %vm1542_vm8, %v1544_v25, %v1540_v48 }
 0xe29   :  { %v1551_v46 = vmul.f32 %v1549_v47, %v1545_v61 }
 0xe6e   :  { %v1554_v12 = vpop.permute.xlu2 %1553 }
 0xe6f   :  { %v1556_v19 = vmul.f32 %v1554_v12, %v1545_v61 }
 0xe71   :  { %1558 = vrot.lane.b32.xlu0 %v1556_v19, %s2898_s24 }
 0xee3   :  { %v1559_v28 = vpop.permute.xlu0 %1558 }
 0xee4   :  { %v1561_v11 = vadd.f32 %v1559_v28, %v1551_v46 }
 0xee6   :  { %2681 = vtanh.f32 %v1561_v11 }
 0xeec   :  { %v2682_v62 = vpop.eup %2681 }
 0xeed   :  { %1564 = vrot.lane.b32.xlu1 %v2682_v62, %s2898_s24 }
 0xf5f   :  { %v1565_v58 = vpop.permute.xlu1 %1564 }
 0xf60   :  { %v1567_v17 = vmul.f32 %v1565_v58, %v1545_v61 }
 0xf62   :  { %v1569_v38 = vrot.slane %v1567_v17, 5 }
 0xf64   :  { %1570 = vrot.lane.b32.xlu2 %v1569_v38, %s2899_s25 }
 0xfbe   :  { %v1571_v50 = vpop.permute.xlu2 %1570 }
 0xfbf   :  { %2590 = vmatmul.msk.f32.vlgmr.msrb.gmra.mxu0 %vm1157_vm0, %v1571_v50 }
 0xfc0   :  { %2142 = vmatpush.msrb.mxu0 %v3862_v55 }
 0xfc2   :  { %2143 = vmatpush.msrb.mxu0 %v3872_v16 }
 0xfc4   :  { %2144 = vmatpush.msrb.mxu0 %v3892_v1 }
 0xfc6   :  { %2145 = vmatpush.msrb.mxu0 %v4092_v34 }
0x103c   :  { %v1591_v37 = vpop.f32.mrf.mxu0 }
0x103d   :  { %v1595_v45 = vrot.slane %v1591_v37, 2 }
0x103f   :  { %v1597_v53 = vadd.f32 %v1595_v45, %v4157_v44 }
0x1041   :  { %2683 = vtanh.f32 %v1597_v53  ;;  %v2591_v48 = vmul.f32 -1.442695, %v1597_v53  ;;  %v1619_v53 = vrot.slane %v1561_v11, 7 }
0x1043   :  { %2685 = vpow2.f32 %v2591_v48 }
0x1047   :  { %v2684_v35 = vpop.eup %2683 }
0x1048   :  { %1623 = vrot.lane.b32.xlu0 %v2684_v35, %s2898_s24 }
0x1049   :  { %v2686_v25 = vpop.eup %2685 }
0x104a   :  { %v1601_v12 = vadd.f32 1.0, %v2686_v25 }
0x104c   :  { %2687 = vrcp.f32 %v1601_v12  ;;  %v1613_v62 = vand.u32 2147483648, %v1601_v12  ;;  %vm1607_vm3 = vweird.f32 %v1601_v12  ;;  %v1611_v58 = vand.u32 2147483647, %v1601_v12 }
0x104e   :  { %v1614_v38 = vor.u32 1.1754944e-38, %v1613_v62  ;;  %vm1612_vm6 = vcmp.eq.f32.partialorder %v1611_v58, 8.507059e+37 }
0x1052   :  { %v2688_v61 = vpop.eup %2687 }
0x1053   :  { %v1603_v19 = vmul.f32 %v2688_v61, %v1601_v12  ;;  %vm1608_vm5 = vweird.f32 %v2688_v61 }
0x1054   :  { %vm1609_vm4 = vmor %vm1607_vm3, %vm1608_vm5 }
0x1055   :  { %v1604_v47 = vsub.f32 1.0, %v1603_v19 }
0x1057   :  { %v1605_v46 = vmul.f32 %v2688_v61, %v1604_v47 }
0x1059   :  { %v1606_v28 = vadd.f32 %v2688_v61, %v1605_v46 }
0x105b   :  { %v1610_v17 = vsel %vm1609_vm4, %v2688_v61, %v1606_v28 }
0x105c   :  { %v1615_v37 = vsel %vm1612_vm6, %v1614_v38, %v1610_v17 }
0x105d   :  { %v1621_v35 = vmul.f32 %v1619_v53, %v1615_v37 }
0x10ba   :  { %v1624_v50 = vpop.permute.xlu0 %1623 }
0x10bb   :  { %v1626_v45 = vmul.f32 %v1624_v50, %v1615_v37 }
0x10bd   :  { %1628 = vrot.lane.b32.xlu1 %v1626_v45, %s2898_s24 }
0x112f   :  { %v1629_v48 = vpop.permute.xlu1 %1628 }
0x1130   :  { %v1631_v25 = vadd.f32 %v1629_v48, %v1621_v35 }
0x1132   :  { %2689 = vtanh.f32 %v1631_v25 }
0x1138   :  { %v2690_v19 = vpop.eup %2689 }
0x1139   :  { %1634 = vrot.lane.b32.xlu2 %v2690_v19, %s2898_s24 }
0x1193   :  { %v1635_v47 = vpop.permute.xlu2 %1634 }
0x1194   :  { %v1637_v46 = vmul.f32 %v1635_v47, %v1615_v37 }
0x1196   :  { %v1639_v12 = vrot.slane %v1637_v46, 6  ;;  %v1689_v46 = vrot.slane %v1631_v25, 7 }
0x1198   :  { %1640 = vrot.lane.b32.xlu0 %v1639_v12, %s2899_s25 }
0x120a   :  { %v1641_v61 = vpop.permute.xlu0 %1640 }
0x120b   :  { %2592 = vmatmul.msk.f32.vlgmr.msrb.gmra.mxu1 %vm1157_vm0, %v1641_v61 }
0x120c   :  { %2212 = vmatpush.msrb.mxu1 %v3862_v55 }
0x120e   :  { %2213 = vmatpush.msrb.mxu1 %v3872_v16 }
0x1210   :  { %2214 = vmatpush.msrb.mxu1 %v3892_v1 }
0x1212   :  { %2215 = vmatpush.msrb.mxu1 %v4092_v34 }
0x1288   :  { %v1661_v11 = vpop.f32.mrf.mxu1 }
0x1289   :  { %v1665_v28 = vrot.slane %v1661_v11, 1 }
0x128b   :  { %v1667_v62 = vadd.f32 %v1665_v28, %v4157_v44 }
0x128d   :  { %2691 = vtanh.f32 %v1667_v62  ;;  %v2593_v17 = vmul.f32 -1.442695, %v1667_v62 }
0x128f   :  { %2693 = vpow2.f32 %v2593_v17 }
0x1293   :  { %v2692_v58 = vpop.eup %2691 }
0x1294   :  { %1693 = vrot.lane.b32.xlu1 %v2692_v58, %s2898_s24 }
0x1295   :  { %v2694_v38 = vpop.eup %2693 }
0x1296   :  { %v1671_v50 = vadd.f32 1.0, %v2694_v38 }
0x1298   :  { %2695 = vrcp.f32 %v1671_v50  ;;  %v1683_v34 = vand.u32 2147483648, %v1671_v50  ;;  %vm1677_vm1 = vweird.f32 %v1671_v50  ;;  %v1681_v53 = vand.u32 2147483647, %v1671_v50 }
0x129a   :  { %v1684_v35 = vor.u32 1.1754944e-38, %v1683_v34  ;;  %vm1682_vm12 = vcmp.eq.f32.partialorder %v1681_v53, 8.507059e+37 }
0x129e   :  { %v2696_v55 = vpop.eup %2695 }
0x129f   :  { %v1673_v37 = vmul.f32 %v2696_v55, %v1671_v50  ;;  %vm1678_vm11 = vweird.f32 %v2696_v55  ;;  %v1152_v50 = vadd.f32 %v4201_v59, %v4189_v9 }
0x12a0   :  { %vm1679_vm9 = vmor %vm1677_vm1, %vm1678_vm11 }
0x12a1   :  { %v1674_v16 = vsub.f32 1.0, %v1673_v37  ;;  %v4242_v25 = vadd.f32 %v4154_v27, %v1152_v50 }
0x12a3   :  { %v1675_v45 = vmul.f32 %v2696_v55, %v1674_v16 }
0x12a5   :  { %v1676_v1 = vadd.f32 %v2696_v55, %v1675_v45 }
0x12a7   :  { %v1680_v44 = vsel %vm1679_vm9, %v2696_v55, %v1676_v1 }
0x12a8   :  { %v1685_v19 = vsel %vm1682_vm12, %v1684_v35, %v1680_v44 }
0x12a9   :  { %v1691_v12 = vmul.f32 %v1689_v46, %v1685_v19 }
0x1306   :  { %v1694_v48 = vpop.permute.xlu1 %1693 }
0x1307   :  { %v1696_v47 = vmul.f32 %v1694_v48, %v1685_v19 }
0x1309   :  { %1698 = vrot.lane.b32.xlu2 %v1696_v47, %s2898_s24 }
0x1363   :  { %v1699_v61 = vpop.permute.xlu2 %1698 }
0x1364   :  { %v1701_v11 = vadd.f32 %v1699_v61, %v1691_v12 }
0x1366   :  { %2697 = vtanh.f32 %v1701_v11 }
0x136c   :  { %v2698_v28 = vpop.eup %2697 }
0x136d   :  { %1704 = vrot.lane.b32.xlu0 %v2698_v28, %s2898_s24  ;;  %v1756_v28 = vrot.slane %v1701_v11, 7 }
0x13df   :  { %v1705_v62 = vpop.permute.xlu0 %1704 }
0x13e0   :  { %v1707_v58 = vmul.f32 %v1705_v62, %v1685_v19 }
0x13e2   :  { %v1709_v17 = vrot.slane %v1707_v58, 7 }
0x13e4   :  { %1710 = vrot.lane.b32.xlu1 %v1709_v17, %s2899_s25 }
0x1456   :  { %v1711_v38 = vpop.permute.xlu1 %1710 }
0x1457   :  { %2594 = vmatmul.msk.f32.vlgmr.msrb.gmra.mxu2 %vm1157_vm0, %v1711_v38 }
0x14da   :  { %v1731_v55 = vpop.f32.mrf.mxu2 }
0x14db   :  { %v1734_v37 = vadd.f32 %v1731_v55, %v4242_v25 }
0x14dd   :  { %2699 = vtanh.f32 %v1734_v37  ;;  %v2595_v45 = vmul.f32 -1.442695, %v1734_v37 }
0x14df   :  { %2701 = vpow2.f32 %v2595_v45 }
0x14e3   :  { %v2700_v16 = vpop.eup %2699 }
0x14e4   :  { %1760 = vrot.lane.b32.xlu2 %v2700_v16, %s2898_s24 }
0x14e5   :  { %v2702_v1 = vpop.eup %2701 }
0x14e6   :  { %v1738_v34 = vadd.f32 1.0, %v2702_v1 }
0x14e8   :  { %2703 = vrcp.f32 %v1738_v34  ;;  %v1750_v27 = vand.u32 2147483648, %v1738_v34  ;;  %vm1744_vm2 = vweird.f32 %v1738_v34  ;;  %v1748_v59 = vand.u32 2147483647, %v1738_v34 }
0x14ea   :  { %v1751_v47 = vor.u32 1.1754944e-38, %v1750_v27  ;;  %vm1749_vm13 = vcmp.eq.f32.partialorder %v1748_v59, 8.507059e+37 }
0x14ee   :  { %v2704_v53 = vpop.eup %2703 }
0x14ef   :  { %v1740_v44 = vmul.f32 %v2704_v53, %v1738_v34  ;;  %vm1745_vm15 = vweird.f32 %v2704_v53 }
0x14f0   :  { %vm1746_vm10 = vmor %vm1744_vm2, %vm1745_vm15  ;;  %vm4935_vm2 = vcmask 130048  }
0x14f1   :  { %v1741_v35 = vsub.f32 1.0, %v1740_v44 }
0x14f3   :  { %v1742_v48 = vmul.f32 %v2704_v53, %v1741_v35 }
0x14f5   :  { %v1743_v9 = vadd.f32 %v2704_v53, %v1742_v48 }
0x14f7   :  { %v1747_v19 = vsel %vm1746_vm10, %v2704_v53, %v1743_v9  ;;  %vm4936_vm10 = vmmov %vm4935_vm2 }
0x14f8   :  { %v1752_v12 = vsel %vm1749_vm13, %v1751_v47, %v1747_v19 }
0x14f9   :  { %v1758_v62 = vmul.f32 %v1756_v28, %v1752_v12 }
0x153e   :  { %v1761_v46 = vpop.permute.xlu2 %1760 }
0x153f   :  { %v1763_v61 = vmul.f32 %v1761_v46, %v1752_v12 }
0x1541   :  { %1765 = vrot.lane.b32.xlu0 %v1763_v61, %s2898_s24 }
0x15b3   :  { %v1766_v58 = vpop.permute.xlu0 %1765 }
0x15b4   :  { %v1768_v17 = vadd.f32 %v1766_v58, %v1758_v62 }
0x15b6   :  { %2705 = vtanh.f32 %v1768_v17  ;;  %v1825_v58 = vrot.slane %v1768_v17, 7 }
0x15bc   :  { %v2706_v38 = vpop.eup %2705 }
0x15bd   :  { %1771 = vrot.lane.b32.xlu1 %v2706_v38, %s2898_s24 }
0x162f   :  { %v1772_v50 = vpop.permute.xlu1 %1771 }
0x1630   :  { %v1774_v55 = vmul.f32 %v1772_v50, %v1752_v12 }
0x1632   :  { %1776 = vrot.lane.b32.xlu2 %v1774_v55, %s2899_s25 }
0x168c   :  { %v1777_v37 = vpop.permute.xlu2 %1776 }
0x168d   :  { %2596 = vmatmul.msk.f32.vlgmr.msra.gmra.mxu3 %vm1157_vm0, %v1777_v37 }
0x1710   :  { %v1797_v16 = vpop.f32.mrf.mxu3 }
0x1711   :  { %v1801_v45 = vrot.slane %v1797_v16, 7 }
0x1713   :  { %v1803_v1 = vadd.f32 %v1801_v45, %v4242_v25 }
0x1715   :  { %2707 = vtanh.f32 %v1803_v1  ;;  %v2597_v34 = vmul.f32 -1.442695, %v1803_v1 }
0x1717   :  { %2709 = vpow2.f32 %v2597_v34 }
0x171b   :  { %v2708_v11 = vpop.eup %2707 }
0x171c   :  { %1829 = vrot.lane.b32.xlu0 %v2708_v11, %s2898_s24 }
0x171d   :  { %v2710_v53 = vpop.eup %2709 }
0x171e   :  { %v1807_v44 = vadd.f32 1.0, %v2710_v53 }
0x1720   :  { %2711 = vrcp.f32 %v1807_v44  ;;  %v1819_v19 = vand.u32 2147483648, %v1807_v44  ;;  %vm1813_vm14 = vweird.f32 %v1807_v44  ;;  %v1817_v47 = vand.u32 2147483647, %v1807_v44 }
0x1722   :  { %v1820_v12 = vor.u32 1.1754944e-38, %v1819_v19  ;;  %vm1818_vm5 = vcmp.eq.f32.partialorder %v1817_v47, 8.507059e+37 }
0x1726   :  { %v2712_v35 = vpop.eup %2711 }
0x1727   :  { %v1809_v48 = vmul.f32 %v2712_v35, %v1807_v44  ;;  %vm1814_vm7 = vweird.f32 %v2712_v35 }
0x1728   :  { %vm1815_vm8 = vmor %vm1813_vm14, %vm1814_vm7 }
0x1729   :  { %v1810_v9 = vsub.f32 1.0, %v1809_v48 }
0x172b   :  { %v1811_v27 = vmul.f32 %v2712_v35, %v1810_v9 }
0x172d   :  { %v1812_v59 = vadd.f32 %v2712_v35, %v1811_v27 }
0x172f   :  { %v1816_v46 = vsel %vm1815_vm8, %v2712_v35, %v1812_v59 }
0x1730   :  { %v1821_v28 = vsel %vm1818_vm5, %v1820_v12, %v1816_v46 }
0x1731   :  { %v1827_v38 = vmul.f32 %v1825_v58, %v1821_v28 }
0x178e   :  { %v1830_v61 = vpop.permute.xlu0 %1829 }
0x178f   :  { %v1832_v62 = vmul.f32 %v1830_v61, %v1821_v28 }
0x1791   :  { %1834 = vrot.lane.b32.xlu1 %v1832_v62, %s2898_s24 }
0x1803   :  { %v1835_v50 = vpop.permute.xlu1 %1834 }
0x1804   :  { %v1837_v55 = vadd.f32 %v1835_v50, %v1827_v38 }
0x1806   :  { %2713 = vtanh.f32 %v1837_v55 }
0x180c   :  { %v2714_v37 = vpop.eup %2713 }
0x180d   :  { %1840 = vrot.lane.b32.xlu2 %v2714_v37, %s2898_s24  ;;  %v1895_v37 = vrot.slane %v1837_v55, 7 }
0x1867   :  { %v1841_v16 = vpop.permute.xlu2 %1840 }
0x1868   :  { %v1843_v45 = vmul.f32 %v1841_v16, %v1821_v28 }
0x186a   :  { %v1845_v1 = vrot.slane %v1843_v45, 1 }
0x186c   :  { %1846 = vrot.lane.b32.xlu0 %v1845_v1, %s2899_s25 }
0x18de   :  { %v1847_v11 = vpop.permute.xlu0 %1846 }
0x18df   :  { %2598 = vmatmul.msk.f32.vlgmr.msra.gmra.mxu0 %vm1157_vm0, %v1847_v11 }
0x195c   :  { %v1867_v34 = vpop.f32.mrf.mxu0 }
0x195d   :  { %v1871_v53 = vrot.slane %v1867_v34, 6 }
0x195f   :  { %v1873_v44 = vadd.f32 %v1871_v53, %v4242_v25 }
0x1961   :  { %2715 = vtanh.f32 %v1873_v44  ;;  %v2599_v35 = vmul.f32 -1.442695, %v1873_v44 }
0x1963   :  { %2717 = vpow2.f32 %v2599_v35 }
0x1967   :  { %v2716_v17 = vpop.eup %2715 }
0x1968   :  { %1899 = vrot.lane.b32.xlu1 %v2716_v17, %s2898_s24 }
0x1969   :  { %v2718_v48 = vpop.eup %2717 }
0x196a   :  { %v1877_v9 = vadd.f32 1.0, %v2718_v48 }
0x196c   :  { %2719 = vrcp.f32 %v1877_v9  ;;  %v1889_v12 = vand.u32 2147483648, %v1877_v9  ;;  %vm1883_vm4 = vweird.f32 %v1877_v9  ;;  %v1887_v61 = vand.u32 2147483647, %v1877_v9 }
0x196e   :  { %v1890_v62 = vor.u32 1.1754944e-38, %v1889_v12  ;;  %vm1888_vm11 = vcmp.eq.f32.partialorder %v1887_v61, 8.507059e+37 }
0x1972   :  { %v2720_v27 = vpop.eup %2719 }
0x1973   :  { %v1879_v59 = vmul.f32 %v2720_v27, %v1877_v9  ;;  %vm1884_vm3 = vweird.f32 %v2720_v27 }
0x1974   :  { %vm1885_vm6 = vmor %vm1883_vm4, %vm1884_vm3 }
0x1975   :  { %v1880_v19 = vsub.f32 1.0, %v1879_v59 }
0x1977   :  { %v1881_v47 = vmul.f32 %v2720_v27, %v1880_v19 }
0x1979   :  { %v1882_v46 = vadd.f32 %v2720_v27, %v1881_v47 }
0x197b   :  { %v1886_v28 = vsel %vm1885_vm6, %v2720_v27, %v1882_v46 }
0x197c   :  { %v1891_v38 = vsel %vm1888_vm11, %v1890_v62, %v1886_v28 }
0x197d   :  { %v1897_v16 = vmul.f32 %v1895_v37, %v1891_v38 }
0x19da   :  { %v1900_v58 = vpop.permute.xlu1 %1899 }
0x19db   :  { %v1902_v50 = vmul.f32 %v1900_v58, %v1891_v38 }
0x19dd   :  { %1904 = vrot.lane.b32.xlu2 %v1902_v50, %s2898_s24 }
0x1a37   :  { %v1905_v45 = vpop.permute.xlu2 %1904 }
0x1a38   :  { %v1907_v1 = vadd.f32 %v1905_v45, %v1897_v16 }
0x1a3a   :  { %2721 = vtanh.f32 %v1907_v1 }
0x1a40   :  { %v2722_v11 = vpop.eup %2721 }
0x1a41   :  { %1910 = vrot.lane.b32.xlu0 %v2722_v11, %s2898_s24  ;;  %v1965_v11 = vrot.slane %v1907_v1, 7 }
0x1ab3   :  { %v1911_v34 = vpop.permute.xlu0 %1910 }
0x1ab4   :  { %v1913_v53 = vmul.f32 %v1911_v34, %v1891_v38 }
0x1ab6   :  { %v1915_v44 = vrot.slane %v1913_v53, 2 }
0x1ab8   :  { %1916 = vrot.lane.b32.xlu1 %v1915_v44, %s2899_s25 }
0x1b2a   :  { %v1917_v17 = vpop.permute.xlu1 %1916 }
0x1b2b   :  { %2600 = vmatmul.msk.f32.vlgmr.msra.gmra.mxu1 %vm1157_vm0, %v1917_v17 }
0x1ba8   :  { %v1937_v35 = vpop.f32.mrf.mxu1 }
0x1ba9   :  { %v1941_v48 = vrot.slane %v1937_v35, 5 }
0x1bab   :  { %v1943_v9 = vadd.f32 %v1941_v48, %v4242_v25 }
0x1bad   :  { %2723 = vtanh.f32 %v1943_v9  ;;  %v2601_v27 = vmul.f32 -1.442695, %v1943_v9 }
0x1baf   :  { %2725 = vpow2.f32 %v2601_v27  ;;  %v88_v27 = vld [vmem:[#allocation7 + $0x60] sm:$0xff] }
0x1bb3   :  { %v2724_v55 = vpop.eup %2723 }
0x1bb4   :  { %1969 = vrot.lane.b32.xlu2 %v2724_v55, %s2898_s24  ;;  %v89_v55 = vld [vmem:[#allocation7 + $0x68] sm:$0xff] }
0x1bb5   :  { %v2726_v59 = vpop.eup %2725  ;;  %2340 = vmatpush.msrb.mxu2 %v89_v55 }
0x1bb6   :  { %v1947_v19 = vadd.f32 1.0, %v2726_v59 }
0x1bb7   :  { %2341 = vmatpush.msrb.mxu2 %v88_v27 }
0x1bb8   :  { %2727 = vrcp.f32 %v1947_v19  ;;  %v1959_v62 = vand.u32 2147483648, %v1947_v19  ;;  %vm1953_vm9 = vweird.f32 %v1947_v19  ;;  %v1957_v58 = vand.u32 2147483647, %v1947_v19 }
0x1bba   :  { %v1960_v50 = vor.u32 1.1754944e-38, %v1959_v62  ;;  %vm1958_vm15 = vcmp.eq.f32.partialorder %v1957_v58, 8.507059e+37 }
0x1bbe   :  { %v2728_v47 = vpop.eup %2727 }
0x1bbf   :  { %v1949_v46 = vmul.f32 %v2728_v47, %v1947_v19  ;;  %vm1954_vm1 = vweird.f32 %v2728_v47 }
0x1bc0   :  { %vm1955_vm12 = vmor %vm1953_vm9, %vm1954_vm1 }
0x1bc1   :  { %v1950_v12 = vsub.f32 1.0, %v1949_v46 }
0x1bc3   :  { %v1951_v61 = vmul.f32 %v2728_v47, %v1950_v12 }
0x1bc5   :  { %v1952_v28 = vadd.f32 %v2728_v47, %v1951_v61 }
0x1bc7   :  { %v1956_v38 = vsel %vm1955_vm12, %v2728_v47, %v1952_v28 }
0x1bc8   :  { %v1961_v16 = vsel %vm1958_vm15, %v1960_v50, %v1956_v38 }
0x1bc9   :  { %v1967_v34 = vmul.f32 %v1965_v11, %v1961_v16 }
0x1c0e   :  { %v1970_v37 = vpop.permute.xlu2 %1969 }
0x1c0f   :  { %v1972_v45 = vmul.f32 %v1970_v37, %v1961_v16 }
0x1c11   :  { %1974 = vrot.lane.b32.xlu0 %v1972_v45, %s2898_s24 }
0x1c83   :  { %v1975_v53 = vpop.permute.xlu0 %1974 }
0x1c84   :  { %v1977_v44 = vadd.f32 %v1975_v53, %v1967_v34 }
0x1c86   :  { %2729 = vtanh.f32 %v1977_v44 }
0x1c8c   :  { %v2730_v17 = vpop.eup %2729 }
0x1c8d   :  { %1980 = vrot.lane.b32.xlu1 %v2730_v17, %s2898_s24  ;;  %v2035_v17 = vrot.slane %v1977_v44, 7 }
0x1cff   :  { %v1981_v35 = vpop.permute.xlu1 %1980 }
0x1d00   :  { %v1983_v48 = vmul.f32 %v1981_v35, %v1961_v16 }
0x1d02   :  { %v1985_v9 = vrot.slane %v1983_v48, 3 }
0x1d04   :  { %1986 = vrot.lane.b32.xlu2 %v1985_v9, %s2899_s25 }
0x1d5e   :  { %v1987_v59 = vpop.permute.xlu2 %1986 }
0x1d5f   :  { %2602 = vmatmul.msk.f32.vlgmr.msra.gmra.mxu2 %vm1157_vm0, %v1987_v59 }
0x1d67   :  { %2610 = vmatmul.msk.f32.vlgmr.msrb.gmra.mxu2 %vm4935_vm2, %v4056_v56 }
0x1d6f   :  { %2611 = vmatmul.msk.f32.gmra.mxu2 %vm4936_vm10, %v4045_v29 }
0x1de2   :  { %v2007_v1 = vpop.f32.mrf.mxu2 }
0x1de3   :  { %v2011_v19 = vrot.slane %v2007_v1, 4 }
0x1de5   :  { %v2013_v47 = vadd.f32 %v2011_v19, %v4242_v25 }
0x1de7   :  { %2731 = vtanh.f32 %v2013_v47  ;;  %v2603_v12 = vmul.f32 -1.442695, %v2013_v47 }
0x1de9   :  { %2733 = vpow2.f32 %v2603_v12 }
0x1ded   :  { %v2732_v46 = vpop.eup %2731 }
0x1dee   :  { %2039 = vrot.lane.b32.xlu0 %v2732_v46, %s2898_s24 }
0x1def   :  { %v2734_v61 = vpop.eup %2733 }
0x1df0   :  { %v2017_v28 = vadd.f32 1.0, %v2734_v61 }
0x1df2   :  { %2735 = vrcp.f32 %v2017_v28  ;;  %v2029_v29 = vand.u32 2147483648, %v2017_v28  ;;  %vm2023_vm7 = vweird.f32 %v2017_v28  ;;  %v2027_v37 = vand.u32 2147483647, %v2017_v28 }
0x1df4   :  { %v2030_v45 = vor.u32 1.1754944e-38, %v2029_v29  ;;  %vm2028_vm8 = vcmp.eq.f32.partialorder %v2027_v37, 8.507059e+37 }
0x1df8   :  { %v2736_v62 = vpop.eup %2735 }
0x1df9   :  { %v2019_v58 = vmul.f32 %v2736_v62, %v2017_v28  ;;  %vm2024_vm13 = vweird.f32 %v2736_v62 }
0x1dfa   :  { %vm2025_vm14 = vmor %vm2023_vm7, %vm2024_vm13  ;;  %vm142_vm7 = vcmp.eq.s32.totalorder %v3159_v54, 0 }
0x1dfb   :  { %v2020_v38 = vsub.f32 1.0, %v2019_v58 }
0x1dfd   :  { %v2021_v56 = vmul.f32 %v2736_v62, %v2020_v38 }
0x1dff   :  { %v2022_v50 = vadd.f32 %v2736_v62, %v2021_v56 }
0x1e01   :  { %v2026_v16 = vsel %vm2025_vm14, %v2736_v62, %v2022_v50  ;;  %vm194_vm14 = vcmp.eq.s32.totalorder %v3159_v54, 1 }
0x1e02   :  { %v2031_v34 = vsel %vm2028_vm8, %v2030_v45, %v2026_v16  ;;  %vm4937_vm8 = vcmp.eq.s32.totalorder %v4882_v20, %v2952_v3 }
0x1e03   :  { %v2037_v35 = vmul.f32 %v2035_v17, %v2031_v34 }
0x1e60   :  { %v2040_v11 = vpop.permute.xlu0 %2039 }
0x1e61   :  { %v2042_v53 = vmul.f32 %v2040_v11, %v2031_v34 }
0x1e63   :  { %2044 = vrot.lane.b32.xlu1 %v2042_v53, %s2898_s24 }
0x1ed5   :  { %v2045_v48 = vpop.permute.xlu1 %2044 }
0x1ed6   :  { %v2047_v9 = vadd.f32 %v2045_v48, %v2037_v35 }
0x1ed8   :  { %2737 = vtanh.f32 %v2047_v9  ;;  %v2105_v35 = vrot.slane %v2047_v9, 7 }
0x1ede   :  { %v2738_v55 = vpop.eup %2737 }
0x1edf   :  { %2050 = vrot.lane.b32.xlu2 %v2738_v55, %s2898_s24 }
0x1f39   :  { %v2051_v27 = vpop.permute.xlu2 %2050 }
0x1f3a   :  { %v2053_v59 = vmul.f32 %v2051_v27, %v2031_v34 }
0x1f3c   :  { %v2055_v1 = vrot.slane %v2053_v59, 4 }
0x1f3e   :  { %2056 = vrot.lane.b32.xlu0 %v2055_v1, %s2899_s25 }
0x1fb0   :  { %v2057_v19 = vpop.permute.xlu0 %2056 }
0x1fb1   :  { %2604 = vmatmul.msk.f32.vlgmr.msrb.gmra.mxu3 %vm1157_vm0, %v2057_v19 }
0x2034   :  { %v2077_v47 = vpop.f32.mrf.mxu3 }
0x2035   :  { %v2081_v46 = vrot.slane %v2077_v47, 3 }
0x2037   :  { %v2083_v12 = vadd.f32 %v2081_v46, %v4242_v25 }
0x2039   :  { %2739 = vtanh.f32 %v2083_v12  ;;  %v2605_v61 = vmul.f32 -1.442695, %v2083_v12 }
0x203b   :  { %2741 = vpow2.f32 %v2605_v61 }
0x203f   :  { %v2740_v44 = vpop.eup %2739 }
0x2040   :  { %2109 = vrot.lane.b32.xlu1 %v2740_v44, %s2898_s24 }
0x2041   :  { %v2742_v28 = vpop.eup %2741 }
0x2042   :  { %v2087_v62 = vadd.f32 1.0, %v2742_v28 }
0x2044   :  { %2743 = vrcp.f32 %v2087_v62  ;;  %v2099_v37 = vand.u32 2147483648, %v2087_v62  ;;  %vm2093_vm3 = vweird.f32 %v2087_v62  ;;  %v2097_v16 = vand.u32 2147483647, %v2087_v62 }
0x2046   :  { %v2100_v11 = vor.u32 1.1754944e-38, %v2099_v37  ;;  %vm2098_vm6 = vcmp.eq.f32.partialorder %v2097_v16, 8.507059e+37 }
0x204a   :  { %v2744_v58 = vpop.eup %2743 }
0x204b   :  { %v2089_v38 = vmul.f32 %v2744_v58, %v2087_v62  ;;  %vm2094_vm5 = vweird.f32 %v2744_v58 }
0x204c   :  { %vm2095_vm4 = vmor %vm2093_vm3, %vm2094_vm5  ;;  %vm4938_vm3 = vcmp.eq.s32.totalorder %v4882_v20, %v4890_v60 }
0x204d   :  { %v2090_v56 = vsub.f32 1.0, %v2089_v38  ;;  %vm143_vm5 = vmand %vm142_vm7, %vm4937_vm8 }
0x204f   :  { %v2091_v50 = vmul.f32 %v2744_v58, %v2090_v56 }
0x2051   :  { %v2092_v29 = vadd.f32 %v2744_v58, %v2091_v50 }
0x2053   :  { %v2096_v45 = vsel %vm2095_vm4, %v2744_v58, %v2092_v29  ;;  %vm147_vm4 = vmand %vm142_vm7, %vm4938_vm3  ;;  %vm4943_vm3 = vcmp.eq.s32.totalorder %v4882_v20, %v2988_v10 }
0x2054   :  { %v2101_v53 = vsel %vm2098_vm6, %v2100_v11, %v2096_v45  ;;  %vm246_vm6 = vcmp.eq.s32.totalorder %v3159_v54, 2 }
0x2055   :  { %v2107_v48 = vmul.f32 %v2105_v35, %v2101_v53 }
0x20b2   :  { %v2110_v34 = vpop.permute.xlu1 %2109 }
0x20b3   :  { %v2112_v17 = vmul.f32 %v2110_v34, %v2101_v53 }
0x20b5   :  { %2114 = vrot.lane.b32.xlu2 %v2112_v17, %s2898_s24 }
0x210f   :  { %v2115_v55 = vpop.permute.xlu2 %2114 }
0x2110   :  { %v2117_v27 = vadd.f32 %v2115_v55, %v2107_v48 }
0x2112   :  { %2745 = vtanh.f32 %v2117_v27  ;;  %v2175_v48 = vrot.slane %v2117_v27, 7 }
0x2118   :  { %v2746_v59 = vpop.eup %2745 }
0x2119   :  { %2120 = vrot.lane.b32.xlu0 %v2746_v59, %s2898_s24 }
0x218b   :  { %v2121_v1 = vpop.permute.xlu0 %2120 }
0x218c   :  { %v2123_v19 = vmul.f32 %v2121_v1, %v2101_v53 }
0x218e   :  { %v2125_v47 = vrot.slane %v2123_v19, 5 }
0x2190   :  { %2126 = vrot.lane.b32.xlu1 %v2125_v47, %s2899_s25 }
0x2202   :  { %v2127_v46 = vpop.permute.xlu1 %2126 }
0x2203   :  { %2606 = vmatmul.msk.f32.vlgmr.msrb.gmra.mxu0 %vm1157_vm0, %v2127_v46 }
0x2280   :  { %v2147_v12 = vpop.f32.mrf.mxu0 }
0x2281   :  { %v2151_v44 = vrot.slane %v2147_v12, 2 }
0x2283   :  { %v2153_v61 = vadd.f32 %v2151_v44, %v4242_v25 }
0x2285   :  { %2747 = vtanh.f32 %v2153_v61  ;;  %v2607_v28 = vmul.f32 -1.442695, %v2153_v61 }
0x2287   :  { %2749 = vpow2.f32 %v2607_v28 }
0x228b   :  { %v2748_v9 = vpop.eup %2747 }
0x228c   :  { %2179 = vrot.lane.b32.xlu2 %v2748_v9, %s2898_s24 }
0x228d   :  { %v2750_v62 = vpop.eup %2749 }
0x228e   :  { %v2157_v58 = vadd.f32 1.0, %v2750_v62 }
0x2290   :  { %2751 = vrcp.f32 %v2157_v58  ;;  %v2169_v16 = vand.u32 2147483648, %v2157_v58  ;;  %vm2163_vm1 = vweird.f32 %v2157_v58  ;;  %v2167_v45 = vand.u32 2147483647, %v2157_v58 }
0x2292   :  { %v2170_v34 = vor.u32 1.1754944e-38, %v2169_v16  ;;  %vm2168_vm12 = vcmp.eq.f32.partialorder %v2167_v45, 8.507059e+37 }
0x2296   :  { %v2752_v38 = vpop.eup %2751 }
0x2297   :  { %v2159_v56 = vmul.f32 %v2752_v38, %v2157_v58  ;;  %vm2164_vm11 = vweird.f32 %v2752_v38 }
0x2298   :  { %vm2165_vm9 = vmor %vm2163_vm1, %vm2164_vm11  ;;  %vm4939_vm11 = vcmp.eq.s32.totalorder %v4882_v20, %v2963_v4 }
0x2299   :  { %v2160_v50 = vsub.f32 1.0, %v2159_v56  ;;  %vm195_vm1 = vmand %vm194_vm14, %vm4939_vm11  ;;  %vm4944_vm11 = vcmp.eq.s32.totalorder %v4882_v20, %v3370_v57 }
0x229b   :  { %v2161_v29 = vmul.f32 %v2752_v38, %v2160_v50 }
0x229d   :  { %v2162_v37 = vadd.f32 %v2752_v38, %v2161_v29 }
0x229f   :  { %v2166_v11 = vsel %vm2165_vm9, %v2752_v38, %v2162_v37  ;;  %vm4940_vm9 = vcmp.eq.s32.totalorder %v4882_v20, %v4927_v41 }
0x22a0   :  { %v2171_v17 = vsel %vm2168_vm12, %v2170_v34, %v2166_v11  ;;  %vm199_vm12 = vmand %vm194_vm14, %vm4940_vm9  ;;  %vm402_vm9 = vcmp.eq.s32.totalorder %v3159_v54, 5 }
0x22a1   :  { %v2177_v55 = vmul.f32 %v2175_v48, %v2171_v17 }
0x22e6   :  { %v2180_v53 = vpop.permute.xlu2 %2179 }
0x22e7   :  { %v2182_v35 = vmul.f32 %v2180_v53, %v2171_v17 }
0x22e9   :  { %2184 = vrot.lane.b32.xlu0 %v2182_v35, %s2898_s24 }
0x235b   :  { %v2185_v59 = vpop.permute.xlu0 %2184 }
0x235c   :  { %v2187_v1 = vadd.f32 %v2185_v59, %v2177_v55 }
0x235e   :  { %2753 = vtanh.f32 %v2187_v1  ;;  %v2245_v48 = vrot.slane %v2187_v1, 7  ;;  %v145_v1 = vsel %vm143_vm5, 1.0, %v4859_v0  ;;  %vm350_vm5 = vcmp.eq.s32.totalorder %v3159_v54, 4 }
0x2364   :  { %v2754_v19 = vpop.eup %2753 }
0x2365   :  { %2190 = vrot.lane.b32.xlu1 %v2754_v19, %s2898_s24 }
0x23d7   :  { %v2191_v47 = vpop.permute.xlu1 %2190 }
0x23d8   :  { %v2193_v46 = vmul.f32 %v2191_v47, %v2171_v17 }
0x23da   :  { %v2195_v12 = vrot.slane %v2193_v46, 6  ;;  %v149_v46 = vsel %vm147_vm4, 1.0, %v4859_v0 }
0x23dc   :  { %2196 = vrot.lane.b32.xlu2 %v2195_v12, %s2899_s25  ;;  %v151_v12 = vadd.f32 %v149_v46, %v145_v1 }
0x2436   :  { %v2197_v44 = vpop.permute.xlu2 %2196 }
0x2437   :  { %2608 = vmatmul.msk.f32.vlgmr.msrb.gmra.mxu1 %vm1157_vm0, %v2197_v44  ;;  %v197_v44 = vsel %vm195_vm1, 1.0, %v4859_v0 }
0x24b4   :  { %v2217_v61 = vpop.f32.mrf.mxu1 }
0x24b5   :  { %v2221_v9 = vrot.slane %v2217_v61, 1  ;;  %v201_v61 = vsel %vm199_vm12, 1.0, %v4859_v0  ;;  %vm4945_vm12 = vcmp.eq.s32.totalorder %v4882_v20, %v3008_v14 }
0x24b7   :  { %v2223_v28 = vadd.f32 %v2221_v9, %v4242_v25  ;;  %v203_v9 = vadd.f32 %v201_v61, %v197_v44 }
0x24b9   :  { %2755 = vtanh.f32 %v2223_v28  ;;  %v2609_v62 = vmul.f32 -1.442695, %v2223_v28 }
0x24bb   :  { %2757 = vpow2.f32 %v2609_v62  ;;  %v205_v62 = vadd.f32 %v203_v9, %v151_v12 }
0x24bf   :  { %v2756_v27 = vpop.eup %2755 }
0x24c0   :  { %2249 = vrot.lane.b32.xlu0 %v2756_v27, %s2898_s24 }
0x24c1   :  { %v2758_v58 = vpop.eup %2757 }
0x24c2   :  { %v2227_v38 = vadd.f32 1.0, %v2758_v58 }
0x24c4   :  { %2759 = vrcp.f32 %v2227_v38  ;;  %v2239_v45 = vand.u32 2147483648, %v2227_v38  ;;  %vm2233_vm2 = vweird.f32 %v2227_v38  ;;  %v2237_v11 = vand.u32 2147483647, %v2227_v38 }
0x24c6   :  { %v2240_v34 = vor.u32 1.1754944e-38, %v2239_v45  ;;  %vm2238_vm13 = vcmp.eq.f32.partialorder %v2237_v11, 8.507059e+37 }
0x24ca   :  { %v2760_v56 = vpop.eup %2759 }
0x24cb   :  { %v2229_v50 = vmul.f32 %v2760_v56, %v2227_v38  ;;  %vm2234_vm15 = vweird.f32 %v2760_v56 }
0x24cc   :  { %vm2235_vm10 = vmor %vm2233_vm2, %vm2234_vm15  ;;  %vm298_vm15 = vcmp.eq.s32.totalorder %v3159_v54, 3  ;;  %vm4941_vm2 = vcmp.eq.s32.totalorder %v4882_v20, %v2977_v7 }
0x24cd   :  { %v2230_v29 = vsub.f32 1.0, %v2229_v50  ;;  %vm299_vm4 = vmand %vm298_vm15, %vm4943_vm3  ;;  %vm4947_vm3 = vcmp.eq.s32.totalorder %v4882_v20, %v3024_v18 }
0x24ce   :  { %v301_v38 = vsel %vm299_vm4, 1.0, %v4859_v0  ;;  %vm303_vm1 = vmand %vm298_vm15, %vm4944_vm11  ;;  %vm4948_vm11 = vcmp.eq.s32.totalorder %v4882_v20, %v3471_v49 }
0x24cf   :  { %v2231_v37 = vmul.f32 %v2760_v56, %v2230_v29  ;;  %vm403_vm4 = vmand %vm402_vm9, %vm4947_vm3 }
0x24d1   :  { %v2232_v16 = vadd.f32 %v2760_v56, %v2231_v37 }
0x24d3   :  { %v2236_v25 = vsel %vm2235_vm10, %v2760_v56, %v2232_v16  ;;  %vm247_vm10 = vmand %vm246_vm6, %vm4941_vm2  ;;  %v305_v56 = vsel %vm303_vm1, 1.0, %v4859_v0 }
0x24d4   :  { %v4292_v17 = vsel %vm2238_vm13, %v2240_v34, %v2236_v25  ;;  %v249_v28 = vsel %vm247_vm10, 1.0, %v4859_v0  ;;  %vm4942_vm13 = vcmp.eq.s32.totalorder %v4882_v20, %v4895_v15  ;;  %vm351_vm2 = vmand %vm350_vm5, %vm4945_vm12  ;;  %v307_v29 = vadd.f32 %v305_v56, %v301_v38 }
0x24d5   :  { %v2247_v55 = vmul.f32 %v2245_v48, %v4292_v17  ;;  %vm251_vm8 = vmand %vm246_vm6, %vm4942_vm13  ;;  %v353_v37 = vsel %vm351_vm2, 1.0, %v4859_v0  ;;  %vm4946_vm10 = vcmp.eq.s32.totalorder %v4882_v20, %v3420_v40  ;;  %v405_v25 = vsel %vm403_vm4, 1.0, %v4859_v0 }
0x24d6   :  { %v253_v27 = vsel %vm251_vm8, 1.0, %v4859_v0  ;;  %vm355_vm13 = vmand %vm350_vm5, %vm4946_vm10  ;;  %vm4844_vm8 = vcmp.eq.s32.totalorder %v3159_v54, 6  ;;  %vm4839_vm12 = vcmp.eq.s32.totalorder %v3159_v54, 7  ;;  %vm4949_vm2 = vcmp.eq.s32.totalorder %v4882_v20, %v3053_v26 }
0x24d7   :  { %v255_v58 = vadd.f32 %v253_v27, %v249_v28  ;;  %v357_v16 = vsel %vm355_vm13, 1.0, %v4859_v0  ;;  %vm407_vm1 = vmand %vm402_vm9, %vm4948_vm11  ;;  %vm4950_vm13 = vcmp.eq.s32.totalorder %v4882_v20, %v3492_v23  ;;  %vm4840_vm4 = vcmp.eq.s32.totalorder %v3159_v54, 8 }
0x24d8   :  { %v359_v11 = vadd.f32 %v357_v16, %v353_v37  ;;  %v409_v34 = vsel %vm407_vm1, 1.0, %v4859_v0  ;;  %vm455_vm10 = vmand %vm4844_vm8, %vm4949_vm2  ;;  %vm4951_vm11 = vcmp.eq.s32.totalorder %v4882_v20, %v3066_v31  ;;  %vm4952_vm2 = vcmp.eq.s32.totalorder %v4882_v20, %v3514_v22 }
0x24d9   :  { %v257_v50 = vadd.f32 %v255_v58, %v205_v62  ;;  %v457_v48 = vsel %vm455_vm10, 1.0, %v4859_v0  ;;  %vm459_vm3 = vmand %vm4844_vm8, %vm4950_vm13  ;;  %vm4841_vm13 = vcmp.eq.s32.totalorder %v3159_v54, 9  ;;  %vm890_vm8 = vcmp.eq.s32.totalorder %v3159_v54, 15 }
0x24da   :  { %vm507_vm1 = vmand %vm4839_vm12, %vm4951_vm11 }
0x24db   :  { %v309_v45 = vadd.f32 %v307_v29, %v257_v50  ;;  %vm511_vm10 = vmand %vm4839_vm12, %vm4952_vm2  ;;  %vm4842_vm12 = vcmp.eq.s32.totalorder %v3159_v54, 10 }
0x24dc   :  { %v513_v1 = vsel %vm511_vm10, 1.0, %v4859_v0  ;;  %vm4955_vm10 = vcmp.eq.s32.totalorder %v4882_v20, %v3114_v43 }
0x2532   :  { %v2250_v53 = vpop.permute.xlu0 %2249 }
0x2533   :  { %v2252_v35 = vmul.f32 %v2250_v53, %v4292_v17  ;;  %v361_v53 = vadd.f32 %v359_v11, %v309_v45 }
0x2535   :  { %2254 = vrot.lane.b32.xlu1 %v2252_v35, %s2898_s24  ;;  %v411_v35 = vadd.f32 %v409_v34, %v405_v25 }
0x25a7   :  { %v2255_v59 = vpop.permute.xlu1 %2254 }
0x25a8   :  { %v2257_v19 = vadd.f32 %v2255_v59, %v2247_v55  ;;  %v461_v55 = vsel %vm459_vm3, 1.0, %v4859_v0  ;;  %v413_v59 = vadd.f32 %v411_v35, %v361_v53  ;;  %vm4953_vm3 = vcmp.eq.s32.totalorder %v4882_v20, %v3097_v39 }
0x25a9   :  { %vm555_vm11 = vmand %vm4840_vm4, %vm4953_vm3 }
0x25aa   :  { %2761 = vtanh.f32 %v2257_v19  ;;  %v463_v19 = vadd.f32 %v461_v55, %v457_v48  ;;  %v557_v44 = vsel %vm555_vm11, 1.0, %v4859_v0  ;;  %vm603_vm3 = vmand %vm4841_vm13, %vm4955_vm10  ;;  %vm4956_vm11 = vcmp.eq.s32.totalorder %v4882_v20, %v3542_v42 }
0x25ab   :  { %v605_v27 = vsel %vm603_vm3, 1.0, %v4859_v0  ;;  %vm4958_vm3 = vcmp.eq.s32.totalorder %v4882_v20, %v3545_v52 }
0x25ac   :  { %v465_v46 = vadd.f32 %v463_v19, %v413_v59 }
0x25b0   :  { %v2762_v47 = vpop.eup %2761 }
0x25b1   :  { %2260 = vrot.lane.b32.xlu2 %v2762_v47, %s2898_s24  ;;  %v509_v47 = vsel %vm507_vm1, 1.0, %v4859_v0  ;;  %vm4954_vm1 = vcmp.eq.s32.totalorder %v4882_v20, %v3535_v33 }
0x25b2   :  { %v515_v12 = vadd.f32 %v513_v1, %v509_v47  ;;  %vm559_vm2 = vmand %vm4840_vm4, %vm4954_vm1  ;;  %vm4843_vm4 = vcmp.eq.s32.totalorder %v3159_v54, 11 }
0x25b3   :  { %v561_v61 = vsel %vm559_vm2, 1.0, %v4859_v0  ;;  %vm607_vm1 = vmand %vm4841_vm13, %vm4956_vm11  ;;  %vm4957_vm2 = vcmp.eq.s32.totalorder %v4882_v20, %v3144_v51  ;;  %vm4845_vm13 = vcmp.eq.s32.totalorder %v3159_v54, 12 }
0x25b4   :  { %v517_v9 = vadd.f32 %v515_v12, %v465_v46  ;;  %v563_v28 = vadd.f32 %v561_v61, %v557_v44  ;;  %v609_v62 = vsel %vm607_vm1, 1.0, %v4859_v0  ;;  %vm651_vm10 = vmand %vm4842_vm12, %vm4957_vm2  ;;  %vm4959_vm1 = vcmp.eq.s32.totalorder %v4882_v20, %v4875_v5 }
0x25b5   :  { %v611_v38 = vadd.f32 %v609_v62, %v605_v27  ;;  %v653_v56 = vsel %vm651_vm10, 1.0, %v4859_v0  ;;  %vm655_vm11 = vmand %vm4842_vm12, %vm4958_vm3  ;;  %vm4960_vm10 = vcmp.eq.s32.totalorder %v4882_v20, %v3558_v36  ;;  %vm794_vm12 = vcmp.eq.s32.totalorder %v3159_v54, 13 }
0x25b6   :  { %v565_v58 = vadd.f32 %v563_v28, %v517_v9  ;;  %v657_v50 = vsel %vm655_vm11, 1.0, %v4859_v0  ;;  %vm699_vm2 = vmand %vm4843_vm4, %vm4959_vm1  ;;  %vm4961_vm11 = vcmp.eq.s32.totalorder %v4882_v20, %v4878_v8 }
0x25b7   :  { %v659_v37 = vadd.f32 %v657_v50, %v653_v56  ;;  %v701_v16 = vsel %vm699_vm2, 1.0, %v4859_v0  ;;  %vm703_vm3 = vmand %vm4843_vm4, %vm4960_vm10  ;;  %vm4962_vm2 = vcmp.eq.s32.totalorder %v4882_v20, %v4873_v63  ;;  %vm842_vm4 = vcmp.eq.s32.totalorder %v3159_v54, 14 }
0x25b8   :  { %v613_v29 = vadd.f32 %v611_v38, %v565_v58  ;;  %v705_v45 = vsel %vm703_vm3, 1.0, %v4859_v0  ;;  %vm747_vm1 = vmand %vm4845_vm13, %vm4961_vm11  ;;  %vm4963_vm3 = vcmp.eq.s32.totalorder %v4882_v20, %v3210_v6 }
0x25b9   :  { %v707_v25 = vadd.f32 %v705_v45, %v701_v16  ;;  %v749_v34 = vsel %vm747_vm1, 1.0, %v4859_v0  ;;  %vm751_vm10 = vmand %vm4845_vm13, %vm4962_vm2  ;;  %vm4964_vm1 = vcmp.eq.s32.totalorder %v4882_v20, %v3583_v13 }
0x25ba   :  { %v661_v11 = vadd.f32 %v659_v37, %v613_v29  ;;  %v753_v35 = vsel %vm751_vm10, 1.0, %v4859_v0  ;;  %vm795_vm11 = vmand %vm794_vm12, %vm4963_vm3  ;;  %vm4965_vm10 = vcmp.eq.s32.totalorder %v4882_v20, %v3254_v21 }
0x25bb   :  { %v755_v59 = vadd.f32 %v753_v35, %v749_v34  ;;  %v797_v19 = vsel %vm795_vm11, 1.0, %v4859_v0  ;;  %vm799_vm2 = vmand %vm794_vm12, %vm4964_vm1  ;;  %vm4966_vm11 = vcmp.eq.s32.totalorder %v4882_v20, %v3586_v32  ;;  %vm4967_vm1 = vcmp.eq.s32.totalorder %v4882_v20, %v3264_v24 }
0x25bc   :  { %v709_v55 = vadd.f32 %v707_v25, %v661_v11  ;;  %v801_v47 = vsel %vm799_vm2, 1.0, %v4859_v0  ;;  %vm843_vm3 = vmand %vm842_vm4, %vm4965_vm10  ;;  %vm4968_vm10 = vcmp.eq.s32.totalorder %v4882_v20, %v3642_v30 }
0x25bd   :  { %v803_v46 = vadd.f32 %v801_v47, %v797_v19  ;;  %v845_v12 = vsel %vm843_vm3, 1.0, %v4859_v0  ;;  %vm847_vm13 = vmand %vm842_vm4, %vm4966_vm11 }
0x25be   :  { %v849_v44 = vsel %vm847_vm13, 1.0, %v4859_v0  ;;  %vm891_vm2 = vmand %vm890_vm8, %vm4967_vm1  ;;  %vm4969_vm13 = vcmp.eq.s32.totalorder %v2946_v2, %v2952_v3  ;;  %vm4970_vm1 = vcmp.eq.s32.totalorder %v2946_v2, %v4890_v60 }
0x25bf   :  { %v851_v9 = vadd.f32 %v849_v44, %v845_v12  ;;  %v893_v28 = vsel %vm891_vm2, 1.0, %v4859_v0  ;;  %vm895_vm3 = vmand %vm890_vm8, %vm4968_vm10  ;;  %vm4971_vm10 = vcmp.eq.s32.totalorder %v2946_v2, %v2963_v4 }
0x25c0   :  { %v897_v27 = vsel %vm895_vm3, 1.0, %v4859_v0  ;;  %vm144_vm11 = vmand %vm142_vm7, %vm4969_vm13  ;;  %vm4972_vm13 = vcmp.eq.s32.totalorder %v2946_v2, %v4927_v41 }
0x25c1   :  { %v899_v58 = vadd.f32 %v897_v27, %v893_v28  ;;  %v146_v38 = vsel %vm144_vm11, 1.0, %v4859_v0  ;;  %vm148_vm2 = vmand %vm142_vm7, %vm4970_vm1  ;;  %vm4973_vm7 = vcmp.eq.s32.totalorder %v2946_v2, %v2977_v7 }
0x25c2   :  { %v150_v56 = vsel %vm148_vm2, 1.0, %v4859_v0  ;;  %vm196_vm3 = vmand %vm194_vm14, %vm4971_vm10  ;;  %vm4974_vm2 = vcmp.eq.s32.totalorder %v2946_v2, %v4895_v15  ;;  %vm4975_vm10 = vcmp.eq.s32.totalorder %v2946_v2, %v2988_v10 }
0x25c3   :  { %v152_v50 = vadd.f32 %v150_v56, %v146_v38  ;;  %v198_v29 = vsel %vm196_vm3, 1.0, %v4859_v0  ;;  %vm200_vm11 = vmand %vm194_vm14, %vm4972_vm13  ;;  %vm4976_vm13 = vcmp.eq.s32.totalorder %v2946_v2, %v3370_v57 }
0x25c4   :  { %v202_v60 = vsel %vm200_vm11, 1.0, %v4859_v0  ;;  %vm248_vm1 = vmand %vm246_vm6, %vm4973_vm7 }
0x25c5   :  { %v204_v37 = vadd.f32 %v202_v60, %v198_v29  ;;  %v250_v16 = vsel %vm248_vm1, 1.0, %v4859_v0  ;;  %vm252_vm14 = vmand %vm246_vm6, %vm4974_vm2  ;;  %vm4977_vm6 = vcmp.eq.s32.totalorder %v2946_v2, %v3008_v14  ;;  %vm4978_vm1 = vcmp.eq.s32.totalorder %v2946_v2, %v3420_v40 }
0x25c6   :  { %v254_v41 = vsel %vm252_vm14, 1.0, %v4859_v0  ;;  %vm300_vm3 = vmand %vm298_vm15, %vm4975_vm10  ;;  %vm4980_vm10 = vcmp.eq.s32.totalorder %v2946_v2, %v3471_v49 }
0x25c7   :  { %v206_v7 = vadd.f32 %v204_v37, %v152_v50  ;;  %v256_v45 = vadd.f32 %v254_v41, %v250_v16  ;;  %v302_v11 = vsel %vm300_vm3, 1.0, %v4859_v0  ;;  %vm304_vm11 = vmand %vm298_vm15, %vm4976_vm13  ;;  %vm4979_vm15 = vcmp.eq.s32.totalorder %v2946_v2, %v3024_v18 }
0x25c8   :  { %v306_v15 = vsel %vm304_vm11, 1.0, %v4859_v0  ;;  %vm352_vm7 = vmand %vm350_vm5, %vm4977_vm6  ;;  %vm4982_vm13 = vcmp.eq.s32.totalorder %v3159_v54, 6  ;;  %vm4983_vm6 = vcmp.eq.s32.totalorder %v2946_v2, %v3492_v23 }
0x25c9   :  { %v258_v10 = vadd.f32 %v256_v45, %v206_v7  ;;  %v308_v25 = vadd.f32 %v306_v15, %v302_v11  ;;  %v354_v34 = vsel %vm352_vm7, 1.0, %v4859_v0  ;;  %vm356_vm2 = vmand %vm350_vm5, %vm4978_vm1  ;;  %vm4981_vm5 = vcmp.eq.s32.totalorder %v2946_v2, %v3053_v26 }
0x25ca   :  { %v358_v57 = vsel %vm356_vm2, 1.0, %v4859_v0  ;;  %vm404_vm14 = vmand %vm402_vm9, %vm4979_vm15  ;;  %vm4986_vm2 = vcmp.eq.s32.totalorder %v3159_v54, 7 }
0x25cb   :  { %v310_v14 = vadd.f32 %v308_v25, %v258_v10  ;;  %v406_v35 = vsel %vm404_vm14, 1.0, %v4859_v0  ;;  %vm408_vm3 = vmand %vm402_vm9, %vm4980_vm10  ;;  %vm4985_vm9 = vcmp.eq.s32.totalorder %v2946_v2, %v3066_v31  ;;  %vm4987_vm14 = vcmp.eq.s32.totalorder %v2946_v2, %v3514_v22 }
0x25cc   :  { %v410_v40 = vsel %vm408_vm3, 1.0, %v4859_v0  ;;  %vm456_vm11 = vmand %vm4982_vm13, %vm4981_vm5  ;;  %vm4989_vm5 = vcmp.eq.s32.totalorder %v2946_v2, %v3097_v39 }
0x25cd   :  { %vm4984_vm7 = vmmov %vm4982_vm13  ;;  %vm4990_vm13 = vcmp.eq.s32.totalorder %v3159_v54, 8 }
0x25ce   :  { %vm460_vm1 = vmand %vm4984_vm7, %vm4983_vm6  ;;  %vm4991_vm6 = vcmp.eq.s32.totalorder %v2946_v2, %v3535_v33 }
0x25cf   :  { %v462_v49 = vsel %vm460_vm1, 1.0, %v4859_v0  ;;  %vm508_vm15 = vmand %vm4986_vm2, %vm4985_vm9  ;;  %vm4993_vm9 = vcmp.eq.s32.totalorder %v2946_v2, %v3114_v43 }
0x25d0   :  { %v510_v19 = vsel %vm508_vm15, 1.0, %v4859_v0  ;;  %vm4988_vm10 = vmmov %vm4986_vm2  ;;  %vm4994_vm2 = vcmp.eq.s32.totalorder %v3159_v54, 9 }
0x25d1   :  { %vm512_vm3 = vmand %vm4988_vm10, %vm4987_vm14  ;;  %vm4995_vm14 = vcmp.eq.s32.totalorder %v2946_v2, %v3542_v42 }
0x25d2   :  { %v514_v23 = vsel %vm512_vm3, 1.0, %v4859_v0  ;;  %vm4992_vm7 = vmmov %vm4990_vm13 }
0x25d3   :  { %v516_v47 = vadd.f32 %v514_v23, %v510_v19  ;;  %vm560_vm1 = vmand %vm4992_vm7, %vm4991_vm6  ;;  %vm4999_vm6 = vcmp.eq.s32.totalorder %v2946_v2, %v3545_v52  ;;  %v2343_v23 = vpop.f32.mrf.mxu2 }
0x25d4   :  { %v562_v22 = vsel %vm560_vm1, 1.0, %v4859_v0  ;;  %vm604_vm15 = vmand %vm4994_vm2, %vm4993_vm9  ;;  %vm5001_vm9 = vcmp.eq.s32.totalorder %v2946_v2, %v4875_v5 }
0x25d5   :  { %vm4996_vm10 = vmmov %vm4994_vm2  ;;  %vm5002_vm2 = vcmp.eq.s32.totalorder %v3159_v54, 11 }
0x25d6   :  { %vm608_vm3 = vmand %vm4996_vm10, %vm4995_vm14  ;;  %vm5003_vm14 = vcmp.eq.s32.totalorder %v2946_v2, %v3558_v36 }
0x25d7   :  { %v610_v33 = vsel %vm608_vm3, 1.0, %v4859_v0  ;;  %vm5004_vm10 = vmmov %vm5002_vm2 }
0x25d8   :  { %vm704_vm3 = vmand %vm5004_vm10, %vm5003_vm14  ;;  %vm5011_vm10 = vcmp.eq.s32.totalorder %v2946_v2, %v3254_v21 }
0x25d9   :  { %v706_v52 = vsel %vm704_vm3, 1.0, %v4859_v0  ;;  %vm844_vm3 = vmand %vm842_vm4, %vm5011_vm10 }
0x25da   :  { %v846_v56 = vsel %vm844_vm3, 1.0, %v4859_v0 }
0x260b   :  { %v2261_v53 = vpop.permute.xlu2 %2260 }
0x260c   :  { %v2263_v48 = vmul.f32 %v2261_v53, %v4292_v17  ;;  %v757_v17 = vadd.f32 %v755_v59, %v709_v55  ;;  %v360_v53 = vadd.f32 %v358_v57, %v354_v34  ;;  %v458_v55 = vsel %vm456_vm11, 1.0, %v4859_v0  ;;  %vm556_vm11 = vmand %vm4990_vm13, %vm4989_vm5 }
0x260d   :  { %v464_v59 = vadd.f32 %v462_v49, %v458_v55  ;;  %vm4997_vm5 = vcmp.eq.s32.totalorder %v2946_v2, %v3144_v51  ;;  %vm4998_vm13 = vcmp.eq.s32.totalorder %v3159_v54, 10 }
0x260e   :  { %v2275_v1 = vperm.slane %v2263_v48, 7  ;;  %v805_v61 = vadd.f32 %v803_v46, %v757_v17  ;;  %v362_v18 = vadd.f32 %v360_v53, %v310_v14  ;;  %v412_v48 = vadd.f32 %v410_v40, %v406_v35  ;;  %vm5000_vm7 = vmmov %vm4998_vm13 }
0x260f   :  { %v606_v46 = vsel %vm604_vm15, 1.0, %v4859_v0  ;;  %vm656_vm1 = vmand %vm5000_vm7, %vm4999_vm6  ;;  %vm5007_vm6 = vcmp.eq.s32.totalorder %v2946_v2, %v4873_v63 }
0x2610   :  { %2277 = vrot.lane.b32.xlu0 %v2275_v1, %s2899_s25  ;;  %v853_v62 = vadd.f32 %v851_v9, %v805_v61  ;;  %v414_v26 = vadd.f32 %v412_v48, %v362_v18  ;;  %v558_v1 = vsel %vm556_vm11, 1.0, %v4859_v0  ;;  %vm652_vm11 = vmand %vm4998_vm13, %vm4997_vm5  ;;  %v612_v12 = vadd.f32 %v610_v33, %v606_v46 }
0x2611   :  { %v564_v17 = vadd.f32 %v562_v22, %v558_v1  ;;  %v654_v44 = vsel %vm652_vm11, 1.0, %v4859_v0  ;;  %v658_v42 = vsel %vm656_vm1, 1.0, %v4859_v0  ;;  %vm700_vm15 = vmand %vm5002_vm2, %vm5001_vm9  ;;  %vm5005_vm5 = vcmp.eq.s32.totalorder %v2946_v2, %v4878_v8 }
0x2612   :  { %v4525_v3 = vadd.f32 %v899_v58, %v853_v62  ;;  %v466_v31 = vadd.f32 %v464_v59, %v414_v26  ;;  %v660_v61 = vadd.f32 %v658_v42, %v654_v44  ;;  %v702_v9 = vsel %vm700_vm15, 1.0, %v4859_v0 }
0x2613   :  { %vm5006_vm13 = vcmp.eq.s32.totalorder %v3159_v54, 12  ;;  %v708_v28 = vadd.f32 %v706_v52, %v702_v9  ;;  %vm5009_vm9 = vcmp.eq.s32.totalorder %v2946_v2, %v3210_v6  ;;  %vm5010_vm15 = vcmp.eq.s32.totalorder %v2946_v2, %v3583_v13  ;;  %v2629_v9 = vld [vmem:[#allocation9 + $0x3] ss:$0 sm:$0xff]  ;;  %v2346_v52 = vpop.f32.mrf.mxu2 }
0x2614   :  { %v2264_v4 = vsel %vm1157_vm0, %v4525_v3, 0.0  ;;  %v518_v39 = vadd.f32 %v516_v47, %v466_v31  ;;  %vm748_vm11 = vmand %vm5006_vm13, %vm5005_vm5  ;;  %vm5012_vm5 = vcmp.eq.s32.totalorder %v2946_v2, %v3586_v32 }
0x2615   :  { %2265 = vadd.xlane.f32.xlu1 %v2264_v4  ;;  %v750_v27 = vsel %vm748_vm11, 1.0, %v4859_v0  ;;  %vm5008_vm7 = vmmov %vm5006_vm13 }
0x2616   :  { %v566_v43 = vadd.f32 %v564_v17, %v518_v39  ;;  %vm752_vm1 = vmand %vm5008_vm7, %vm5007_vm6  ;;  %vm5014_vm6 = vcmp.eq.s32.totalorder %v2946_v2, %v3642_v30  ;;  %v2627_v39 = vld [vmem:[#allocation9 + $0x2] ss:$0 sm:$0xff] }
0x2617   :  { %v754_v36 = vsel %vm752_vm1, 1.0, %v4859_v0  ;;  %vm796_vm2 = vmand %vm794_vm12, %vm5009_vm9 }
0x2618   :  { %v614_v51 = vadd.f32 %v612_v12, %v566_v43  ;;  %v756_v62 = vadd.f32 %v754_v36, %v750_v27  ;;  %v798_v58 = vsel %vm796_vm2, 1.0, %v4859_v0  ;;  %vm800_vm14 = vmand %vm794_vm12, %vm5010_vm15  ;;  %vm5013_vm12 = vcmp.eq.s32.totalorder %v2946_v2, %v3264_v24 }
0x2619   :  { %v802_v63 = vsel %vm800_vm14, 1.0, %v4859_v0  ;;  %vm848_vm13 = vmand %vm842_vm4, %vm5012_vm5  ;;  %vm2267_vm4 = vcmask 257024  }
0x261a   :  { %v662_v5 = vadd.f32 %v660_v61, %v614_v51  ;;  %v804_v38 = vadd.f32 %v802_v63, %v798_v58  ;;  %v850_v13 = vsel %vm848_vm13, 1.0, %v4859_v0  ;;  %vm892_vm11 = vmand %vm890_vm8, %vm5013_vm12  ;;  %v2628_v61 = vld [vmem:[#allocation9 + $0x4] ss:$0 sm:$0xff]  ;;  %vm2352_vm13 = vcmask 64512  }
0x261b   :  { %v852_v50 = vadd.f32 %v850_v13, %v846_v56  ;;  %v894_v29 = vsel %vm892_vm11, 1.0, %v4859_v0  ;;  %vm896_vm7 = vmand %vm890_vm8, %vm5014_vm6  ;;  %vm2356_vm12 = vcmask 60416   ;;  %vm5015_vm11 = vcmask 1043456  }
0x261c   :  { %v710_v8 = vadd.f32 %v708_v28, %v662_v5  ;;  %v898_v32 = vsel %vm896_vm7, 1.0, %v4859_v0  ;;  %vm2398_vm6 = vcmp.eq.s32.totalorder %v4882_v20, %v3159_v54  ;;  %v2372_v56 = vadd.s32 4294967288, %v3159_v54 }
0x261d   :  { %v900_v4 = vadd.f32 %v898_v32, %v894_v29  ;;  %vm2374_vm7 = vcmask 130112  }
0x261e   :  { %v758_v6 = vadd.f32 %v756_v62, %v710_v8 }
0x2620   :  { %v806_v21 = vadd.f32 %v804_v38, %v758_v6 }
0x2622   :  { %v854_v60 = vadd.f32 %v852_v50, %v806_v21  ;;  %v2400_v21 = vsel %vm2398_vm6, 1.0, %v4859_v0 }
0x2624   :  { %v902_v37 = vadd.f32 %v900_v4, %v854_v60  ;;  %v5016_v60 = vld [vmem:[#allocation26_spill] sm:$0xff] }
0x2625   :  { %v2402_v4 = vadd.f32 %v2400_v21, %v5016_v60 }
0x2626   :  { %v2268_v24 = vsel %vm2267_vm4, %v902_v37, 0.0 }
0x2627   :  { %2269 = vadd.xlane.f32.xlu2 %v2268_v24 }
0x2682   :  { %v2278_v16 = vpop.permute.xlu0 %2277 }
0x2683   :  { %v2280_v41 = vmul.f32 %v2278_v16, %v4525_v3  ;;  %v2281_v7 = vmul.f32 %v2278_v16, %v902_v37 }
0x2685   :  { %v2285_v45 = vsel %vm2267_vm4, %v2281_v7, 0.0  ;;  %v2282_v11 = vsel %vm1157_vm0, %v2280_v41, 0.0  ;;  %vm2399_vm4 = vcmp.eq.s32.totalorder %v2946_v2, %v3159_v54  ;;  %v5017_v7 = vld [vmem:[#allocation25_spill] sm:$0xff] }
0x2686   :  { %2286 = vadd.xlane.f32.xlu2 %v2285_v45  ;;  %2283 = vadd.xlane.f32.xlu0 %v2282_v11  ;;  %v2401_v16 = vsel %vm2399_vm4, 1.0, %v4859_v0 }
0x2687   :  { %v2403_v45 = vadd.f32 %v2401_v16, %v5017_v7 }
0x2688   :  { %v2266_v30 = vpop.xlane.xlu1 %2265 }
0x2689   :  { %vm2271_vm8 = vcmp.eq.f32.partialorder %v2266_v30, 0.0 }
0x268a   :  { %v2273_v10 = vsel %vm2271_vm8, 1.0, %v2266_v30 }
0x268b   :  { %2763 = vrcp.f32 %v2273_v10  ;;  %vm2293_vm9 = vweird.f32 %v2273_v10  ;;  %v2299_v48 = vand.u32 2147483648, %v2273_v10  ;;  %v2297_v26 = vand.u32 2147483647, %v2273_v10 }
0x268d   :  { %v2300_v31 = vor.u32 1.1754944e-38, %v2299_v48  ;;  %vm2298_vm3 = vcmp.eq.f32.partialorder %v2297_v26, 8.507059e+37 }
0x2691   :  { %v2764_v34 = vpop.eup %2763 }
0x2692   :  { %v2289_v14 = vmul.f32 %v2764_v34, %v2273_v10  ;;  %vm2294_vm0 = vweird.f32 %v2764_v34 }
0x2693   :  { %vm2295_vm14 = vmor %vm2293_vm9, %vm2294_vm0  ;;  %vm5018_vm9 = vcmask 97280  }
0x2694   :  { %v2290_v35 = vsub.f32 1.0, %v2289_v14 }
0x2696   :  { %v2291_v40 = vmul.f32 %v2764_v34, %v2290_v35 }
0x2698   :  { %v2292_v49 = vadd.f32 %v2764_v34, %v2291_v40 }
0x269a   :  { %v2270_v15 = vpop.xlane.xlu2 %2269  ;;  %v2296_v1 = vsel %vm2295_vm14, %v2764_v34, %v2292_v49  ;;  %vm5019_vm14 = vmmov %vm5018_vm9 }
0x269b   :  { %vm2272_vm1 = vcmp.eq.f32.partialorder %v2270_v15, 0.0  ;;  %v2301_v17 = vsel %vm2298_vm3, %v2300_v31, %v2296_v1 }
0x269c   :  { %v2274_v25 = vsel %vm2272_vm1, 1.0, %v2270_v15  ;;  %vm2404_vm1 = vcmp.gt.f32.partialorder %v2402_v4, 0.0 }
0x269d   :  { %2765 = vrcp.f32 %v2274_v25  ;;  %vm2308_vm2 = vweird.f32 %v2274_v25  ;;  %v2314_v55 = vand.u32 2147483648, %v2274_v25  ;;  %v2312_v19 = vand.u32 2147483647, %v2274_v25 }
0x269f   :  { %v2315_v47 = vor.u32 1.1754944e-38, %v2314_v55  ;;  %vm2313_vm5 = vcmp.eq.f32.partialorder %v2312_v19, 8.507059e+37 }
0x26a3   :  { %v2766_v57 = vpop.eup %2765 }
0x26a4   :  { %v2304_v53 = vmul.f32 %v2766_v57, %v2274_v25  ;;  %vm2309_vm15 = vweird.f32 %v2766_v57 }
0x26a5   :  { %vm2310_vm10 = vmor %vm2308_vm2, %vm2309_vm15  ;;  %vm2405_vm2 = vcmp.gt.f32.partialorder %v2403_v45, 0.0  ;;  %vm2411_vm15 = vcmask 93184  }
0x26a6   :  { %v2305_v3 = vsub.f32 1.0, %v2304_v53 }
0x26a8   :  { %v2306_v18 = vmul.f32 %v2766_v57, %v2305_v3 }
0x26aa   :  { %v2307_v59 = vadd.f32 %v2766_v57, %v2306_v18 }
0x26ac   :  { %v2311_v22 = vsel %vm2310_vm10, %v2766_v57, %v2307_v59 }
0x26ad   :  { %v2316_v33 = vsel %vm2313_vm5, %v2315_v47, %v2311_v22 }
0x26f9   :  { %v2284_v46 = vpop.xlane.xlu0 %2283  ;;  %v2287_v43 = vpop.xlane.xlu2 %2286 }
0x26fa   :  { %v2302_v12 = vmul.f32 %v2301_v17, %v2284_v46  ;;  %v2317_v44 = vmul.f32 %v2316_v33, %v2287_v43 }
0x26fc   :  { %v2319_v42 = vmul.f32 %v2627_v39, %v2302_v12  ;;  %v2320_v51 = vmul.f32 %v2627_v39, %v2317_v44 }
0x26fe   :  { %v2347_v5 = vadd.f32 %v2346_v52, %v2320_v51  ;;  %v2344_v28 = vadd.f32 %v2343_v23, %v2319_v42 }
0x2700   :  { %2612 = vmatpush.msk.msra.mxu3 %vm5015_vm11, %v2347_v5  ;;  %v2361_v27 = vmul.f32 %v2628_v61, %v2344_v28  ;;  %v2350_v36 = vmul.f32 %v2629_v9, %v2344_v28  ;;  %v2351_v8 = vmul.f32 %v2629_v9, %v2347_v5  ;;  %v2362_v6 = vmul.f32 %v2628_v61, %v2347_v5 }
0x2702   :  { %2484 = vmatpush.msra.mxu3 %v2344_v28  ;;  %v2363_v62 = vsel %vm2352_vm13, %v2361_v27, 0.0  ;;  %v2353_v58 = vsel %vm2352_vm13, %v2350_v36, 0.0  ;;  %v2357_v63 = vsel %vm2356_vm12, %v2351_v8, 0.0  ;;  %v2366_v38 = vsel %vm2356_vm12, %v2362_v6, 0.0 }
0x2703   :  { %2364 = vadd.xlane.f32.xlu0 %v2363_v62  ;;  %2354 = vadd.xlane.f32.xlu1 %v2353_v58 }
0x2704   :  { %2358 = vadd.xlane.f32.xlu2 %v2357_v63  ;;  %v2630_v63 = vld [vmem:[#allocation9 + $0x5] ss:$0 sm:$0xff] }
0x270b   :  { %2367 = vadd.xlane.f32.xlu1 %v2366_v38 }
0x2776   :  { %v2355_v13 = vpop.xlane.xlu1 %2354  ;;  %v2365_v37 = vpop.xlane.xlu0 %2364 }
0x2777   :  { %v2371_v50 = vperm.slane %v2355_v13, %v3159_v54  ;;  %v2359_v29 = vpop.xlane.xlu2 %2358 }
0x2778   :  { %v2373_v32 = vperm.slane %v2359_v29, %v2372_v56 }
0x277a   :  { %v2375_v24 = vsel %vm2374_vm7, %v2373_v32, %v2371_v50 }
0x277b   :  { %v2390_v20 = vadd.f32 %v2375_v24, %v2365_v37 }
0x277d   :  { %vm2392_vm8 = vcmp.ge.f32.partialorder %v2390_v20, 0.0  ;;  %v2394_v41 = vmul.f32 0.2, %v2390_v20 }
0x277e   :  { %v2368_v11 = vpop.xlane.xlu1 %2367 }
0x277f   :  { %v2391_v30 = vadd.f32 %v2375_v24, %v2368_v11  ;;  %v2396_v15 = vsel %vm2392_vm8, %v2390_v20, %v2394_v41  ;;  %vm5020_vm8 = vmmov %vm5018_vm9  ;;  %v96_v41 = vld [vmem:[#allocation9 + $0x6] sm:$0x1] }
0x2780   :  { %v2406_v10 = vsel %vm2404_vm1, %v2396_v15, -1e+30 }
0x2781   :  { %v2395_v25 = vmul.f32 0.2, %v2391_v30  ;;  %v2408_v2 = vsel %vm5018_vm9, %v2406_v10, -inf  ;;  %vm2393_vm0 = vcmp.ge.f32.partialorder %v2391_v30, 0.0  ;;  %vm5021_vm9 = vmmov %vm5020_vm8 }
0x2782   :  { %2409 = vmax.xlane.f32.xlu2 %v2408_v2 }
0x2783   :  { %v2397_v54 = vsel %vm2393_vm0, %v2391_v30, %v2395_v25  ;;  %vm2505_vm0 = vcmask 57344   ;;  %v97_v30 = vld [vmem:[#allocation9 + $0x7] sm:$0x1] }
0x2784   :  { %v2407_v34 = vsel %vm2405_vm2, %v2397_v54, -1e+30 }
0x2785   :  { %v2412_v0 = vsel %vm2411_vm15, %v2407_v34, -inf }
0x2786   :  { %2413 = vmax.xlane.f32.xlu0 %v2412_v0 }
0x27f5   :  { %v2410_v57 = vpop.xlane.xlu2 %2409 }
0x27f6   :  { %v2415_v14 = vsub.f32 %v2406_v10, %v2410_v57 }
0x27f8   :  { %v2417_v53 = vmul.f32 1.442695, %v2415_v14 }
0x27f9   :  { %v2414_v35 = vpop.xlane.xlu0 %2413 }
0x27fa   :  { %2767 = vpow2.f32 %v2417_v53  ;;  %v2416_v3 = vsub.f32 %v2407_v34, %v2414_v35 }
0x27fc   :  { %v2419_v40 = vmul.f32 1.442695, %v2416_v3 }
0x27fe   :  { %2769 = vpow2.f32 %v2419_v40 }
0x2800   :  { %v2768_v18 = vpop.eup %2767 }
0x2801   :  { %v2421_v48 = vmul.f32 %v2768_v18, %v2402_v4 }
0x2803   :  { %v2423_v55 = vsel %vm5019_vm14, %v2421_v48, 0.0 }
0x2804   :  { %v2770_v49 = vpop.eup %2769  ;;  %2424 = vadd.xlane.f32.xlu1 %v2423_v55 }
0x2805   :  { %v2422_v26 = vmul.f32 %v2770_v49, %v2403_v45 }
0x2807   :  { %v2426_v59 = vsel %vm2411_vm15, %v2422_v26, 0.0 }
0x2808   :  { %2427 = vadd.xlane.f32.xlu2 %v2426_v59 }
0x2877   :  { %v2425_v19 = vpop.xlane.xlu1 %2424 }
0x2878   :  { %2771 = vrcp.f32 %v2425_v19  ;;  %v2440_v39 = vand.u32 2147483648, %v2425_v19  ;;  %v2438_v46 = vand.u32 2147483647, %v2425_v19  ;;  %vm2434_vm3 = vweird.f32 %v2425_v19 }
0x287a   :  { %v2441_v44 = vor.u32 1.1754944e-38, %v2440_v39  ;;  %vm2439_vm11 = vcmp.eq.f32.partialorder %v2438_v46, 8.507059e+37 }
0x287b   :  { %v2428_v23 = vpop.xlane.xlu2 %2427 }
0x287c   :  { %2773 = vrcp.f32 %v2428_v23  ;;  %v2455_v9 = vand.u32 2147483648, %v2428_v23  ;;  %vm2449_vm7 = vweird.f32 %v2428_v23  ;;  %v2453_v28 = vand.u32 2147483647, %v2428_v23 }
0x287e   :  { %v2772_v31 = vpop.eup %2771  ;;  %v2456_v36 = vor.u32 1.1754944e-38, %v2455_v9  ;;  %vm2454_vm1 = vcmp.eq.f32.partialorder %v2453_v28, 8.507059e+37 }
0x287f   :  { %v2430_v47 = vmul.f32 %v2772_v31, %v2425_v19  ;;  %vm2435_vm10 = vweird.f32 %v2772_v31 }
0x2880   :  { %vm2436_vm5 = vmor %vm2434_vm3, %vm2435_vm10 }
0x2881   :  { %v2431_v1 = vsub.f32 1.0, %v2430_v47 }
0x2882   :  { %v2774_v22 = vpop.eup %2773 }
0x2883   :  { %v2432_v17 = vmul.f32 %v2772_v31, %v2431_v1  ;;  %v2445_v33 = vmul.f32 %v2774_v22, %v2428_v23  ;;  %vm2450_vm6 = vweird.f32 %v2774_v22 }
0x2884   :  { %vm2451_vm4 = vmor %vm2449_vm7, %vm2450_vm6 }
0x2885   :  { %v2433_v43 = vadd.f32 %v2772_v31, %v2432_v17  ;;  %v2446_v12 = vsub.f32 1.0, %v2445_v33 }
0x2887   :  { %v2437_v42 = vsel %vm2436_vm5, %v2772_v31, %v2433_v43  ;;  %v2447_v51 = vmul.f32 %v2774_v22, %v2446_v12 }
0x2888   :  { %v2442_v61 = vsel %vm2439_vm11, %v2441_v44, %v2437_v42 }
0x2889   :  { %v2443_v52 = vmul.f32 %v2442_v61, %v2421_v48  ;;  %v2448_v5 = vadd.f32 %v2774_v22, %v2447_v51 }
0x288b   :  { %2613 = vmatmul.msk.f32.vlgmr.msra.gmra.mxu3 %vm5020_vm8, %v2443_v52  ;;  %v2452_v27 = vsel %vm2451_vm4, %v2774_v22, %v2448_v5 }
0x288c   :  { %v2457_v8 = vsel %vm2454_vm1, %v2456_v36, %v2452_v27 }
0x288d   :  { %v2458_v62 = vmul.f32 %v2457_v8, %v2422_v26 }
0x2893   :  { %2614 = vmatmul.msk.f32.gmra.mxu3 %vm5021_vm9, %v2458_v62 }
0x290e   :  { %v2486_v58 = vpop.f32.mrf.mxu3 }
0x290f   :  { %v2487_v6 = vadd.f32 %v2630_v63, %v2486_v58 }
0x2911   :  { %v2492_v56 = vmax.f32 %v2487_v6, 0.0 }
0x2913   :  { %v2494_v50 = vsel %vm2352_vm13, %v2492_v56, 0.0  ;;  %vm2510_vm13 = vcmask 0  }
0x2916   :  { %v2489_v38 = vpop.f32.mrf.mxu3 }
0x2917   :  { %v2490_v13 = vadd.f32 %v2630_v63, %v2489_v38 }
0x2919   :  { %v2493_v21 = vmax.f32 %v2490_v13, 0.0 }
0x291b   :  { %v2495_v29 = vsel %vm2356_vm12, %v2493_v21, 0.0 }
0x291c   :  { %v2496_v32 = vadd.f32 %v2495_v29, %v2494_v50 }
0x291e   :  { %v2497_v60 = vrot.slane %v2496_v32, 4 }
0x2920   :  { %v2498_v4 = vadd.f32 %v2497_v60, %v2496_v32 }
0x2922   :  { %v2499_v37 = vrot.slane %v2498_v4, 2 }
0x2924   :  { %v2500_v24 = vadd.f32 %v2499_v37, %v2498_v4 }
0x2926   :  { %v2501_v16 = vrot.slane %v2500_v24, 1 }
0x2928   :  { %v2502_v20 = vadd.f32 %v2501_v16, %v2500_v24 }
0x292a   :  { %v2503_v7 = vmul.f32 0.083333336, %v2502_v20 }
0x292c   :  { %v2504_v45 = vmul.f32 %v2503_v7, %v96_v41 }
0x292e   :  { %v2506_v11 = vsel %vm2505_vm0, %v2504_v45, 0.0 }
0x292f   :  { %2507 = vadd.xlane.f32.xlu0 %v2506_v11 }
0x29a2   :  { %v2508_v15 = vpop.xlane.xlu0 %2507 }
0x29a3   :  { %v2509_v10 = vadd.f32 %v2508_v15, %v97_v30 }
0x29a5   :  { %2511 = vst.msk [vmem:[#allocation10] sm:$0x1] %vm2510_vm13, %v2509_v10 }
0x29a6   :  { %2522 = dma.vmem_to_hbm [thread:$0]  %s2518_s27, 16, %s2520_s29, [#allocation4]  }
0x29a7   :  { %2889 = dma.done.wait [#allocation4], 16  }
0x29a8   :  { %2890 = vsyncadd [#allocation4], 4294967280 }
0x29a9   :  { %2527 = vsyncpa [#allocation3], 1 }
0x29aa   :  { %2528 = vsyncpa [#allocation8], 1 }
0x29ab   :  { %2529 = vsyncpa [#allocation4], 1 }
0x29ac   :  { %2530 = vsyncpa [#allocation5], 1 }

</bundles_post_ra>
